<compile_context>
chip_gen: v6e
topology: v6e:2x2x1
jax: 0.10.0
libtpu: 0.0.40
codegen_flags: <defaults>
</compile_context>

<pallas_src>
import functools
import math

import jax
import jax.numpy as jnp
from jax.experimental import pallas as pl
from jax.experimental.pallas import tpu as pltpu


def encoder_layer_kernel(
    x_ref,            # (Bb, S, E) f32  -- this block of batch elements
    in_wt_ref,        # (E, 3E) bf16  in_proj_weight, pre-transposed, head-grouped cols
    in_b_ref,         # (1, 3E) f32   head-grouped
    out_wt_ref,       # (E, E)  bf16  out_proj.weight, pre-transposed
    out_b_ref,        # (1, E)  f32
    w1t_ref,          # (E, F)  bf16  linear1.weight, pre-transposed
    b1_ref,           # (1, F)  f32
    w2t_ref,          # (F, E)  bf16  linear2.weight, pre-transposed
    b2_ref,           # (1, E)  f32
    a1_ref, c1_ref,   # (1, E)  f32   folded norm1:  y = x*a1 + c1
    a2_ref, c2_ref,   # (1, E)  f32   folded norm2
    o_ref,            # (Bb, S, E) f32
    *, nhead):
  Bb, S, E = x_ref.shape
  H = nhead
  Dh = E // H
  T = Bb * S                                   # token rows fed to the MXU
  scale = 1.0 / math.sqrt(Dh)
  bf16 = jnp.bfloat16
  f32 = jnp.float32

  x = x_ref[...].reshape(T, E)                 # (T, E) f32

  # ---- fused QKV projection for all tokens in the block (MXU, bf16 -> f32) --
  qkv = jnp.dot(x.astype(bf16), in_wt_ref[...],
                preferred_element_type=f32) + in_b_ref[...]            # (T, 3E)
  qkv = qkv.reshape(Bb, S, 3 * E)              # batch-separated for attention

  # ---- multi-head self-attention with per-head out-proj accumulation -------
  acc = jnp.zeros((T, E), dtype=f32)
  for h in range(H):                           # static, tiny H
    # columns are head-grouped: one contiguous 3*Dh slice per head
    blk = qkv[:, :, h * 3 * Dh:(h + 1) * 3 * Dh]       # (Bb, S, 3Dh)
    qh = blk[:, :, :Dh].astype(bf16)
    kh = blk[:, :, Dh:2 * Dh].astype(bf16)
    vh = blk[:, :, 2 * Dh:].astype(bf16)
    # contraction on last dims of both operands: no explicit transpose of kh
    s = jnp.einsum('bqd,bkd->bqk', qh, kh,
                   preferred_element_type=f32) * scale                 # (Bb,S,S)
    s = s - jnp.max(s, axis=-1, keepdims=True)
    pexp = jnp.exp(s)
    inv = pl.reciprocal(jnp.sum(pexp, axis=-1, keepdims=True), approx=True)  # EUP
    pw = (pexp * inv).astype(bf16)
    ph = jnp.einsum('bqk,bkd->bqd', pw, vh,
                    preferred_element_type=f32)                        # (Bb,S,Dh)
    # accumulate this head's contribution to the output projection (MXU);
    # out_wt row slice is a static, sublane-aligned slice of a resident ref.
    acc = acc + jnp.dot(ph.reshape(T, Dh).astype(bf16),
                        out_wt_ref[h * Dh:(h + 1) * Dh, :],
                        preferred_element_type=f32)                    # (T, E)

  sa = acc + out_b_ref[...]                    # self-attention output

  x1 = x + sa                                  # residual (dropout1 = identity)
  x1n = x1 * a1_ref[...] + c1_ref[...]         # folded eval-mode BatchNorm1d

  # ---- feed-forward block ---------------------------------------------------
  h1 = jnp.dot(x1n.astype(bf16), w1t_ref[...],
               preferred_element_type=f32) + b1_ref[...]               # (T, F)
  h1 = jnp.maximum(h1, 0.0)                    # relu
  ff = jnp.dot(h1.astype(bf16), w2t_ref[...],
               preferred_element_type=f32) + b2_ref[...]               # (T, E)

  x2 = x1n + ff                                # residual (dropout2 = identity)
  o_ref[...] = (x2 * a2_ref[...] + c2_ref[...]).reshape(Bb, S, E)


def _vmem_limit_bytes():
  """Generation-aware VMEM limit: leave Mosaic-scratch headroom, cap at ~110MiB."""
  cap = 128 * 1024 * 1024
  try:
    info = pltpu.get_tpu_info()
    cap = int(getattr(info, 'vmem_capacity_bytes', cap) or cap)
  except Exception:
    pass
  return int(max(32 * 1024 * 1024,
                 min(cap - 12 * 1024 * 1024, 110 * 1024 * 1024)))


def transformer_encoder_layer(x, p, *, nhead, eps=1e-5, token_target=256):
  """x: (B, S, E) float32. Returns (B, S, E) float32 (eval-mode forward)."""
  B, S, E = x.shape
  H = nhead
  Dh = E // H

  # ---- batch block: smallest divisor of B giving >= token_target rows/step --
  # (keeps the GEMM M-dim close to MXU height; multiples of 16 rows pack bf16
  #  vregs fully).  For the toy size this collapses to Bb = B, grid = (1,).
  Bb = B
  for d in range(1, B + 1):
    if B % d == 0 and d * S >= token_target:
      Bb = d
      break
  grid = (B // Bb,)

  def r2(v):            # 1-D param -> (1, N) f32 for VMEM
    return jnp.asarray(v).reshape(1, -1).astype(jnp.float32)

  def bw(w):            # weight matrix, pre-transposed, bf16 MXU operand
    return w.T.astype(jnp.bfloat16)

  # head-grouped QKV column order: [q_h | k_h | v_h] contiguous per head
  perm = jnp.concatenate([
      jnp.concatenate([jnp.arange(h * Dh, (h + 1) * Dh) + j * E
                       for j in range(3)])
      for h in range(H)])
  in_wt = bw(p['in_proj_w'])[:, perm]
  in_b = p['in_proj_b'][perm]

  def bn_fold(g, be, rm, rv):   # eval BatchNorm -> y = x*a + c
    a = g * jax.lax.rsqrt(rv + eps)
    return r2(a), r2(be - rm * a)

  a1, c1 = bn_fold(p['g1'], p['be1'], p['rm1'], p['rv1'])
  a2, c2 = bn_fold(p['g2'], p['be2'], p['rm2'], p['rv2'])

  args = (
      x,
      in_wt, r2(in_b),
      bw(p['out_proj_w']), r2(p['out_proj_b']),
      bw(p['w1']), r2(p['b1']),
      bw(p['w2']), r2(p['b2']),
      a1, c1, a2, c2,
  )

  kernel = functools.partial(encoder_layer_kernel, nhead=H)

  def build(single_buffer_weights):
    def resident(a):
      # Constant index_map: fetched once, stays VMEM-resident across grid steps.
      kw = {}
      if single_buffer_weights:
        kw['pipeline_mode'] = pl.Buffered(1)   # don't double-buffer weights
      nd = a.ndim
      return pl.BlockSpec(a.shape, lambda b, _nd=nd: (0,) * _nd, **kw)

    in_specs = (
        [pl.BlockSpec((Bb, S, E), lambda b: (b, 0, 0))]   # x: Bb batch els/step
        + [resident(a) for a in args[1:]]
    )
    return pl.pallas_call(
        kernel,
        out_shape=jax.ShapeDtypeStruct((B, S, E), jnp.float32),
        grid=grid,
        in_specs=in_specs,
        out_specs=pl.BlockSpec((Bb, S, E), lambda b: (b, 0, 0)),
        compiler_params=pltpu.CompilerParams(
            dimension_semantics=("parallel",),      # shard batch blocks across TCs
            vmem_limit_bytes=_vmem_limit_bytes()),
    )

  try:
    return build(True)(*args)
  except Exception:
    # pl.Buffered(1) unsupported on this jax build -> default double buffering.
    return build(False)(*args)


def init_params(key, d_model, nhead, dim_feedforward):
  ks = jax.random.split(key, 16)

  def nrm(k, shape, scale=0.1):
    return scale * jax.random.normal(k, shape, dtype=jnp.float32)

  p = {
      'in_proj_w': nrm(ks[0], (3 * d_model, d_model)),   # MHA fused qkv weight
      'in_proj_b': nrm(ks[1], (3 * d_model,)),
      'out_proj_w': nrm(ks[2], (d_model, d_model)),
      'out_proj_b': nrm(ks[3], (d_model,)),
      'w1': nrm(ks[4], (dim_feedforward, d_model)),      # linear1
      'b1': nrm(ks[5], (dim_feedforward,)),
      'w2': nrm(ks[6], (d_model, dim_feedforward)),      # linear2
      'b2': nrm(ks[7], (d_model,)),
      'g1': 1.0 + nrm(ks[8], (d_model,)),                # norm1 (BatchNorm1d)
      'be1': nrm(ks[9], (d_model,)),
      'rm1': nrm(ks[10], (d_model,)),
      'rv1': 1.0 + 0.1 * jax.random.uniform(ks[11], (d_model,), dtype=jnp.float32),
      'g2': 1.0 + nrm(ks[12], (d_model,)),               # norm2 (BatchNorm1d)
      'be2': nrm(ks[13], (d_model,)),
      'rm2': nrm(ks[14], (d_model,)),
      'rv2': 1.0 + 0.1 * jax.random.uniform(ks[15], (d_model,), dtype=jnp.float32),
  }
  return p


def reference(x, p, *, nhead, eps=1e-5):
  """Pure-JAX eval-mode reference (same math as the PyTorch module; matmul
  operands cast to bf16 with f32 accumulation to match the kernel's MXU use)."""
  B, S, E = x.shape
  H, Dh = nhead, E // nhead
  bf = jnp.bfloat16

  def mm(a, b):
    return jnp.dot(a.astype(bf), b.astype(bf), preferred_element_type=jnp.float32)

  x2d = x.reshape(B * S, E)
  qkv = mm(x2d, p['in_proj_w'].T) + p['in_proj_b']
  q, k, v = qkv[:, :E], qkv[:, E:2 * E], qkv[:, 2 * E:]

  def split(t):
    return t.reshape(B, S, H, Dh).transpose(0, 2, 1, 3)

  qh, kh, vh = split(q), split(k), split(v)
  s = jnp.einsum('bhqd,bhkd->bhqk', qh.astype(bf), kh.astype(bf),
                 preferred_element_type=jnp.float32) / math.sqrt(Dh)
  pw = jax.nn.softmax(s, axis=-1)
  a = jnp.einsum('bhqk,bhkd->bhqd', pw.astype(bf), vh.astype(bf),
                 preferred_element_type=jnp.float32)
  a = a.transpose(0, 2, 1, 3).reshape(B * S, E)
  sa = mm(a, p['out_proj_w'].T) + p['out_proj_b']

  def bn(t, g, be, rm, rv):
    return (t - rm) / jnp.sqrt(rv + eps) * g + be

  x1 = bn((x2d + sa).reshape(B, S, E), p['g1'], p['be1'], p['rm1'], p['rv1'])
  x1_2d = x1.reshape(B * S, E)
  ff = mm(jnp.maximum(mm(x1_2d, p['w1'].T) + p['b1'], 0.0), p['w2'].T) + p['b2']
  return bn((x1_2d + ff).reshape(B, S, E), p['g2'], p['be2'], p['rm2'], p['rv2'])


if __name__ == "__main__":
  # batch, seq, d_model, nhead, dim_feedforward (E/F lane-aligned to 128)
  B, S, E, H, FF = 2, 8, 128, 4, 256
  key = jax.random.PRNGKey(0)
  kx, kp = jax.random.split(key)
  x = jax.random.normal(kx, (B, S, E), dtype=jnp.float32)
  params = init_params(kp, E, H, FF)

  out = transformer_encoder_layer(x, params, nhead=H)
  out = jax.block_until_ready(out)

  ref = reference(x, params, nhead=H)
  assert out.shape == (B, S, E)
  # bf16 matmul operands + approximate reciprocal in the softmax => compare
  # against the bf16-matched reference with a matching tolerance.
  if not jnp.allclose(out, ref, rtol=2e-2, atol=2e-2):
    err = float(jnp.max(jnp.abs(out - ref)))
    raise AssertionError(f"Pallas kernel output does not match reference "
                         f"(max abs err={err})")
  print("KERNEL_OK")
</pallas_src>

<mosaic_0001>
module attributes {stable_mosaic.version = 11 : i64} {
  func.func @encoder_layer_kernel(%arg0: i32, %arg1: memref<2x8x128xf32, #tpu.memory_space<vmem>>, %arg2: memref<128x384xbf16, #tpu.memory_space<vmem>>, %arg3: memref<1x384xf32, #tpu.memory_space<vmem>>, %arg4: memref<128x128xbf16, #tpu.memory_space<vmem>>, %arg5: memref<1x128xf32, #tpu.memory_space<vmem>>, %arg6: memref<128x256xbf16, #tpu.memory_space<vmem>>, %arg7: memref<1x256xf32, #tpu.memory_space<vmem>>, %arg8: memref<256x128xbf16, #tpu.memory_space<vmem>>, %arg9: memref<1x128xf32, #tpu.memory_space<vmem>>, %arg10: memref<1x128xf32, #tpu.memory_space<vmem>>, %arg11: memref<1x128xf32, #tpu.memory_space<vmem>>, %arg12: memref<1x128xf32, #tpu.memory_space<vmem>>, %arg13: memref<1x128xf32, #tpu.memory_space<vmem>>, %arg14: memref<2x8x128xf32, #tpu.memory_space<vmem>>) attributes {dimension_semantics = [#tpu.dimension_semantics<parallel>], iteration_bounds = array<i64: 1>, scalar_prefetch = 0 : i64, scratch_operands = 0 : i64, tpu.core_type = #tpu.core_type<tc>, window_params = [{transform_indices = @transform_0, window_bounds = array<i64: 2, 8, 128>}, {pipeline_mode = #tpu.pipeline_mode<synchronous>, transform_indices = @transform_1, window_bounds = array<i64: 128, 384>}, {pipeline_mode = #tpu.pipeline_mode<synchronous>, transform_indices = @transform_2, window_bounds = array<i64: 1, 384>}, {pipeline_mode = #tpu.pipeline_mode<synchronous>, transform_indices = @transform_3, window_bounds = array<i64: 128, 128>}, {pipeline_mode = #tpu.pipeline_mode<synchronous>, transform_indices = @transform_4, window_bounds = array<i64: 1, 128>}, {pipeline_mode = #tpu.pipeline_mode<synchronous>, transform_indices = @transform_5, window_bounds = array<i64: 128, 256>}, {pipeline_mode = #tpu.pipeline_mode<synchronous>, transform_indices = @transform_6, window_bounds = array<i64: 1, 256>}, {pipeline_mode = #tpu.pipeline_mode<synchronous>, transform_indices = @transform_7, window_bounds = array<i64: 256, 128>}, {pipeline_mode = #tpu.pipeline_mode<synchronous>, transform_indices = @transform_8, window_bounds = array<i64: 1, 128>}, {pipeline_mode = #tpu.pipeline_mode<synchronous>, transform_indices = @transform_9, window_bounds = array<i64: 1, 128>}, {pipeline_mode = #tpu.pipeline_mode<synchronous>, transform_indices = @transform_10, window_bounds = array<i64: 1, 128>}, {pipeline_mode = #tpu.pipeline_mode<synchronous>, transform_indices = @transform_11, window_bounds = array<i64: 1, 128>}, {pipeline_mode = #tpu.pipeline_mode<synchronous>, transform_indices = @transform_12, window_bounds = array<i64: 1, 128>}, {transform_indices = @transform_13, window_bounds = array<i64: 2, 8, 128>}]} {
    %c0 = arith.constant 0 : index
    %c0_0 = arith.constant 0 : index
    %c0_1 = arith.constant 0 : index
    %0 = vector.load %arg1[%c0, %c0_0, %c0_1] : memref<2x8x128xf32, #tpu.memory_space<vmem>>, vector<2x8x128xf32>
    %1 = vector.shape_cast %0 : vector<2x8x128xf32> to vector<16x128xf32>
    %2 = arith.truncf %1 : vector<16x128xf32> to vector<16x128xbf16>
    %c0_2 = arith.constant 0 : index
    %c0_3 = arith.constant 0 : index
    %3 = vector.load %arg2[%c0_2, %c0_3] : memref<128x384xbf16, #tpu.memory_space<vmem>>, vector<128x384xbf16>
    %cst = arith.constant dense<0.000000e+00> : vector<16x384xf32>
    %4 = tpu.matmul %2, %3, %cst {dimension_numbers = #tpu.dot_dimension_numbers<[1], [0], [0], [1], [0, 0, 1, 1], [], []>} : vector<16x128xbf16>, vector<128x384xbf16>, vector<16x384xf32> -> vector<16x384xf32>
    %c0_4 = arith.constant 0 : index
    %c0_5 = arith.constant 0 : index
    %5 = vector.load %arg3[%c0_4, %c0_5] : memref<1x384xf32, #tpu.memory_space<vmem>>, vector<1x384xf32>
    %6 = vector.broadcast %5 : vector<1x384xf32> to vector<16x384xf32>
    %7 = arith.addf %4, %6 : vector<16x384xf32>
    %8 = vector.shape_cast %7 : vector<16x384xf32> to vector<2x8x384xf32>
    %cst_6 = arith.constant 0.000000e+00 : f32
    %9 = vector.broadcast %cst_6 : f32 to vector<16x128xf32>
    %10 = vector.extract_strided_slice %8 {offsets = [0, 0, 0], sizes = [2, 8, 96], strides = [1, 1, 1]} : vector<2x8x384xf32> to vector<2x8x96xf32>
    %11 = vector.extract_strided_slice %10 {offsets = [0, 0, 0], sizes = [2, 8, 32], strides = [1, 1, 1]} : vector<2x8x96xf32> to vector<2x8x32xf32>
    %12 = arith.truncf %11 : vector<2x8x32xf32> to vector<2x8x32xbf16>
    %13 = vector.extract_strided_slice %10 {offsets = [0, 0, 32], sizes = [2, 8, 32], strides = [1, 1, 1]} : vector<2x8x96xf32> to vector<2x8x32xf32>
    %14 = arith.truncf %13 : vector<2x8x32xf32> to vector<2x8x32xbf16>
    %15 = vector.extract_strided_slice %10 {offsets = [0, 0, 64], sizes = [2, 8, 32], strides = [1, 1, 1]} : vector<2x8x96xf32> to vector<2x8x32xf32>
    %16 = arith.truncf %15 : vector<2x8x32xf32> to vector<2x8x32xbf16>
    "tpu.trace_start"() <{level = 10 : i32, message = "bqd,bkd->bqk"}> : () -> ()
    %cst_7 = arith.constant dense<0.000000e+00> : vector<2x8x8xf32>
    %17 = tpu.matmul %12, %14, %cst_7 {dimension_numbers = #tpu.dot_dimension_numbers<[2], [2], [1], [1], [0, 0, 0, 1, 1, 1], [0], [0]>} : vector<2x8x32xbf16>, vector<2x8x32xbf16>, vector<2x8x8xf32> -> vector<2x8x8xf32>
    "tpu.trace_stop"() : () -> ()
    %cst_8 = arith.constant 0.176776692 : f32
    %18 = vector.broadcast %cst_8 : f32 to vector<2x8x8xf32>
    %19 = arith.mulf %17, %18 : vector<2x8x8xf32>
    %cst_9 = arith.constant dense<0xFF800000> : vector<2x8xf32>
    %20 = vector.multi_reduction <maximumf>, %19, %cst_9 [2] : vector<2x8x8xf32> to vector<2x8xf32>
    %21 = vector.shape_cast %20 : vector<2x8xf32> to vector<2x8x1xf32>
    %22 = vector.broadcast %21 : vector<2x8x1xf32> to vector<2x8x8xf32>
    %23 = arith.subf %19, %22 : vector<2x8x8xf32>
    %24 = math.exp %23 : vector<2x8x8xf32>
    %cst_10 = arith.constant dense<0.000000e+00> : vector<2x8xf32>
    %25 = vector.multi_reduction <add>, %24, %cst_10 [2] : vector<2x8x8xf32> to vector<2x8xf32>
    %26 = vector.shape_cast %25 : vector<2x8xf32> to vector<2x8x1xf32>
    %27 = tpu.reciprocal %26 {approx = true} : vector<2x8x1xf32> -> vector<2x8x1xf32>
    %28 = vector.broadcast %27 : vector<2x8x1xf32> to vector<2x8x8xf32>
    %29 = arith.mulf %24, %28 : vector<2x8x8xf32>
    %30 = arith.truncf %29 : vector<2x8x8xf32> to vector<2x8x8xbf16>
    "tpu.trace_start"() <{level = 10 : i32, message = "bqk,bkd->bqd"}> : () -> ()
    %cst_11 = arith.constant dense<0.000000e+00> : vector<2x8x32xf32>
    %31 = tpu.matmul %30, %16, %cst_11 {dimension_numbers = #tpu.dot_dimension_numbers<[2], [1], [1], [2], [0, 0, 0, 1, 1, 2], [0], [0]>} : vector<2x8x8xbf16>, vector<2x8x32xbf16>, vector<2x8x32xf32> -> vector<2x8x32xf32>
    "tpu.trace_stop"() : () -> ()
    %32 = vector.shape_cast %31 : vector<2x8x32xf32> to vector<16x32xf32>
    %33 = arith.truncf %32 : vector<16x32xf32> to vector<16x32xbf16>
    %c0_12 = arith.constant 0 : index
    %c0_13 = arith.constant 0 : index
    %34 = vector.load %arg4[%c0_12, %c0_13] : memref<128x128xbf16, #tpu.memory_space<vmem>>, vector<32x128xbf16>
    %cst_14 = arith.constant dense<0.000000e+00> : vector<16x128xf32>
    %35 = tpu.matmul %33, %34, %cst_14 {dimension_numbers = #tpu.dot_dimension_numbers<[1], [0], [0], [1], [0, 0, 1, 1], [], []>} : vector<16x32xbf16>, vector<32x128xbf16>, vector<16x128xf32> -> vector<16x128xf32>
    %36 = arith.addf %9, %35 : vector<16x128xf32>
    %37 = vector.extract_strided_slice %8 {offsets = [0, 0, 96], sizes = [2, 8, 96], strides = [1, 1, 1]} : vector<2x8x384xf32> to vector<2x8x96xf32>
    %38 = vector.extract_strided_slice %37 {offsets = [0, 0, 0], sizes = [2, 8, 32], strides = [1, 1, 1]} : vector<2x8x96xf32> to vector<2x8x32xf32>
    %39 = arith.truncf %38 : vector<2x8x32xf32> to vector<2x8x32xbf16>
    %40 = vector.extract_strided_slice %37 {offsets = [0, 0, 32], sizes = [2, 8, 32], strides = [1, 1, 1]} : vector<2x8x96xf32> to vector<2x8x32xf32>
    %41 = arith.truncf %40 : vector<2x8x32xf32> to vector<2x8x32xbf16>
    %42 = vector.extract_strided_slice %37 {offsets = [0, 0, 64], sizes = [2, 8, 32], strides = [1, 1, 1]} : vector<2x8x96xf32> to vector<2x8x32xf32>
    %43 = arith.truncf %42 : vector<2x8x32xf32> to vector<2x8x32xbf16>
    "tpu.trace_start"() <{level = 10 : i32, message = "bqd,bkd->bqk"}> : () -> ()
    %cst_15 = arith.constant dense<0.000000e+00> : vector<2x8x8xf32>
    %44 = tpu.matmul %39, %41, %cst_15 {dimension_numbers = #tpu.dot_dimension_numbers<[2], [2], [1], [1], [0, 0, 0, 1, 1, 1], [0], [0]>} : vector<2x8x32xbf16>, vector<2x8x32xbf16>, vector<2x8x8xf32> -> vector<2x8x8xf32>
    "tpu.trace_stop"() : () -> ()
    %cst_16 = arith.constant 0.176776692 : f32
    %45 = vector.broadcast %cst_16 : f32 to vector<2x8x8xf32>
    %46 = arith.mulf %44, %45 : vector<2x8x8xf32>
    %cst_17 = arith.constant dense<0xFF800000> : vector<2x8xf32>
    %47 = vector.multi_reduction <maximumf>, %46, %cst_17 [2] : vector<2x8x8xf32> to vector<2x8xf32>
    %48 = vector.shape_cast %47 : vector<2x8xf32> to vector<2x8x1xf32>
    %49 = vector.broadcast %48 : vector<2x8x1xf32> to vector<2x8x8xf32>
    %50 = arith.subf %46, %49 : vector<2x8x8xf32>
    %51 = math.exp %50 : vector<2x8x8xf32>
    %cst_18 = arith.constant dense<0.000000e+00> : vector<2x8xf32>
    %52 = vector.multi_reduction <add>, %51, %cst_18 [2] : vector<2x8x8xf32> to vector<2x8xf32>
    %53 = vector.shape_cast %52 : vector<2x8xf32> to vector<2x8x1xf32>
    %54 = tpu.reciprocal %53 {approx = true} : vector<2x8x1xf32> -> vector<2x8x1xf32>
    %55 = vector.broadcast %54 : vector<2x8x1xf32> to vector<2x8x8xf32>
    %56 = arith.mulf %51, %55 : vector<2x8x8xf32>
    %57 = arith.truncf %56 : vector<2x8x8xf32> to vector<2x8x8xbf16>
    "tpu.trace_start"() <{level = 10 : i32, message = "bqk,bkd->bqd"}> : () -> ()
    %cst_19 = arith.constant dense<0.000000e+00> : vector<2x8x32xf32>
    %58 = tpu.matmul %57, %43, %cst_19 {dimension_numbers = #tpu.dot_dimension_numbers<[2], [1], [1], [2], [0, 0, 0, 1, 1, 2], [0], [0]>} : vector<2x8x8xbf16>, vector<2x8x32xbf16>, vector<2x8x32xf32> -> vector<2x8x32xf32>
    "tpu.trace_stop"() : () -> ()
    %59 = vector.shape_cast %58 : vector<2x8x32xf32> to vector<16x32xf32>
    %60 = arith.truncf %59 : vector<16x32xf32> to vector<16x32xbf16>
    %c32 = arith.constant 32 : index
    %c0_20 = arith.constant 0 : index
    %61 = vector.load %arg4[%c32, %c0_20] : memref<128x128xbf16, #tpu.memory_space<vmem>>, vector<32x128xbf16>
    %cst_21 = arith.constant dense<0.000000e+00> : vector<16x128xf32>
    %62 = tpu.matmul %60, %61, %cst_21 {dimension_numbers = #tpu.dot_dimension_numbers<[1], [0], [0], [1], [0, 0, 1, 1], [], []>} : vector<16x32xbf16>, vector<32x128xbf16>, vector<16x128xf32> -> vector<16x128xf32>
    %63 = arith.addf %36, %62 : vector<16x128xf32>
    %64 = vector.extract_strided_slice %8 {offsets = [0, 0, 192], sizes = [2, 8, 96], strides = [1, 1, 1]} : vector<2x8x384xf32> to vector<2x8x96xf32>
    %65 = vector.extract_strided_slice %64 {offsets = [0, 0, 0], sizes = [2, 8, 32], strides = [1, 1, 1]} : vector<2x8x96xf32> to vector<2x8x32xf32>
    %66 = arith.truncf %65 : vector<2x8x32xf32> to vector<2x8x32xbf16>
    %67 = vector.extract_strided_slice %64 {offsets = [0, 0, 32], sizes = [2, 8, 32], strides = [1, 1, 1]} : vector<2x8x96xf32> to vector<2x8x32xf32>
    %68 = arith.truncf %67 : vector<2x8x32xf32> to vector<2x8x32xbf16>
    %69 = vector.extract_strided_slice %64 {offsets = [0, 0, 64], sizes = [2, 8, 32], strides = [1, 1, 1]} : vector<2x8x96xf32> to vector<2x8x32xf32>
    %70 = arith.truncf %69 : vector<2x8x32xf32> to vector<2x8x32xbf16>
    "tpu.trace_start"() <{level = 10 : i32, message = "bqd,bkd->bqk"}> : () -> ()
    %cst_22 = arith.constant dense<0.000000e+00> : vector<2x8x8xf32>
    %71 = tpu.matmul %66, %68, %cst_22 {dimension_numbers = #tpu.dot_dimension_numbers<[2], [2], [1], [1], [0, 0, 0, 1, 1, 1], [0], [0]>} : vector<2x8x32xbf16>, vector<2x8x32xbf16>, vector<2x8x8xf32> -> vector<2x8x8xf32>
    "tpu.trace_stop"() : () -> ()
    %cst_23 = arith.constant 0.176776692 : f32
    %72 = vector.broadcast %cst_23 : f32 to vector<2x8x8xf32>
    %73 = arith.mulf %71, %72 : vector<2x8x8xf32>
    %cst_24 = arith.constant dense<0xFF800000> : vector<2x8xf32>
    %74 = vector.multi_reduction <maximumf>, %73, %cst_24 [2] : vector<2x8x8xf32> to vector<2x8xf32>
    %75 = vector.shape_cast %74 : vector<2x8xf32> to vector<2x8x1xf32>
    %76 = vector.broadcast %75 : vector<2x8x1xf32> to vector<2x8x8xf32>
    %77 = arith.subf %73, %76 : vector<2x8x8xf32>
    %78 = math.exp %77 : vector<2x8x8xf32>
    %cst_25 = arith.constant dense<0.000000e+00> : vector<2x8xf32>
    %79 = vector.multi_reduction <add>, %78, %cst_25 [2] : vector<2x8x8xf32> to vector<2x8xf32>
    %80 = vector.shape_cast %79 : vector<2x8xf32> to vector<2x8x1xf32>
    %81 = tpu.reciprocal %80 {approx = true} : vector<2x8x1xf32> -> vector<2x8x1xf32>
    %82 = vector.broadcast %81 : vector<2x8x1xf32> to vector<2x8x8xf32>
    %83 = arith.mulf %78, %82 : vector<2x8x8xf32>
    %84 = arith.truncf %83 : vector<2x8x8xf32> to vector<2x8x8xbf16>
    "tpu.trace_start"() <{level = 10 : i32, message = "bqk,bkd->bqd"}> : () -> ()
    %cst_26 = arith.constant dense<0.000000e+00> : vector<2x8x32xf32>
    %85 = tpu.matmul %84, %70, %cst_26 {dimension_numbers = #tpu.dot_dimension_numbers<[2], [1], [1], [2], [0, 0, 0, 1, 1, 2], [0], [0]>} : vector<2x8x8xbf16>, vector<2x8x32xbf16>, vector<2x8x32xf32> -> vector<2x8x32xf32>
    "tpu.trace_stop"() : () -> ()
    %86 = vector.shape_cast %85 : vector<2x8x32xf32> to vector<16x32xf32>
    %87 = arith.truncf %86 : vector<16x32xf32> to vector<16x32xbf16>
    %c64 = arith.constant 64 : index
    %c0_27 = arith.constant 0 : index
    %88 = vector.load %arg4[%c64, %c0_27] : memref<128x128xbf16, #tpu.memory_space<vmem>>, vector<32x128xbf16>
    %cst_28 = arith.constant dense<0.000000e+00> : vector<16x128xf32>
    %89 = tpu.matmul %87, %88, %cst_28 {dimension_numbers = #tpu.dot_dimension_numbers<[1], [0], [0], [1], [0, 0, 1, 1], [], []>} : vector<16x32xbf16>, vector<32x128xbf16>, vector<16x128xf32> -> vector<16x128xf32>
    %90 = arith.addf %63, %89 : vector<16x128xf32>
    %91 = vector.extract_strided_slice %8 {offsets = [0, 0, 288], sizes = [2, 8, 96], strides = [1, 1, 1]} : vector<2x8x384xf32> to vector<2x8x96xf32>
    %92 = vector.extract_strided_slice %91 {offsets = [0, 0, 0], sizes = [2, 8, 32], strides = [1, 1, 1]} : vector<2x8x96xf32> to vector<2x8x32xf32>
    %93 = arith.truncf %92 : vector<2x8x32xf32> to vector<2x8x32xbf16>
    %94 = vector.extract_strided_slice %91 {offsets = [0, 0, 32], sizes = [2, 8, 32], strides = [1, 1, 1]} : vector<2x8x96xf32> to vector<2x8x32xf32>
    %95 = arith.truncf %94 : vector<2x8x32xf32> to vector<2x8x32xbf16>
    %96 = vector.extract_strided_slice %91 {offsets = [0, 0, 64], sizes = [2, 8, 32], strides = [1, 1, 1]} : vector<2x8x96xf32> to vector<2x8x32xf32>
    %97 = arith.truncf %96 : vector<2x8x32xf32> to vector<2x8x32xbf16>
    "tpu.trace_start"() <{level = 10 : i32, message = "bqd,bkd->bqk"}> : () -> ()
    %cst_29 = arith.constant dense<0.000000e+00> : vector<2x8x8xf32>
    %98 = tpu.matmul %93, %95, %cst_29 {dimension_numbers = #tpu.dot_dimension_numbers<[2], [2], [1], [1], [0, 0, 0, 1, 1, 1], [0], [0]>} : vector<2x8x32xbf16>, vector<2x8x32xbf16>, vector<2x8x8xf32> -> vector<2x8x8xf32>
    "tpu.trace_stop"() : () -> ()
    %cst_30 = arith.constant 0.176776692 : f32
    %99 = vector.broadcast %cst_30 : f32 to vector<2x8x8xf32>
    %100 = arith.mulf %98, %99 : vector<2x8x8xf32>
    %cst_31 = arith.constant dense<0xFF800000> : vector<2x8xf32>
    %101 = vector.multi_reduction <maximumf>, %100, %cst_31 [2] : vector<2x8x8xf32> to vector<2x8xf32>
    %102 = vector.shape_cast %101 : vector<2x8xf32> to vector<2x8x1xf32>
    %103 = vector.broadcast %102 : vector<2x8x1xf32> to vector<2x8x8xf32>
    %104 = arith.subf %100, %103 : vector<2x8x8xf32>
    %105 = math.exp %104 : vector<2x8x8xf32>
    %cst_32 = arith.constant dense<0.000000e+00> : vector<2x8xf32>
    %106 = vector.multi_reduction <add>, %105, %cst_32 [2] : vector<2x8x8xf32> to vector<2x8xf32>
    %107 = vector.shape_cast %106 : vector<2x8xf32> to vector<2x8x1xf32>
    %108 = tpu.reciprocal %107 {approx = true} : vector<2x8x1xf32> -> vector<2x8x1xf32>
    %109 = vector.broadcast %108 : vector<2x8x1xf32> to vector<2x8x8xf32>
    %110 = arith.mulf %105, %109 : vector<2x8x8xf32>
    %111 = arith.truncf %110 : vector<2x8x8xf32> to vector<2x8x8xbf16>
    "tpu.trace_start"() <{level = 10 : i32, message = "bqk,bkd->bqd"}> : () -> ()
    %cst_33 = arith.constant dense<0.000000e+00> : vector<2x8x32xf32>
    %112 = tpu.matmul %111, %97, %cst_33 {dimension_numbers = #tpu.dot_dimension_numbers<[2], [1], [1], [2], [0, 0, 0, 1, 1, 2], [0], [0]>} : vector<2x8x8xbf16>, vector<2x8x32xbf16>, vector<2x8x32xf32> -> vector<2x8x32xf32>
    "tpu.trace_stop"() : () -> ()
    %113 = vector.shape_cast %112 : vector<2x8x32xf32> to vector<16x32xf32>
    %114 = arith.truncf %113 : vector<16x32xf32> to vector<16x32xbf16>
    %c96 = arith.constant 96 : index
    %c0_34 = arith.constant 0 : index
    %115 = vector.load %arg4[%c96, %c0_34] : memref<128x128xbf16, #tpu.memory_space<vmem>>, vector<32x128xbf16>
    %cst_35 = arith.constant dense<0.000000e+00> : vector<16x128xf32>
    %116 = tpu.matmul %114, %115, %cst_35 {dimension_numbers = #tpu.dot_dimension_numbers<[1], [0], [0], [1], [0, 0, 1, 1], [], []>} : vector<16x32xbf16>, vector<32x128xbf16>, vector<16x128xf32> -> vector<16x128xf32>
    %117 = arith.addf %90, %116 : vector<16x128xf32>
    %c0_36 = arith.constant 0 : index
    %c0_37 = arith.constant 0 : index
    %118 = vector.load %arg5[%c0_36, %c0_37] : memref<1x128xf32, #tpu.memory_space<vmem>>, vector<1x128xf32>
    %119 = vector.broadcast %118 : vector<1x128xf32> to vector<16x128xf32>
    %120 = arith.addf %117, %119 : vector<16x128xf32>
    %121 = arith.addf %1, %120 : vector<16x128xf32>
    %c0_38 = arith.constant 0 : index
    %c0_39 = arith.constant 0 : index
    %122 = vector.load %arg10[%c0_38, %c0_39] : memref<1x128xf32, #tpu.memory_space<vmem>>, vector<1x128xf32>
    %123 = vector.broadcast %122 : vector<1x128xf32> to vector<16x128xf32>
    %124 = arith.mulf %121, %123 : vector<16x128xf32>
    %c0_40 = arith.constant 0 : index
    %c0_41 = arith.constant 0 : index
    %125 = vector.load %arg11[%c0_40, %c0_41] : memref<1x128xf32, #tpu.memory_space<vmem>>, vector<1x128xf32>
    %126 = vector.broadcast %125 : vector<1x128xf32> to vector<16x128xf32>
    %127 = arith.addf %124, %126 : vector<16x128xf32>
    %128 = arith.truncf %127 : vector<16x128xf32> to vector<16x128xbf16>
    %c0_42 = arith.constant 0 : index
    %c0_43 = arith.constant 0 : index
    %129 = vector.load %arg6[%c0_42, %c0_43] : memref<128x256xbf16, #tpu.memory_space<vmem>>, vector<128x256xbf16>
    %cst_44 = arith.constant dense<0.000000e+00> : vector<16x256xf32>
    %130 = tpu.matmul %128, %129, %cst_44 {dimension_numbers = #tpu.dot_dimension_numbers<[1], [0], [0], [1], [0, 0, 1, 1], [], []>} : vector<16x128xbf16>, vector<128x256xbf16>, vector<16x256xf32> -> vector<16x256xf32>
    %c0_45 = arith.constant 0 : index
    %c0_46 = arith.constant 0 : index
    %131 = vector.load %arg7[%c0_45, %c0_46] : memref<1x256xf32, #tpu.memory_space<vmem>>, vector<1x256xf32>
    %132 = vector.broadcast %131 : vector<1x256xf32> to vector<16x256xf32>
    %133 = arith.addf %130, %132 : vector<16x256xf32>
    %cst_47 = arith.constant 0.000000e+00 : f32
    %134 = vector.broadcast %cst_47 : f32 to vector<16x256xf32>
    %135 = arith.maximumf %133, %134 : vector<16x256xf32>
    %136 = arith.truncf %135 : vector<16x256xf32> to vector<16x256xbf16>
    %c0_48 = arith.constant 0 : index
    %c0_49 = arith.constant 0 : index
    %137 = vector.load %arg8[%c0_48, %c0_49] : memref<256x128xbf16, #tpu.memory_space<vmem>>, vector<256x128xbf16>
    %cst_50 = arith.constant dense<0.000000e+00> : vector<16x128xf32>
    %138 = tpu.matmul %136, %137, %cst_50 {dimension_numbers = #tpu.dot_dimension_numbers<[1], [0], [0], [1], [0, 0, 1, 1], [], []>} : vector<16x256xbf16>, vector<256x128xbf16>, vector<16x128xf32> -> vector<16x128xf32>
    %c0_51 = arith.constant 0 : index
    %c0_52 = arith.constant 0 : index
    %139 = vector.load %arg9[%c0_51, %c0_52] : memref<1x128xf32, #tpu.memory_space<vmem>>, vector<1x128xf32>
    %140 = vector.broadcast %139 : vector<1x128xf32> to vector<16x128xf32>
    %141 = arith.addf %138, %140 : vector<16x128xf32>
    %142 = arith.addf %127, %141 : vector<16x128xf32>
    %c0_53 = arith.constant 0 : index
    %c0_54 = arith.constant 0 : index
    %143 = vector.load %arg12[%c0_53, %c0_54] : memref<1x128xf32, #tpu.memory_space<vmem>>, vector<1x128xf32>
    %144 = vector.broadcast %143 : vector<1x128xf32> to vector<16x128xf32>
    %145 = arith.mulf %142, %144 : vector<16x128xf32>
    %c0_55 = arith.constant 0 : index
    %c0_56 = arith.constant 0 : index
    %146 = vector.load %arg13[%c0_55, %c0_56] : memref<1x128xf32, #tpu.memory_space<vmem>>, vector<1x128xf32>
    %147 = vector.broadcast %146 : vector<1x128xf32> to vector<16x128xf32>
    %148 = arith.addf %145, %147 : vector<16x128xf32>
    %149 = vector.shape_cast %148 : vector<16x128xf32> to vector<2x8x128xf32>
    %c0_57 = arith.constant 0 : index
    %c0_58 = arith.constant 0 : index
    %c0_59 = arith.constant 0 : index
    %150 = vector.load %arg14[%c0_57, %c0_58, %c0_59] : memref<2x8x128xf32, #tpu.memory_space<vmem>>, vector<2x8x128xf32>
    tpu.vector_store %arg14[%c0_57, %c0_58, %c0_59], %149 {strides = array<i32>} : memref<2x8x128xf32, #tpu.memory_space<vmem>>, vector<2x8x128xf32>,
    return
  }
  func.func @transform_0(%arg0: i32) -> (i32, i32, i32) {
    %c0_i32 = arith.constant 0 : i32
    %c0_i32_0 = arith.constant 0 : i32
    %c0_i32_1 = arith.constant 0 : i32
    return %arg0, %c0_i32, %c0_i32_0 : i32, i32, i32
  }
  func.func @transform_1(%arg0: i32) -> (i32, i32) {
    %c0_i32 = arith.constant 0 : i32
    %c0_i32_0 = arith.constant 0 : i32
    %c0_i32_1 = arith.constant 0 : i32
    return %c0_i32, %c0_i32_0 : i32, i32
  }
  func.func @transform_2(%arg0: i32) -> (i32, i32) {
    %c0_i32 = arith.constant 0 : i32
    %c0_i32_0 = arith.constant 0 : i32
    %c0_i32_1 = arith.constant 0 : i32
    return %c0_i32, %c0_i32_0 : i32, i32
  }
  func.func @transform_3(%arg0: i32) -> (i32, i32) {
    %c0_i32 = arith.constant 0 : i32
    %c0_i32_0 = arith.constant 0 : i32
    %c0_i32_1 = arith.constant 0 : i32
    return %c0_i32, %c0_i32_0 : i32, i32
  }
  func.func @transform_4(%arg0: i32) -> (i32, i32) {
    %c0_i32 = arith.constant 0 : i32
    %c0_i32_0 = arith.constant 0 : i32
    %c0_i32_1 = arith.constant 0 : i32
    return %c0_i32, %c0_i32_0 : i32, i32
  }
  func.func @transform_5(%arg0: i32) -> (i32, i32) {
    %c0_i32 = arith.constant 0 : i32
    %c0_i32_0 = arith.constant 0 : i32
    %c0_i32_1 = arith.constant 0 : i32
    return %c0_i32, %c0_i32_0 : i32, i32
  }
  func.func @transform_6(%arg0: i32) -> (i32, i32) {
    %c0_i32 = arith.constant 0 : i32
    %c0_i32_0 = arith.constant 0 : i32
    %c0_i32_1 = arith.constant 0 : i32
    return %c0_i32, %c0_i32_0 : i32, i32
  }
  func.func @transform_7(%arg0: i32) -> (i32, i32) {
    %c0_i32 = arith.constant 0 : i32
    %c0_i32_0 = arith.constant 0 : i32
    %c0_i32_1 = arith.constant 0 : i32
    return %c0_i32, %c0_i32_0 : i32, i32
  }
  func.func @transform_8(%arg0: i32) -> (i32, i32) {
    %c0_i32 = arith.constant 0 : i32
    %c0_i32_0 = arith.constant 0 : i32
    %c0_i32_1 = arith.constant 0 : i32
    return %c0_i32, %c0_i32_0 : i32, i32
  }
  func.func @transform_9(%arg0: i32) -> (i32, i32) {
    %c0_i32 = arith.constant 0 : i32
    %c0_i32_0 = arith.constant 0 : i32
    %c0_i32_1 = arith.constant 0 : i32
    return %c0_i32, %c0_i32_0 : i32, i32
  }
  func.func @transform_10(%arg0: i32) -> (i32, i32) {
    %c0_i32 = arith.constant 0 : i32
    %c0_i32_0 = arith.constant 0 : i32
    %c0_i32_1 = arith.constant 0 : i32
    return %c0_i32, %c0_i32_0 : i32, i32
  }
  func.func @transform_11(%arg0: i32) -> (i32, i32) {
    %c0_i32 = arith.constant 0 : i32
    %c0_i32_0 = arith.constant 0 : i32
    %c0_i32_1 = arith.constant 0 : i32
    return %c0_i32, %c0_i32_0 : i32, i32
  }
  func.func @transform_12(%arg0: i32) -> (i32, i32) {
    %c0_i32 = arith.constant 0 : i32
    %c0_i32_0 = arith.constant 0 : i32
    %c0_i32_1 = arith.constant 0 : i32
    return %c0_i32, %c0_i32_0 : i32, i32
  }
  func.func @transform_13(%arg0: i32) -> (i32, i32, i32) {
    %c0_i32 = arith.constant 0 : i32
    %c0_i32_0 = arith.constant 0 : i32
    %c0_i32_1 = arith.constant 0 : i32
    return %arg0, %c0_i32, %c0_i32_0 : i32, i32, i32
  }
}

module attributes {stable_mosaic.version = 11 : i64} {
  func.func @encoder_layer_kernel(%arg0: i32, %arg1: memref<2x8x128xf32, #tpu.memory_space<vmem>>, %arg2: memref<128x384xbf16, #tpu.memory_space<vmem>>, %arg3: memref<1x384xf32, #tpu.memory_space<vmem>>, %arg4: memref<128x128xbf16, #tpu.memory_space<vmem>>, %arg5: memref<1x128xf32, #tpu.memory_space<vmem>>, %arg6: memref<128x256xbf16, #tpu.memory_space<vmem>>, %arg7: memref<1x256xf32, #tpu.memory_space<vmem>>, %arg8: memref<256x128xbf16, #tpu.memory_space<vmem>>, %arg9: memref<1x128xf32, #tpu.memory_space<vmem>>, %arg10: memref<1x128xf32, #tpu.memory_space<vmem>>, %arg11: memref<1x128xf32, #tpu.memory_space<vmem>>, %arg12: memref<1x128xf32, #tpu.memory_space<vmem>>, %arg13: memref<1x128xf32, #tpu.memory_space<vmem>>, %arg14: memref<2x8x128xf32, #tpu.memory_space<vmem>>) attributes {dimension_semantics = [#tpu.dimension_semantics<parallel>], iteration_bounds = array<i64: 1>, scalar_prefetch = 0 : i64, scratch_operands = 0 : i64, tpu.core_type = #tpu.core_type<tc>, window_params = [{transform_indices = @transform_0, window_bounds = array<i64: 2, 8, 128>}, {pipeline_mode = #tpu.pipeline_mode<synchronous>, transform_indices = @transform_1, window_bounds = array<i64: 128, 384>}, {pipeline_mode = #tpu.pipeline_mode<synchronous>, transform_indices = @transform_2, window_bounds = array<i64: 1, 384>}, {pipeline_mode = #tpu.pipeline_mode<synchronous>, transform_indices = @transform_3, window_bounds = array<i64: 128, 128>}, {pipeline_mode = #tpu.pipeline_mode<synchronous>, transform_indices = @transform_4, window_bounds = array<i64: 1, 128>}, {pipeline_mode = #tpu.pipeline_mode<synchronous>, transform_indices = @transform_5, window_bounds = array<i64: 128, 256>}, {pipeline_mode = #tpu.pipeline_mode<synchronous>, transform_indices = @transform_6, window_bounds = array<i64: 1, 256>}, {pipeline_mode = #tpu.pipeline_mode<synchronous>, transform_indices = @transform_7, window_bounds = array<i64: 256, 128>}, {pipeline_mode = #tpu.pipeline_mode<synchronous>, transform_indices = @transform_8, window_bounds = array<i64: 1, 128>}, {pipeline_mode = #tpu.pipeline_mode<synchronous>, transform_indices = @transform_9, window_bounds = array<i64: 1, 128>}, {pipeline_mode = #tpu.pipeline_mode<synchronous>, transform_indices = @transform_10, window_bounds = array<i64: 1, 128>}, {pipeline_mode = #tpu.pipeline_mode<synchronous>, transform_indices = @transform_11, window_bounds = array<i64: 1, 128>}, {pipeline_mode = #tpu.pipeline_mode<synchronous>, transform_indices = @transform_12, window_bounds = array<i64: 1, 128>}, {transform_indices = @transform_13, window_bounds = array<i64: 2, 8, 128>}]} {
    %c0 = arith.constant 0 : index
    %c0_0 = arith.constant 0 : index
    %c0_1 = arith.constant 0 : index
    %0 = vector.load %arg1[%c0, %c0_0, %c0_1] : memref<2x8x128xf32, #tpu.memory_space<vmem>>, vector<2x8x128xf32>
    %1 = vector.shape_cast %0 : vector<2x8x128xf32> to vector<16x128xf32>
    %2 = arith.truncf %1 : vector<16x128xf32> to vector<16x128xbf16>
    %c0_2 = arith.constant 0 : index
    %c0_3 = arith.constant 0 : index
    %3 = vector.load %arg2[%c0_2, %c0_3] : memref<128x384xbf16, #tpu.memory_space<vmem>>, vector<128x384xbf16>
    %cst = arith.constant dense<0.000000e+00> : vector<16x384xf32>
    %4 = tpu.matmul %2, %3, %cst {dimension_numbers = #tpu.dot_dimension_numbers<[1], [0], [0], [1], [0, 0, 1, 1], [], []>} : vector<16x128xbf16>, vector<128x384xbf16>, vector<16x384xf32> -> vector<16x384xf32>
    %c0_4 = arith.constant 0 : index
    %c0_5 = arith.constant 0 : index
    %5 = vector.load %arg3[%c0_4, %c0_5] : memref<1x384xf32, #tpu.memory_space<vmem>>, vector<1x384xf32>
    %6 = vector.broadcast %5 : vector<1x384xf32> to vector<16x384xf32>
    %7 = arith.addf %4, %6 : vector<16x384xf32>
    %8 = vector.shape_cast %7 : vector<16x384xf32> to vector<2x8x384xf32>
    %cst_6 = arith.constant 0.000000e+00 : f32
    %9 = vector.broadcast %cst_6 : f32 to vector<16x128xf32>
    %10 = vector.extract_strided_slice %8 {offsets = [0, 0, 0], sizes = [2, 8, 96], strides = [1, 1, 1]} : vector<2x8x384xf32> to vector<2x8x96xf32>
    %11 = vector.extract_strided_slice %10 {offsets = [0, 0, 0], sizes = [2, 8, 32], strides = [1, 1, 1]} : vector<2x8x96xf32> to vector<2x8x32xf32>
    %12 = arith.truncf %11 : vector<2x8x32xf32> to vector<2x8x32xbf16>
    %13 = vector.extract_strided_slice %10 {offsets = [0, 0, 32], sizes = [2, 8, 32], strides = [1, 1, 1]} : vector<2x8x96xf32> to vector<2x8x32xf32>
    %14 = arith.truncf %13 : vector<2x8x32xf32> to vector<2x8x32xbf16>
    %15 = vector.extract_strided_slice %10 {offsets = [0, 0, 64], sizes = [2, 8, 32], strides = [1, 1, 1]} : vector<2x8x96xf32> to vector<2x8x32xf32>
    %16 = arith.truncf %15 : vector<2x8x32xf32> to vector<2x8x32xbf16>
    "tpu.trace_start"() <{level = 10 : i32, message = "bqd,bkd->bqk"}> : () -> ()
    %cst_7 = arith.constant dense<0.000000e+00> : vector<2x8x8xf32>
    %17 = tpu.matmul %12, %14, %cst_7 {dimension_numbers = #tpu.dot_dimension_numbers<[2], [2], [1], [1], [0, 0, 0, 1, 1, 1], [0], [0]>} : vector<2x8x32xbf16>, vector<2x8x32xbf16>, vector<2x8x8xf32> -> vector<2x8x8xf32>
    "tpu.trace_stop"() : () -> ()
    %cst_8 = arith.constant 0.176776692 : f32
    %18 = vector.broadcast %cst_8 : f32 to vector<2x8x8xf32>
    %19 = arith.mulf %17, %18 : vector<2x8x8xf32>
    %cst_9 = arith.constant dense<0xFF800000> : vector<2x8xf32>
    %20 = vector.multi_reduction <maximumf>, %19, %cst_9 [2] : vector<2x8x8xf32> to vector<2x8xf32>
    %21 = vector.shape_cast %20 : vector<2x8xf32> to vector<2x8x1xf32>
    %22 = vector.broadcast %21 : vector<2x8x1xf32> to vector<2x8x8xf32>
    %23 = arith.subf %19, %22 : vector<2x8x8xf32>
    %24 = math.exp %23 : vector<2x8x8xf32>
    %cst_10 = arith.constant dense<0.000000e+00> : vector<2x8xf32>
    %25 = vector.multi_reduction <add>, %24, %cst_10 [2] : vector<2x8x8xf32> to vector<2x8xf32>
    %26 = vector.shape_cast %25 : vector<2x8xf32> to vector<2x8x1xf32>
    %27 = tpu.reciprocal %26 {approx = true} : vector<2x8x1xf32> -> vector<2x8x1xf32>
    %28 = vector.broadcast %27 : vector<2x8x1xf32> to vector<2x8x8xf32>
    %29 = arith.mulf %24, %28 : vector<2x8x8xf32>
    %30 = arith.truncf %29 : vector<2x8x8xf32> to vector<2x8x8xbf16>
    "tpu.trace_start"() <{level = 10 : i32, message = "bqk,bkd->bqd"}> : () -> ()
    %cst_11 = arith.constant dense<0.000000e+00> : vector<2x8x32xf32>
    %31 = tpu.matmul %30, %16, %cst_11 {dimension_numbers = #tpu.dot_dimension_numbers<[2], [1], [1], [2], [0, 0, 0, 1, 1, 2], [0], [0]>} : vector<2x8x8xbf16>, vector<2x8x32xbf16>, vector<2x8x32xf32> -> vector<2x8x32xf32>
    "tpu.trace_stop"() : () -> ()
    %32 = vector.shape_cast %31 : vector<2x8x32xf32> to vector<16x32xf32>
    %33 = arith.truncf %32 : vector<16x32xf32> to vector<16x32xbf16>
    %c0_12 = arith.constant 0 : index
    %c0_13 = arith.constant 0 : index
    %34 = vector.load %arg4[%c0_12, %c0_13] : memref<128x128xbf16, #tpu.memory_space<vmem>>, vector<32x128xbf16>
    %cst_14 = arith.constant dense<0.000000e+00> : vector<16x128xf32>
    %35 = tpu.matmul %33, %34, %cst_14 {dimension_numbers = #tpu.dot_dimension_numbers<[1], [0], [0], [1], [0, 0, 1, 1], [], []>} : vector<16x32xbf16>, vector<32x128xbf16>, vector<16x128xf32> -> vector<16x128xf32>
    %36 = arith.addf %9, %35 : vector<16x128xf32>
    %37 = vector.extract_strided_slice %8 {offsets = [0, 0, 96], sizes = [2, 8, 96], strides = [1, 1, 1]} : vector<2x8x384xf32> to vector<2x8x96xf32>
    %38 = vector.extract_strided_slice %37 {offsets = [0, 0, 0], sizes = [2, 8, 32], strides = [1, 1, 1]} : vector<2x8x96xf32> to vector<2x8x32xf32>
    %39 = arith.truncf %38 : vector<2x8x32xf32> to vector<2x8x32xbf16>
    %40 = vector.extract_strided_slice %37 {offsets = [0, 0, 32], sizes = [2, 8, 32], strides = [1, 1, 1]} : vector<2x8x96xf32> to vector<2x8x32xf32>
    %41 = arith.truncf %40 : vector<2x8x32xf32> to vector<2x8x32xbf16>
    %42 = vector.extract_strided_slice %37 {offsets = [0, 0, 64], sizes = [2, 8, 32], strides = [1, 1, 1]} : vector<2x8x96xf32> to vector<2x8x32xf32>
    %43 = arith.truncf %42 : vector<2x8x32xf32> to vector<2x8x32xbf16>
    "tpu.trace_start"() <{level = 10 : i32, message = "bqd,bkd->bqk"}> : () -> ()
    %cst_15 = arith.constant dense<0.000000e+00> : vector<2x8x8xf32>
    %44 = tpu.matmul %39, %41, %cst_15 {dimension_numbers = #tpu.dot_dimension_numbers<[2], [2], [1], [1], [0, 0, 0, 1, 1, 1], [0], [0]>} : vector<2x8x32xbf16>, vector<2x8x32xbf16>, vector<2x8x8xf32> -> vector<2x8x8xf32>
    "tpu.trace_stop"() : () -> ()
    %cst_16 = arith.constant 0.176776692 : f32
    %45 = vector.broadcast %cst_16 : f32 to vector<2x8x8xf32>
    %46 = arith.mulf %44, %45 : vector<2x8x8xf32>
    %cst_17 = arith.constant dense<0xFF800000> : vector<2x8xf32>
    %47 = vector.multi_reduction <maximumf>, %46, %cst_17 [2] : vector<2x8x8xf32> to vector<2x8xf32>
    %48 = vector.shape_cast %47 : vector<2x8xf32> to vector<2x8x1xf32>
    %49 = vector.broadcast %48 : vector<2x8x1xf32> to vector<2x8x8xf32>
    %50 = arith.subf %46, %49 : vector<2x8x8xf32>
    %51 = math.exp %50 : vector<2x8x8xf32>
    %cst_18 = arith.constant dense<0.000000e+00> : vector<2x8xf32>
    %52 = vector.multi_reduction <add>, %51, %cst_18 [2] : vector<2x8x8xf32> to vector<2x8xf32>
    %53 = vector.shape_cast %52 : vector<2x8xf32> to vector<2x8x1xf32>
    %54 = tpu.reciprocal %53 {approx = true} : vector<2x8x1xf32> -> vector<2x8x1xf32>
    %55 = vector.broadcast %54 : vector<2x8x1xf32> to vector<2x8x8xf32>
    %56 = arith.mulf %51, %55 : vector<2x8x8xf32>
    %57 = arith.truncf %56 : vector<2x8x8xf32> to vector<2x8x8xbf16>
    "tpu.trace_start"() <{level = 10 : i32, message = "bqk,bkd->bqd"}> : () -> ()
    %cst_19 = arith.constant dense<0.000000e+00> : vector<2x8x32xf32>
    %58 = tpu.matmul %57, %43, %cst_19 {dimension_numbers = #tpu.dot_dimension_numbers<[2], [1], [1], [2], [0, 0, 0, 1, 1, 2], [0], [0]>} : vector<2x8x8xbf16>, vector<2x8x32xbf16>, vector<2x8x32xf32> -> vector<2x8x32xf32>
    "tpu.trace_stop"() : () -> ()
    %59 = vector.shape_cast %58 : vector<2x8x32xf32> to vector<16x32xf32>
    %60 = arith.truncf %59 : vector<16x32xf32> to vector<16x32xbf16>
    %c32 = arith.constant 32 : index
    %c0_20 = arith.constant 0 : index
    %61 = vector.load %arg4[%c32, %c0_20] : memref<128x128xbf16, #tpu.memory_space<vmem>>, vector<32x128xbf16>
    %cst_21 = arith.constant dense<0.000000e+00> : vector<16x128xf32>
    %62 = tpu.matmul %60, %61, %cst_21 {dimension_numbers = #tpu.dot_dimension_numbers<[1], [0], [0], [1], [0, 0, 1, 1], [], []>} : vector<16x32xbf16>, vector<32x128xbf16>, vector<16x128xf32> -> vector<16x128xf32>
    %63 = arith.addf %36, %62 : vector<16x128xf32>
    %64 = vector.extract_strided_slice %8 {offsets = [0, 0, 192], sizes = [2, 8, 96], strides = [1, 1, 1]} : vector<2x8x384xf32> to vector<2x8x96xf32>
    %65 = vector.extract_strided_slice %64 {offsets = [0, 0, 0], sizes = [2, 8, 32], strides = [1, 1, 1]} : vector<2x8x96xf32> to vector<2x8x32xf32>
    %66 = arith.truncf %65 : vector<2x8x32xf32> to vector<2x8x32xbf16>
    %67 = vector.extract_strided_slice %64 {offsets = [0, 0, 32], sizes = [2, 8, 32], strides = [1, 1, 1]} : vector<2x8x96xf32> to vector<2x8x32xf32>
    %68 = arith.truncf %67 : vector<2x8x32xf32> to vector<2x8x32xbf16>
    %69 = vector.extract_strided_slice %64 {offsets = [0, 0, 64], sizes = [2, 8, 32], strides = [1, 1, 1]} : vector<2x8x96xf32> to vector<2x8x32xf32>
    %70 = arith.truncf %69 : vector<2x8x32xf32> to vector<2x8x32xbf16>
    "tpu.trace_start"() <{level = 10 : i32, message = "bqd,bkd->bqk"}> : () -> ()
    %cst_22 = arith.constant dense<0.000000e+00> : vector<2x8x8xf32>
    %71 = tpu.matmul %66, %68, %cst_22 {dimension_numbers = #tpu.dot_dimension_numbers<[2], [2], [1], [1], [0, 0, 0, 1, 1, 1], [0], [0]>} : vector<2x8x32xbf16>, vector<2x8x32xbf16>, vector<2x8x8xf32> -> vector<2x8x8xf32>
    "tpu.trace_stop"() : () -> ()
    %cst_23 = arith.constant 0.176776692 : f32
    %72 = vector.broadcast %cst_23 : f32 to vector<2x8x8xf32>
    %73 = arith.mulf %71, %72 : vector<2x8x8xf32>
    %cst_24 = arith.constant dense<0xFF800000> : vector<2x8xf32>
    %74 = vector.multi_reduction <maximumf>, %73, %cst_24 [2] : vector<2x8x8xf32> to vector<2x8xf32>
    %75 = vector.shape_cast %74 : vector<2x8xf32> to vector<2x8x1xf32>
    %76 = vector.broadcast %75 : vector<2x8x1xf32> to vector<2x8x8xf32>
    %77 = arith.subf %73, %76 : vector<2x8x8xf32>
    %78 = math.exp %77 : vector<2x8x8xf32>
    %cst_25 = arith.constant dense<0.000000e+00> : vector<2x8xf32>
    %79 = vector.multi_reduction <add>, %78, %cst_25 [2] : vector<2x8x8xf32> to vector<2x8xf32>
    %80 = vector.shape_cast %79 : vector<2x8xf32> to vector<2x8x1xf32>
    %81 = tpu.reciprocal %80 {approx = true} : vector<2x8x1xf32> -> vector<2x8x1xf32>
    %82 = vector.broadcast %81 : vector<2x8x1xf32> to vector<2x8x8xf32>
    %83 = arith.mulf %78, %82 : vector<2x8x8xf32>
    %84 = arith.truncf %83 : vector<2x8x8xf32> to vector<2x8x8xbf16>
    "tpu.trace_start"() <{level = 10 : i32, message = "bqk,bkd->bqd"}> : () -> ()
    %cst_26 = arith.constant dense<0.000000e+00> : vector<2x8x32xf32>
    %85 = tpu.matmul %84, %70, %cst_26 {dimension_numbers = #tpu.dot_dimension_numbers<[2], [1], [1], [2], [0, 0, 0, 1, 1, 2], [0], [0]>} : vector<2x8x8xbf16>, vector<2x8x32xbf16>, vector<2x8x32xf32> -> vector<2x8x32xf32>
    "tpu.trace_stop"() : () -> ()
    %86 = vector.shape_cast %85 : vector<2x8x32xf32> to vector<16x32xf32>
    %87 = arith.truncf %86 : vector<16x32xf32> to vector<16x32xbf16>
    %c64 = arith.constant 64 : index
    %c0_27 = arith.constant 0 : index
    %88 = vector.load %arg4[%c64, %c0_27] : memref<128x128xbf16, #tpu.memory_space<vmem>>, vector<32x128xbf16>
    %cst_28 = arith.constant dense<0.000000e+00> : vector<16x128xf32>
    %89 = tpu.matmul %87, %88, %cst_28 {dimension_numbers = #tpu.dot_dimension_numbers<[1], [0], [0], [1], [0, 0, 1, 1], [], []>} : vector<16x32xbf16>, vector<32x128xbf16>, vector<16x128xf32> -> vector<16x128xf32>
    %90 = arith.addf %63, %89 : vector<16x128xf32>
    %91 = vector.extract_strided_slice %8 {offsets = [0, 0, 288], sizes = [2, 8, 96], strides = [1, 1, 1]} : vector<2x8x384xf32> to vector<2x8x96xf32>
    %92 = vector.extract_strided_slice %91 {offsets = [0, 0, 0], sizes = [2, 8, 32], strides = [1, 1, 1]} : vector<2x8x96xf32> to vector<2x8x32xf32>
    %93 = arith.truncf %92 : vector<2x8x32xf32> to vector<2x8x32xbf16>
    %94 = vector.extract_strided_slice %91 {offsets = [0, 0, 32], sizes = [2, 8, 32], strides = [1, 1, 1]} : vector<2x8x96xf32> to vector<2x8x32xf32>
    %95 = arith.truncf %94 : vector<2x8x32xf32> to vector<2x8x32xbf16>
    %96 = vector.extract_strided_slice %91 {offsets = [0, 0, 64], sizes = [2, 8, 32], strides = [1, 1, 1]} : vector<2x8x96xf32> to vector<2x8x32xf32>
    %97 = arith.truncf %96 : vector<2x8x32xf32> to vector<2x8x32xbf16>
    "tpu.trace_start"() <{level = 10 : i32, message = "bqd,bkd->bqk"}> : () -> ()
    %cst_29 = arith.constant dense<0.000000e+00> : vector<2x8x8xf32>
    %98 = tpu.matmul %93, %95, %cst_29 {dimension_numbers = #tpu.dot_dimension_numbers<[2], [2], [1], [1], [0, 0, 0, 1, 1, 1], [0], [0]>} : vector<2x8x32xbf16>, vector<2x8x32xbf16>, vector<2x8x8xf32> -> vector<2x8x8xf32>
    "tpu.trace_stop"() : () -> ()
    %cst_30 = arith.constant 0.176776692 : f32
    %99 = vector.broadcast %cst_30 : f32 to vector<2x8x8xf32>
    %100 = arith.mulf %98, %99 : vector<2x8x8xf32>
    %cst_31 = arith.constant dense<0xFF800000> : vector<2x8xf32>
    %101 = vector.multi_reduction <maximumf>, %100, %cst_31 [2] : vector<2x8x8xf32> to vector<2x8xf32>
    %102 = vector.shape_cast %101 : vector<2x8xf32> to vector<2x8x1xf32>
    %103 = vector.broadcast %102 : vector<2x8x1xf32> to vector<2x8x8xf32>
    %104 = arith.subf %100, %103 : vector<2x8x8xf32>
    %105 = math.exp %104 : vector<2x8x8xf32>
    %cst_32 = arith.constant dense<0.000000e+00> : vector<2x8xf32>
    %106 = vector.multi_reduction <add>, %105, %cst_32 [2] : vector<2x8x8xf32> to vector<2x8xf32>
    %107 = vector.shape_cast %106 : vector<2x8xf32> to vector<2x8x1xf32>
    %108 = tpu.reciprocal %107 {approx = true} : vector<2x8x1xf32> -> vector<2x8x1xf32>
    %109 = vector.broadcast %108 : vector<2x8x1xf32> to vector<2x8x8xf32>
    %110 = arith.mulf %105, %109 : vector<2x8x8xf32>
    %111 = arith.truncf %110 : vector<2x8x8xf32> to vector<2x8x8xbf16>
    "tpu.trace_start"() <{level = 10 : i32, message = "bqk,bkd->bqd"}> : () -> ()
    %cst_33 = arith.constant dense<0.000000e+00> : vector<2x8x32xf32>
    %112 = tpu.matmul %111, %97, %cst_33 {dimension_numbers = #tpu.dot_dimension_numbers<[2], [1], [1], [2], [0, 0, 0, 1, 1, 2], [0], [0]>} : vector<2x8x8xbf16>, vector<2x8x32xbf16>, vector<2x8x32xf32> -> vector<2x8x32xf32>
    "tpu.trace_stop"() : () -> ()
    %113 = vector.shape_cast %112 : vector<2x8x32xf32> to vector<16x32xf32>
    %114 = arith.truncf %113 : vector<16x32xf32> to vector<16x32xbf16>
    %c96 = arith.constant 96 : index
    %c0_34 = arith.constant 0 : index
    %115 = vector.load %arg4[%c96, %c0_34] : memref<128x128xbf16, #tpu.memory_space<vmem>>, vector<32x128xbf16>
    %cst_35 = arith.constant dense<0.000000e+00> : vector<16x128xf32>
    %116 = tpu.matmul %114, %115, %cst_35 {dimension_numbers = #tpu.dot_dimension_numbers<[1], [0], [0], [1], [0, 0, 1, 1], [], []>} : vector<16x32xbf16>, vector<32x128xbf16>, vector<16x128xf32> -> vector<16x128xf32>
    %117 = arith.addf %90, %116 : vector<16x128xf32>
    %c0_36 = arith.constant 0 : index
    %c0_37 = arith.constant 0 : index
    %118 = vector.load %arg5[%c0_36, %c0_37] : memref<1x128xf32, #tpu.memory_space<vmem>>, vector<1x128xf32>
    %119 = vector.broadcast %118 : vector<1x128xf32> to vector<16x128xf32>
    %120 = arith.addf %117, %119 : vector<16x128xf32>
    %121 = arith.addf %1, %120 : vector<16x128xf32>
    %c0_38 = arith.constant 0 : index
    %c0_39 = arith.constant 0 : index
    %122 = vector.load %arg10[%c0_38, %c0_39] : memref<1x128xf32, #tpu.memory_space<vmem>>, vector<1x128xf32>
    %123 = vector.broadcast %122 : vector<1x128xf32> to vector<16x128xf32>
    %124 = arith.mulf %121, %123 : vector<16x128xf32>
    %c0_40 = arith.constant 0 : index
    %c0_41 = arith.constant 0 : index
    %125 = vector.load %arg11[%c0_40, %c0_41] : memref<1x128xf32, #tpu.memory_space<vmem>>, vector<1x128xf32>
    %126 = vector.broadcast %125 : vector<1x128xf32> to vector<16x128xf32>
    %127 = arith.addf %124, %126 : vector<16x128xf32>
    %128 = arith.truncf %127 : vector<16x128xf32> to vector<16x128xbf16>
    %c0_42 = arith.constant 0 : index
    %c0_43 = arith.constant 0 : index
    %129 = vector.load %arg6[%c0_42, %c0_43] : memref<128x256xbf16, #tpu.memory_space<vmem>>, vector<128x256xbf16>
    %cst_44 = arith.constant dense<0.000000e+00> : vector<16x256xf32>
    %130 = tpu.matmul %128, %129, %cst_44 {dimension_numbers = #tpu.dot_dimension_numbers<[1], [0], [0], [1], [0, 0, 1, 1], [], []>} : vector<16x128xbf16>, vector<128x256xbf16>, vector<16x256xf32> -> vector<16x256xf32>
    %c0_45 = arith.constant 0 : index
    %c0_46 = arith.constant 0 : index
    %131 = vector.load %arg7[%c0_45, %c0_46] : memref<1x256xf32, #tpu.memory_space<vmem>>, vector<1x256xf32>
    %132 = vector.broadcast %131 : vector<1x256xf32> to vector<16x256xf32>
    %133 = arith.addf %130, %132 : vector<16x256xf32>
    %cst_47 = arith.constant 0.000000e+00 : f32
    %134 = vector.broadcast %cst_47 : f32 to vector<16x256xf32>
    %135 = arith.maximumf %133, %134 : vector<16x256xf32>
    %136 = arith.truncf %135 : vector<16x256xf32> to vector<16x256xbf16>
    %c0_48 = arith.constant 0 : index
    %c0_49 = arith.constant 0 : index
    %137 = vector.load %arg8[%c0_48, %c0_49] : memref<256x128xbf16, #tpu.memory_space<vmem>>, vector<256x128xbf16>
    %cst_50 = arith.constant dense<0.000000e+00> : vector<16x128xf32>
    %138 = tpu.matmul %136, %137, %cst_50 {dimension_numbers = #tpu.dot_dimension_numbers<[1], [0], [0], [1], [0, 0, 1, 1], [], []>} : vector<16x256xbf16>, vector<256x128xbf16>, vector<16x128xf32> -> vector<16x128xf32>
    %c0_51 = arith.constant 0 : index
    %c0_52 = arith.constant 0 : index
    %139 = vector.load %arg9[%c0_51, %c0_52] : memref<1x128xf32, #tpu.memory_space<vmem>>, vector<1x128xf32>
    %140 = vector.broadcast %139 : vector<1x128xf32> to vector<16x128xf32>
    %141 = arith.addf %138, %140 : vector<16x128xf32>
    %142 = arith.addf %127, %141 : vector<16x128xf32>
    %c0_53 = arith.constant 0 : index
    %c0_54 = arith.constant 0 : index
    %143 = vector.load %arg12[%c0_53, %c0_54] : memref<1x128xf32, #tpu.memory_space<vmem>>, vector<1x128xf32>
    %144 = vector.broadcast %143 : vector<1x128xf32> to vector<16x128xf32>
    %145 = arith.mulf %142, %144 : vector<16x128xf32>
    %c0_55 = arith.constant 0 : index
    %c0_56 = arith.constant 0 : index
    %146 = vector.load %arg13[%c0_55, %c0_56] : memref<1x128xf32, #tpu.memory_space<vmem>>, vector<1x128xf32>
    %147 = vector.broadcast %146 : vector<1x128xf32> to vector<16x128xf32>
    %148 = arith.addf %145, %147 : vector<16x128xf32>
    %149 = vector.shape_cast %148 : vector<16x128xf32> to vector<2x8x128xf32>
    %c0_57 = arith.constant 0 : index
    %c0_58 = arith.constant 0 : index
    %c0_59 = arith.constant 0 : index
    %150 = vector.load %arg14[%c0_57, %c0_58, %c0_59] : memref<2x8x128xf32, #tpu.memory_space<vmem>>, vector<2x8x128xf32>
    tpu.vector_store %arg14[%c0_57, %c0_58, %c0_59], %149 {strides = array<i32>} : memref<2x8x128xf32, #tpu.memory_space<vmem>>, vector<2x8x128xf32>,
    return
  }
  func.func @transform_0(%arg0: i32) -> (i32, i32, i32) {
    %c0_i32 = arith.constant 0 : i32
    %c0_i32_0 = arith.constant 0 : i32
    %c0_i32_1 = arith.constant 0 : i32
    return %arg0, %c0_i32, %c0_i32_0 : i32, i32, i32
  }
  func.func @transform_1(%arg0: i32) -> (i32, i32) {
    %c0_i32 = arith.constant 0 : i32
    %c0_i32_0 = arith.constant 0 : i32
    %c0_i32_1 = arith.constant 0 : i32
    return %c0_i32, %c0_i32_0 : i32, i32
  }
  func.func @transform_2(%arg0: i32) -> (i32, i32) {
    %c0_i32 = arith.constant 0 : i32
    %c0_i32_0 = arith.constant 0 : i32
    %c0_i32_1 = arith.constant 0 : i32
    return %c0_i32, %c0_i32_0 : i32, i32
  }
  func.func @transform_3(%arg0: i32) -> (i32, i32) {
    %c0_i32 = arith.constant 0 : i32
    %c0_i32_0 = arith.constant 0 : i32
    %c0_i32_1 = arith.constant 0 : i32
    return %c0_i32, %c0_i32_0 : i32, i32
  }
  func.func @transform_4(%arg0: i32) -> (i32, i32) {
    %c0_i32 = arith.constant 0 : i32
    %c0_i32_0 = arith.constant 0 : i32
    %c0_i32_1 = arith.constant 0 : i32
    return %c0_i32, %c0_i32_0 : i32, i32
  }
  func.func @transform_5(%arg0: i32) -> (i32, i32) {
    %c0_i32 = arith.constant 0 : i32
    %c0_i32_0 = arith.constant 0 : i32
    %c0_i32_1 = arith.constant 0 : i32
    return %c0_i32, %c0_i32_0 : i32, i32
  }
  func.func @transform_6(%arg0: i32) -> (i32, i32) {
    %c0_i32 = arith.constant 0 : i32
    %c0_i32_0 = arith.constant 0 : i32
    %c0_i32_1 = arith.constant 0 : i32
    return %c0_i32, %c0_i32_0 : i32, i32
  }
  func.func @transform_7(%arg0: i32) -> (i32, i32) {
    %c0_i32 = arith.constant 0 : i32
    %c0_i32_0 = arith.constant 0 : i32
    %c0_i32_1 = arith.constant 0 : i32
    return %c0_i32, %c0_i32_0 : i32, i32
  }
  func.func @transform_8(%arg0: i32) -> (i32, i32) {
    %c0_i32 = arith.constant 0 : i32
    %c0_i32_0 = arith.constant 0 : i32
    %c0_i32_1 = arith.constant 0 : i32
    return %c0_i32, %c0_i32_0 : i32, i32
  }
  func.func @transform_9(%arg0: i32) -> (i32, i32) {
    %c0_i32 = arith.constant 0 : i32
    %c0_i32_0 = arith.constant 0 : i32
    %c0_i32_1 = arith.constant 0 : i32
    return %c0_i32, %c0_i32_0 : i32, i32
  }
  func.func @transform_10(%arg0: i32) -> (i32, i32) {
    %c0_i32 = arith.constant 0 : i32
    %c0_i32_0 = arith.constant 0 : i32
    %c0_i32_1 = arith.constant 0 : i32
    return %c0_i32, %c0_i32_0 : i32, i32
  }
  func.func @transform_11(%arg0: i32) -> (i32, i32) {
    %c0_i32 = arith.constant 0 : i32
    %c0_i32_0 = arith.constant 0 : i32
    %c0_i32_1 = arith.constant 0 : i32
    return %c0_i32, %c0_i32_0 : i32, i32
  }
  func.func @transform_12(%arg0: i32) -> (i32, i32) {
    %c0_i32 = arith.constant 0 : i32
    %c0_i32_0 = arith.constant 0 : i32
    %c0_i32_1 = arith.constant 0 : i32
    return %c0_i32, %c0_i32_0 : i32, i32
  }
  func.func @transform_13(%arg0: i32) -> (i32, i32, i32) {
    %c0_i32 = arith.constant 0 : i32
    %c0_i32_0 = arith.constant 0 : i32
    %c0_i32_1 = arith.constant 0 : i32
    return %arg0, %c0_i32, %c0_i32_0 : i32, i32, i32
  }
}

</mosaic_0001>

<bundles_post_ra>
// kernel: tpu_custom_call.1
= control target key start
LH: loop header
LB: loop body
LE: loop exit
PB: predicated region body
PF: predicated region fallthrough
CT: control target
= control target key end

     0   :  { %18 = vsyncpa [#allocation3], 0  ;;  %s2876_s0 = inlined_call_operand.hbm [shape: f32[2,8,128], index: 0, kind: input, shape index: {}]   ;;  %s2877_s1 = inlined_call_operand.hbm [shape: bf16[128,384], index: 1, kind: input, shape index: {}]   ;;  %s2878_s2 = inlined_call_operand.vmem [shape: f32[1,384], index: 2, kind: input, shape index: {}]   ;;  %s2879_s3 = inlined_call_operand.hbm [shape: bf16[128,128], index: 3, kind: input, shape index: {}]   ;;  %s2880_s4 = inlined_call_operand.vmem [shape: f32[1,128], index: 4, kind: input, shape index: {}]   ;;  %s2881_s5 = inlined_call_operand.hbm [shape: bf16[128,256], index: 5, kind: input, shape index: {}]   ;;  %s2882_s6 = inlined_call_operand.vmem [shape: f32[1,256], index: 6, kind: input, shape index: {}]   ;;  %s2883_s7 = inlined_call_operand.hbm [shape: bf16[256,128], index: 7, kind: input, shape index: {}]   ;;  %s2884_s8 = inlined_call_operand.vmem [shape: f32[1,128], index: 8, kind: input, shape index: {}]   ;;  %s2885_s9 = inlined_call_operand.vmem [shape: f32[1,128], index: 9, kind: input, shape index: {}]   ;;  %s2886_s10 = inlined_call_operand.vmem [shape: f32[1,128], index: 10, kind: input, shape index: {}]   ;;  %s2887_s11 = inlined_call_operand.vmem [shape: f32[1,128], index: 11, kind: input, shape index: {}]   ;;  %s2888_s12 = inlined_call_operand.vmem [shape: f32[1,128], index: 12, kind: input, shape index: {}]   ;;  %s2889_s13 = inlined_call_operand.hbm [shape: f32[2,8,128], index: 13, kind: output, shape index: {}]  }
   0x1   :  { %19 = vsyncpa [#allocation6], 0 }
   0x2   :  { %20 = vsyncpa [#allocation9], 0 }
   0x3   :  { %21 = vsyncpa [#allocation4], 0  ;;  %s2493_s25 = smov [#allocation5]  }
   0x4   :  { %s39_s26 = sshll.u32 %s2493_s25, 4  ;;  %s40_s26 = int_to_ptr.vmem [resolvable:$true] %s39_s26 }
   0x5   :  { %s2373_s27 = scalar_lea.vmem %s40_s26, 3072  ;;  %p2378_p1 = scmp.lt.s32.totalorder %s40_s26, %s40_s26 }
   0x6   :  { %p2374_p0 = scmp.ne.s32.totalorder %s40_s26, %s2373_s27  ;;  %p2379_p2 = scmp.lt.s32.totalorder %s2373_s27, %s2373_s27 }
   0x8   :  { %p2380_p3 = por %p2379_p2, %p2378_p1 }
   0xa   :  { %p2381_p4 = pnand %p2380_p3, %p2374_p0 }
   0xc   :  { %2384 = shalt.err (!%p2381_p4)
}
   0xd   :  { %s2494_s28 = smov 192   ;;  %s2495_s29 = smov 12  }
   0xe   :  { %45 = dma.hbm_to_vmem [thread:$0]  %s2877_s1, 3072, %s40_s26, [#allocation6], %s2494_s28, %s2494_s28, %s2495_s29  }
   0xf   :  { %s2496_s15 = smov [#allocation8]   ;;  %s2497_s17 = smov [#allocation2]  }
  0x10   :  { %s67_s16 = sshll.u32 %s2496_s15, 4  ;;  %s27_s18 = sshll.u32 %s2497_s17, 4  ;;  %s68_s16 = int_to_ptr.vmem [resolvable:$true] %s67_s16  ;;  %s28_s18 = int_to_ptr.vmem [resolvable:$true] %s27_s18 }
  0x11   :  { %s2393_s19 = scalar_lea.vmem %s68_s16, 2048  ;;  %p2398_p6 = scmp.lt.s32.totalorder %s68_s16, %s68_s16 }
  0x12   :  { %p2394_p5 = scmp.ne.s32.totalorder %s68_s16, %s2393_s19  ;;  %p2399_p7 = scmp.lt.s32.totalorder %s2393_s19, %s2393_s19 }
  0x14   :  { %p2400_p8 = por %p2399_p7, %p2398_p6 }
  0x16   :  { %p2401_p9 = pnand %p2400_p8, %p2394_p5 }
  0x18   :  { %2404 = shalt.err (!%p2401_p9)
}
  0x19   :  { %s2498_s20 = smov 128   ;;  %s2499_s21 = smov 8  }
  0x1a   :  { %73 = dma.hbm_to_vmem [thread:$0]  %s2881_s5, 2048, %s68_s16, [#allocation9], %s2498_s20, %s2498_s20, %s2499_s21  }
  0x1b   :  { %s2413_s1 = scalar_lea.vmem %s28_s18, 256  ;;  %p2418_p11 = scmp.lt.s32.totalorder %s28_s18, %s28_s18 }
  0x1c   :  { %p2414_p10 = scmp.ne.s32.totalorder %s28_s18, %s2413_s1  ;;  %p2419_p12 = scmp.lt.s32.totalorder %s2413_s1, %s2413_s1 }
  0x1e   :  { %p2420_p13 = por %p2419_p12, %p2418_p11 }
  0x20   :  { %p2421_p0 = pnand %p2420_p13, %p2414_p10 }
  0x22   :  { %2424 = shalt.err (!%p2421_p0)
}
  0x23   :  { %33 = dma.hbm_to_vmem [thread:$0]  %s2876_s0, 256, %s28_s18, [#allocation3], %s2498_s20, %s2498_s20, %s2499_s21  }
  0x24   :  { %s2500_s26 = smov [#allocation7]  }
  0x25   :  { %s53_s27 = sshll.u32 %s2500_s26, 4  ;;  %s54_s27 = int_to_ptr.vmem [resolvable:$true] %s53_s27 }
  0x26   :  { %s2433_s28 = scalar_lea.vmem %s54_s27, 1024  ;;  %p2438_p2 = scmp.lt.s32.totalorder %s54_s27, %s54_s27 }
  0x27   :  { %p2434_p1 = scmp.ne.s32.totalorder %s54_s27, %s2433_s28  ;;  %p2439_p3 = scmp.lt.s32.totalorder %s2433_s28, %s2433_s28 }
  0x29   :  { %p2440_p4 = por %p2439_p3, %p2438_p2 }
  0x2b   :  { %p2441_p5 = pnand %p2440_p4, %p2434_p1 }
  0x2d   :  { %2444 = shalt.err (!%p2441_p5)
}
  0x2e   :  { %s2501_s5 = smov 64   ;;  %s2502_s29 = smov 4  }
  0x2f   :  { %59 = dma.hbm_to_vmem [thread:$0]  %s2879_s3, 1024, %s54_s27, [#allocation6], %s2501_s5, %s2501_s5, %s2502_s29  }
  0x30   :  { %s2503_s15 = smov [#allocation10]  }
  0x31   :  { %s81_s0 = sshll.u32 %s2503_s15, 4  ;;  %s82_s0 = int_to_ptr.vmem [resolvable:$true] %s81_s0 }
  0x32   :  { %s2453_s16 = scalar_lea.vmem %s82_s0, 2048  ;;  %p2458_p7 = scmp.lt.s32.totalorder %s82_s0, %s82_s0 }
  0x33   :  { %p2454_p6 = scmp.ne.s32.totalorder %s82_s0, %s2453_s16  ;;  %p2459_p8 = scmp.lt.s32.totalorder %s2453_s16, %s2453_s16 }
  0x35   :  { %p2460_p9 = por %p2459_p8, %p2458_p7 }
  0x37   :  { %p2461_p10 = pnand %p2460_p9, %p2454_p6 }
  0x39   :  { %2464 = shalt.err (!%p2461_p10)
}
  0x3a   :  { %87 = dma.hbm_to_vmem [thread:$0]  %s2883_s7, 2048, %s82_s0, [#allocation9], %s2501_s5, %s2501_s5, %s2502_s29  }
  0x3b   :  { %2485 = dma.done.wait [#allocation3], 256  }
  0x3c   :  { %2486 = vsyncadd [#allocation3], 4294967040 }
  0x3d   :  { %2487 = dma.done.wait [#allocation6], 4096  }
  0x3e   :  { %2488 = vsyncadd [#allocation6], 4294963200 }
  0x3f   :  { %2489 = dma.done.wait [#allocation9], 4096  }
  0x40   :  { %2490 = vsyncadd [#allocation9], 4294963200  ;;  %v2504_v0 = vmov 0   ;;  %v2251_v1 = vld [vmem:[#allocation5 + $0xac] ss:$12 sps:$4 sm:$0xff]   ;;  %v114_v17 = vld [vmem:[#allocation2] sm:$0xff]  ;;  %v151_v29 = vlaneseq }
  0x41   :  { %326 = vmatprep.mubr.bf16.mxu0 %v2504_v0  ;;  %v2253_v2 = vld [vmem:[#allocation5 + $0xa8] ss:$12 sps:$4 sm:$0xff]   ;;  %294 = vmatprep.subr.bf16.mxu0 %v2251_v1  ;;  %v2256_v4 = vld [vmem:[#allocation5 + $0x90] ss:$12 sps:$4 sm:$0xff]   ;;  %v2259_v6 = vld [vmem:[#allocation5 + $0x78] ss:$12 sps:$4 sm:$0xff]  }
  0x42   :  { %v2254_v3 = vld [vmem:[#allocation5 + $0x94] ss:$12 sps:$4 sm:$0xff]   ;;  %295 = vmatpush1.bf16.msra.mxu0 %v2253_v2  ;;  %v2257_v5 = vld [vmem:[#allocation5 + $0x7c] ss:$12 sps:$4 sm:$0xff]   ;;  %v2260_v7 = vld [vmem:[#allocation5 + $0x64] ss:$12 sps:$4 sm:$0xff]  }
  0x43   :  { %296 = vmatprep.subr.bf16.mxu0 %v2254_v3  ;;  %v2262_v8 = vld [vmem:[#allocation5 + $0x60] ss:$12 sps:$4 sm:$0xff]   ;;  %v2265_v10 = vld [vmem:[#allocation5 + $0x48] ss:$12 sps:$4 sm:$0xff]   ;;  %v2268_v12 = vld [vmem:[#allocation5 + $0x30] ss:$12 sps:$4 sm:$0xff]  }
  0x44   :  { %v2263_v9 = vld [vmem:[#allocation5 + $0x4c] ss:$12 sps:$4 sm:$0xff]   ;;  %v2266_v11 = vld [vmem:[#allocation5 + $0x34] ss:$12 sps:$4 sm:$0xff]   ;;  %v2269_v13 = vld [vmem:[#allocation5 + $0x1c] ss:$12 sps:$4 sm:$0xff]  }
  0x45   :  { %v2271_v14 = vld [vmem:[#allocation5 + $0x18] ss:$12 sps:$4 sm:$0xff]   ;;  %v2274_v16 = vld [vmem:[#allocation5] ss:$12 sps:$4 sm:$0xff]   ;;  %v2275_v20 = vld [vmem:[#allocation5 + $0xb0] ss:$12 sps:$4 sm:$0xff]  }
  0x46   :  { %297 = vmatpush1.bf16.msra.mxu0 %v2256_v4  ;;  %v2272_v15 = vld [vmem:[#allocation5 + $0x4] ss:$12 sps:$4 sm:$0xff]   ;;  %v115_v18 = vld [vmem:[#allocation2 + $0x8] sm:$0xff]  ;;  %v2505_v21 = vmov 0.0   ;;  %vm2506_vm0 = vmmov 0   ;;  %v2622_v30 = vshrl.u32 %v151_v29, 7 }
  0x47   :  { %298 = vmatprep.subr.bf16.mxu0 %v2257_v5  ;;  %v116_v19 = vpack.c.bf16 %v115_v18, %v114_v17  ;;  %2086 = vmatprep.subr.bf16.mxu1 %v2505_v21  ;;  %v2276_v22 = vld [vmem:[#allocation5 + $0x98] ss:$12 sps:$4 sm:$0xff]   ;;  %v2277_v23 = vld [vmem:[#allocation5 + $0x80] ss:$12 sps:$4 sm:$0xff]   ;;  %v2278_v24 = vld [vmem:[#allocation5 + $0x68] ss:$12 sps:$4 sm:$0xff]  }
  0x48   :  { %2102 = vmatprep.mubr.msk.bf16.mxu1 %vm2506_vm0, %v2505_v21  ;;  %2087 = vmatpush3.bf16.msra.mxu1 %v2275_v20  ;;  %v2279_v25 = vld [vmem:[#allocation5 + $0x50] ss:$12 sps:$4 sm:$0xff]   ;;  %v2280_v26 = vld [vmem:[#allocation5 + $0x38] ss:$12 sps:$4 sm:$0xff]   ;;  %v2281_v27 = vld [vmem:[#allocation5 + $0x20] ss:$12 sps:$4 sm:$0xff]  }
  0x49   :  { %2088 = vmatprep.subr.bf16.mxu1 %v2505_v21  ;;  %v2282_v28 = vld [vmem:[#allocation5 + $0x8] ss:$12 sps:$4 sm:$0xff]   ;;  %v153_v31 = vsub.s32 0, %v2622_v30  ;;  %v2628_v32 = vld [vmem:[%s2878_s2] sm:$0x7]  ;;  %s2507_s19 = smov 96  }
  0x4a   :  { %299 = vmatpush1.bf16.msra.mxu0 %v2259_v6  ;;  %v161_v41 = vsub.s32 2, %v2622_v30  ;;  %vm383_vm1 = vcmask 261120   ;;  %vm481_vm2 = vcmask 64512   ;;  %vm511_vm3 = vcmask 1043456   ;;  %s2508_s2 = smov 32  }
  0x4b   :  { %300 = vmatprep.subr.bf16.mxu0 %v2260_v7  ;;  %v154_v33 = vrot.slane %v2628_v32, %v153_v31  ;;  %v157_v17 = vsub.s32 1, %v2622_v30  ;;  %v1992_v30 = vld [vmem:[%s2884_s8] ss:$0 sm:$0xff]  ;;  %s2509_s8 = smov [#allocation11]  }
  0x4c   :  { %2089 = vmatpush3.bf16.msra.mxu1 %v2276_v22  ;;  %v2645_v42 = vrot.slane %v2628_v32, %v161_v41  ;;  %s1907_s30 = sshll.u32 %s2509_s8, 4  ;;  %s1908_s30 = int_to_ptr.vmem [resolvable:$true] %s1907_s30 }
  0x4d   :  { %2090 = vmatprep.subr.bf16.mxu1 %v2505_v21  ;;  %s2465_s14 = scalar_lea.vmem %s1908_s30, 256  ;;  %p2470_p12 = scmp.lt.s32.totalorder %s1908_s30, %s1908_s30 }
  0x4e   :  { %301 = vmatpush1.bf16.msra.mxu0 %v2262_v8  ;;  %p2466_p11 = scmp.ne.s32.totalorder %s1908_s30, %s2465_s14  ;;  %p2471_p13 = scmp.lt.s32.totalorder %s2465_s14, %s2465_s14 }
  0x4f   :  { %302 = vmatprep.subr.bf16.mxu0 %v2263_v9 }
  0x50   :  { %2091 = vmatpush3.bf16.msra.mxu1 %v2277_v23  ;;  %p2472_p0 = por %p2471_p13, %p2470_p12 }
  0x51   :  { %2092 = vmatprep.subr.bf16.mxu1 %v2505_v21 }
  0x52   :  { %303 = vmatpush1.bf16.msra.mxu0 %v2265_v10  ;;  %p2473_p1 = pnand %p2472_p0, %p2466_p11 }
  0x53   :  { %304 = vmatprep.subr.bf16.mxu0 %v2266_v11 }
  0x54   :  { %2093 = vmatpush3.bf16.msra.mxu1 %v2278_v24 }
  0x55   :  { %2094 = vmatprep.subr.bf16.mxu1 %v2505_v21 }
  0x56   :  { %305 = vmatpush1.bf16.msra.mxu0 %v2268_v12 }
  0x57   :  { %306 = vmatprep.subr.bf16.mxu0 %v2269_v13 }
  0x58   :  { %2095 = vmatpush3.bf16.msra.mxu1 %v2279_v25 }
  0x59   :  { %2096 = vmatprep.subr.bf16.mxu1 %v2505_v21 }
  0x5a   :  { %307 = vmatpush1.bf16.msra.mxu0 %v2271_v14 }
  0x5b   :  { %308 = vmatprep.subr.bf16.mxu0 %v2272_v15 }
  0x5c   :  { %2097 = vmatpush3.bf16.msra.mxu1 %v2280_v26 }
  0x5d   :  { %2098 = vmatprep.subr.bf16.mxu1 %v2505_v21 }
  0x5e   :  { %309 = vmatpush1.bf16.msra.mxu0 %v2274_v16 }
  0x5f   :  { %2106 = vmatprep.subr.bf16.mxu0 %v2505_v21 }
  0x60   :  { %2099 = vmatpush3.bf16.msra.mxu1 %v2281_v27 }
  0x61   :  { %327 = vmatmul.mubr.bf16.vlgmr.msra.gmra.mxu0 %v116_v19  ;;  %2100 = vmatprep.subr.bf16.mxu1 %v2505_v21 }
  0x62   :  { %2108 = vmatprep.mubr.msk.bf16.mxu0 %vm2506_vm0, %v2505_v21 }
  0x64   :  { %2101 = vmatpush3.bf16.msra.mxu1 %v2282_v28 }
  0x65   :  { %2112 = vmatprep.subr.bf16.mxu1 %v2505_v21 }
  0x67   :  { %2103 = vmatmul.mubr.bf16.vlgmr.msra.gmra.mxu1 %v116_v19  ;;  %v158_v19 = vrot.slane %v2628_v32, %v157_v17 }
  0x68   :  { %2114 = vmatprep.mubr.msk.bf16.mxu1 %vm2506_vm0, %v2505_v21 }
 0x121   :  { %v328_v34 = vpop.f32.mrf.mxu0 }
 0x122   :  { %v329_v35 = vadd.f32 %v328_v34, %v154_v33 }
 0x123   :  { %v2633_v36 = vpop.f32.mrf.mxu0 }
 0x124   :  { %v2635_v37 = vpack.c.bf16 %v329_v35, %v329_v35  ;;  %v331_v20 = vadd.f32 %v2633_v36, %v158_v19 }
 0x125   :  { %v332_v38 = vpop.f32.mrf.mxu0 }
 0x126   :  { %v333_v39 = vadd.f32 %v332_v38, %v154_v33  ;;  %381 = vrot.lane.b32.xlu0 %v2635_v37, %s2507_s19  ;;  %v2685_v23 = vpack.c.bf16 %v331_v20, %v331_v20 }
 0x127   :  { %v371_v43 = vpop.f32.mrf.mxu1  ;;  %v334_v52 = vpop.f32.mrf.mxu0 }
 0x128   :  { %v2639_v40 = vpack.c.bf16 %v333_v39, %v333_v39  ;;  %v2648_v44 = vadd.f32 %v371_v43, %v2645_v42  ;;  %v335_v24 = vadd.f32 %v334_v52, %v158_v19  ;;  %v616_v29 = vsel %vm383_vm1, %v2685_v23, 0 }
 0x129   :  { %v2104_v45 = vpop.f32.mrf.mxu1 }
 0x12a   :  { %431 = vrot.lane.b32.xlu0 %v2639_v40, %s2507_s19  ;;  %v2687_v28 = vpack.c.bf16 %v335_v24, %v335_v24  ;;  %v2284_v24 = vld [vmem:[#allocation7] sm:$0xff]  }
 0x12b   :  { %v2650_v46 = vpop.f32.mrf.mxu1 }
 0x12c   :  { %v664_v34 = vsel %vm383_vm1, %v2687_v28, 0 }
 0x12d   :  { %v2105_v47 = vpop.f32.mrf.mxu1 }
 0x198   :  { %v382_v48 = vpop.permute.xlu0 %381 }
 0x199   :  { %v388_v49 = vsel %vm383_vm1, %v382_v48, 0 }
 0x19a   :  { %2107 = vmatpush3.bf16.xpose.msra.mxu0 %v388_v49 }
 0x19b   :  { %2118 = vmatprep.subr.bf16.mxu0 %v2505_v21 }
 0x19c   :  { %v432_v50 = vpop.permute.xlu0 %431 }
 0x19d   :  { %v437_v51 = vsel %vm383_vm1, %v432_v50, 0 }
 0x19e   :  { %2113 = vmatpush3.bf16.xpose.msra.mxu1 %v437_v51 }
 0x19f   :  { %2124 = vmatprep.subr.bf16.mxu1 %v2505_v21 }
 0x1a1   :  { %2109 = vmatmul.mubr.msk.bf16.vlgmr.msra.gmra.mxu0 %vm383_vm1, %v2635_v37 }
 0x1a2   :  { %2120 = vmatprep.mubr.msk.bf16.mxu0 %vm2506_vm0, %v2505_v21 }
 0x1a5   :  { %2115 = vmatmul.mubr.msk.bf16.vlgmr.msra.gmra.mxu1 %vm383_vm1, %v2639_v40 }
 0x1a6   :  { %2126 = vmatprep.mubr.msk.bf16.mxu1 %vm2506_vm0, %v2505_v21 }
 0x261   :  { %v424_v53 = vpop.f32.mrf.mxu0 }
 0x262   :  { %v479_v54 = vmul.f32 0.17677669, %v424_v53 }
 0x263   :  { %v2110_v55 = vpop.f32.mrf.mxu0 }
 0x264   :  { %v482_v56 = vsel %vm481_vm2, %v479_v54, -inf }
 0x265   :  { %483 = vmax.xlane.f32.xlu1 %v482_v56  ;;  %v427_v57 = vpop.f32.mrf.mxu0  ;;  %v473_v58 = vpop.f32.mrf.mxu1 }
 0x266   :  { %v480_v59 = vmul.f32 0.17677669, %v473_v58 }
 0x267   :  { %v2111_v60 = vpop.f32.mrf.mxu0  ;;  %v2116_v61 = vpop.f32.mrf.mxu1 }
 0x268   :  { %v485_v62 = vsel %vm481_vm2, %v480_v59, -inf }
 0x269   :  { %486 = vmax.xlane.f32.xlu1 %v485_v62  ;;  %v476_v63 = vpop.f32.mrf.mxu1 }
 0x26b   :  { %v2117_v1 = vpop.f32.mrf.mxu1 }
 0x27a   :  { %506 = vrot.lane.b32.xlu1 %v2635_v37, %s2501_s5 }
 0x27e   :  { %555 = vrot.lane.b32.xlu1 %v2639_v40, %s2501_s5 }
 0x2ee   :  { %v484_v2 = vpop.xlane.xlu1 %483 }
 0x2ef   :  { %v488_v3 = vsub.f32 %v479_v54, %v484_v2 }
 0x2f1   :  { %v490_v4 = vmul.f32 1.442695, %v488_v3 }
 0x2f2   :  { %v487_v5 = vpop.xlane.xlu1 %486 }
 0x2f3   :  { %2331 = vpow2.f32 %v490_v4  ;;  %v489_v6 = vsub.f32 %v480_v59, %v487_v5 }
 0x2f5   :  { %v492_v7 = vmul.f32 1.442695, %v489_v6 }
 0x2f6   :  { %v507_v8 = vpop.permute.xlu1 %506 }
 0x2f7   :  { %2333 = vpow2.f32 %v492_v7  ;;  %v513_v9 = vsel %vm511_vm3, %v507_v8, 0 }
 0x2f8   :  { %2119 = vmatpush3.bf16.msra.mxu0 %v513_v9 }
 0x2f9   :  { %2130 = vmatprep.subr.bf16.mxu0 %v2505_v21 }
 0x2fa   :  { %v556_v10 = vpop.permute.xlu1 %555 }
 0x2fb   :  { %v561_v11 = vsel %vm511_vm3, %v556_v10, 0 }
 0x2fc   :  { %2125 = vmatpush3.bf16.msra.mxu1 %v561_v11 }
 0x2fd   :  { %2136 = vmatprep.subr.bf16.mxu1 %v2505_v21 }
 0x300   :  { %v2332_v12 = vpop.eup %2331 }
 0x301   :  { %v494_v13 = vsel %vm481_vm2, %v2332_v12, 0.0 }
 0x302   :  { %495 = vadd.xlane.f32.xlu0 %v494_v13 }
 0x304   :  { %v2334_v14 = vpop.eup %2333 }
 0x305   :  { %v497_v15 = vsel %vm481_vm2, %v2334_v14, 0.0 }
 0x306   :  { %498 = vadd.xlane.f32.xlu1 %v497_v15 }
 0x317   :  { %610 = vrot.lane.b32.xlu1 %v2635_v37, %s2508_s2 }
 0x31b   :  { %658 = vrot.lane.b32.xlu1 %v2639_v40, %s2508_s2 }
 0x38b   :  { %v496_v16 = vpop.xlane.xlu0 %495 }
 0x38c   :  { %2335 = vrcp.f32 %v496_v16  ;;  %v2285_v16 = vld [vmem:[#allocation7 + $0x18] sm:$0xff]  }
 0x38f   :  { %v499_v18 = vpop.xlane.xlu1 %498 }
 0x390   :  { %2337 = vrcp.f32 %v499_v18 }
 0x393   :  { %v611_v35 = vpop.permute.xlu1 %610 }
 0x397   :  { %v659_v36 = vpop.permute.xlu1 %658 }
 0x399   :  { %v2336_v22 = vpop.eup %2335 }
 0x39a   :  { %v502_v25 = vmul.f32 %v2336_v22, %v2332_v12  ;;  %v2283_v22 = vld [vmem:[#allocation7 + $0x8] sm:$0xff]  }
 0x39c   :  { %v504_v26 = vpack.c.bf16 %v502_v25, %v502_v25 }
 0x39d   :  { %v2338_v27 = vpop.eup %2337 }
 0x39e   :  { %2121 = vmatmul.mubr.msk.bf16.vlgmr.msra.gmra.mxu0 %vm481_vm2, %v504_v26  ;;  %v503_v33 = vmul.f32 %v2338_v27, %v2334_v14  ;;  %v375_v27 = vadd.f32 %v2650_v46, %v2645_v42  ;;  %v2286_v46 = vld [vmem:[#allocation7 + $0x10] sm:$0xff]  }
 0x39f   :  { %2131 = vmatpush3.bf16.xpose.msra.mxu0 %v616_v29  ;;  %2132 = vmatprep.mubr.msk.bf16.mxu0 %vm2506_vm0, %v2505_v21 }
 0x3a0   :  { %v505_v32 = vpack.c.bf16 %v503_v33, %v503_v33  ;;  %2142 = vmatprep.subr.bf16.mxu0 %v2505_v21  ;;  %v2752_v33 = vpack.c.bf16 %v375_v27, %v375_v27 }
 0x3a2   :  { %2127 = vmatmul.mubr.msk.bf16.vlgmr.msra.gmra.mxu1 %vm481_vm2, %v505_v32  ;;  %v1125_v42 = vsel %vm511_vm3, %v2752_v33, 0 }
 0x3a3   :  { %2137 = vmatpush3.bf16.xpose.msra.mxu1 %v664_v34  ;;  %2138 = vmatprep.mubr.msk.bf16.mxu1 %vm2506_vm0, %v2505_v21 }
 0x3a4   :  { %2148 = vmatprep.subr.bf16.mxu1 %v2505_v21 }
 0x3a6   :  { %2133 = vmatmul.mubr.msk.bf16.vlgmr.msra.gmra.mxu0 %vm383_vm1, %v611_v35 }
 0x3a7   :  { %2144 = vmatprep.mubr.msk.bf16.mxu0 %vm2506_vm0, %v2505_v21 }
 0x3aa   :  { %2139 = vmatmul.mubr.msk.bf16.vlgmr.msra.gmra.mxu1 %vm383_vm1, %v659_v36 }
 0x3ab   :  { %2150 = vmatprep.mubr.msk.bf16.mxu1 %vm2506_vm0, %v2505_v21 }
 0x45e   :  { %v2707_v37 = vpop.f32.mrf.mxu0 }
 0x460   :  { %v2122_v38 = vpop.f32.mrf.mxu0 }
 0x462   :  { %v552_v39 = vpop.f32.mrf.mxu0  ;;  %v2709_v40 = vpop.f32.mrf.mxu1 }
 0x463   :  { %v603_v41 = vpack.c.bf16 %v2709_v40, %v2707_v37 }
 0x464   :  { %v2123_v43 = vpop.f32.mrf.mxu0  ;;  %v2128_v45 = vpop.f32.mrf.mxu1 }
 0x466   :  { %v600_v47 = vpop.f32.mrf.mxu1  ;;  %v652_v48 = vpop.f32.mrf.mxu0 }
 0x467   :  { %v706_v49 = vmul.f32 0.17677669, %v652_v48  ;;  %v2768_v47 = vpack.c.bf16 %v2648_v44, %v2648_v44 }
 0x468   :  { %v2129_v50 = vpop.f32.mrf.mxu1  ;;  %v2134_v51 = vpop.f32.mrf.mxu0 }
 0x469   :  { %v708_v52 = vsel %vm481_vm2, %v706_v49, -inf  ;;  %v1079_v50 = vsel %vm511_vm3, %v2768_v47, 0 }
 0x46a   :  { %v700_v53 = vpop.f32.mrf.mxu1  ;;  %709 = vmax.xlane.f32.xlu0 %v708_v52  ;;  %v655_v54 = vpop.f32.mrf.mxu0 }
 0x46b   :  { %v707_v55 = vmul.f32 0.17677669, %v700_v53 }
 0x46c   :  { %v2135_v56 = vpop.f32.mrf.mxu0  ;;  %v2140_v57 = vpop.f32.mrf.mxu1 }
 0x46d   :  { %v711_v58 = vsel %vm481_vm2, %v707_v55, -inf }
 0x46e   :  { %712 = vmax.xlane.f32.xlu1 %v711_v58  ;;  %v703_v59 = vpop.f32.mrf.mxu1 }
 0x470   :  { %v2141_v60 = vpop.f32.mrf.mxu1 }
 0x47f   :  { %1001 = vrot.lane.b32.xlu1 %v2687_v28, %s2508_s2 }
 0x480   :  { %733 = vrot.lane.b32.xlu0 %v2685_v23, %s2507_s19 }
 0x4f3   :  { %v710_v61 = vpop.xlane.xlu0 %709 }
 0x4f4   :  { %v714_v62 = vsub.f32 %v706_v49, %v710_v61 }
 0x4f6   :  { %v716_v63 = vmul.f32 1.442695, %v714_v62 }
 0x4f7   :  { %v713_v1 = vpop.xlane.xlu1 %712  ;;  %v734_v2 = vpop.permute.xlu0 %733 }
 0x4f8   :  { %2339 = vpow2.f32 %v716_v63  ;;  %v715_v3 = vsub.f32 %v707_v55, %v713_v1  ;;  %v739_v4 = vsel %vm511_vm3, %v734_v2, 0 }
 0x4f9   :  { %2143 = vmatpush3.bf16.msra.mxu0 %v739_v4 }
 0x4fa   :  { %v718_v5 = vmul.f32 1.442695, %v715_v3  ;;  %2154 = vmatprep.subr.bf16.mxu0 %v2505_v21 }
 0x4fb   :  { %v1002_v26 = vpop.permute.xlu1 %1001 }
 0x4fc   :  { %2341 = vpow2.f32 %v718_v5 }
 0x505   :  { %v2340_v6 = vpop.eup %2339 }
 0x506   :  { %v720_v7 = vsel %vm481_vm2, %v2340_v6, 0.0 }
 0x507   :  { %721 = vadd.xlane.f32.xlu0 %v720_v7 }
 0x509   :  { %v2342_v8 = vpop.eup %2341 }
 0x50a   :  { %v723_v9 = vsel %vm481_vm2, %v2342_v8, 0.0 }
 0x50b   :  { %724 = vadd.xlane.f32.xlu0 %v723_v9 }
 0x521   :  { %782 = vrot.lane.b32.xlu0 %v2687_v28, %s2507_s19 }
 0x525   :  { %951 = vrot.lane.b32.xlu0 %v2685_v23, %s2508_s2 }
 0x529   :  { %949 = vrot.lane.b32.xlu0 %v2685_v23, %s2501_s5 }
 0x52d   :  { %999 = vrot.lane.b32.xlu0 %v2687_v28, %s2501_s5  ;;  %v1007_v28 = vsel %vm383_vm1, %v1002_v26, 0 }
 0x590   :  { %v722_v10 = vpop.xlane.xlu0 %721 }
 0x591   :  { %2343 = vrcp.f32 %v722_v10 }
 0x594   :  { %v725_v11 = vpop.xlane.xlu0 %724 }
 0x595   :  { %2345 = vrcp.f32 %v725_v11 }
 0x598   :  { %v783_v12 = vpop.permute.xlu0 %782 }
 0x599   :  { %v788_v13 = vsel %vm511_vm3, %v783_v12, 0 }
 0x59a   :  { %2149 = vmatpush3.bf16.msra.mxu1 %v788_v13 }
 0x59b   :  { %2162 = vmatprep.subr.bf16.mxu1 %v2505_v21 }
 0x59c   :  { %v952_v25 = vpop.permute.xlu0 %951 }
 0x59e   :  { %v2344_v14 = vpop.eup %2343 }
 0x59f   :  { %v728_v15 = vmul.f32 %v2344_v14, %v2340_v6 }
 0x5a0   :  { %v950_v29 = vpop.permute.xlu0 %949 }
 0x5a1   :  { %v730_v18 = vpack.c.bf16 %v728_v15, %v728_v15 }
 0x5a2   :  { %v2346_v19 = vpop.eup %2345 }
 0x5a3   :  { %2145 = vmatmul.mubr.msk.bf16.vlgmr.msra.gmra.mxu0 %vm481_vm2, %v730_v18  ;;  %v729_v20 = vmul.f32 %v2346_v19, %v2342_v8 }
 0x5a4   :  { %2155 = vmatpush3.bf16.msra.mxu0 %v2285_v16  ;;  %2158 = vmatprep.mubr.msk.bf16.mxu0 %vm2506_vm0, %v2505_v21  ;;  %v1000_v32 = vpop.permute.xlu0 %999 }
 0x5a5   :  { %v731_v23 = vpack.c.bf16 %v729_v20, %v729_v20  ;;  %2156 = vmatprep.subr.bf16.mxu0 %v2505_v21  ;;  %v2287_v20 = vld [vmem:[#allocation7 + $0x28] sm:$0xff]  }
 0x5a7   :  { %2151 = vmatmul.mubr.msk.bf16.vlgmr.msra.gmra.mxu1 %vm481_vm2, %v731_v23 }
 0x5a8   :  { %2163 = vmatpush3.bf16.msra.mxu1 %v2283_v22  ;;  %2166 = vmatprep.mubr.msk.bf16.mxu1 %vm2506_vm0, %v2505_v21 }
 0x5a9   :  { %2164 = vmatprep.subr.bf16.mxu1 %v2505_v21  ;;  %2157 = vmatpush3.bf16.msra.mxu0 %v2286_v46 }
 0x5aa   :  { %2170 = vmatprep.subr.bf16.mxu0 %v2505_v21 }
 0x5ac   :  { %2165 = vmatpush3.bf16.msra.mxu1 %v2284_v24 }
 0x5ad   :  { %2176 = vmatprep.subr.bf16.mxu1 %v2505_v21 }
 0x5af   :  { %2167 = vmatmul.mubr.msk.bf16.vlgmr.msra.gmra.mxu1 %vm383_vm1, %v603_v41  ;;  %v957_v41 = vsel %vm383_vm1, %v952_v25, 0 }
 0x5b0   :  { %2177 = vmatpush3.bf16.xpose.msra.mxu1 %v1007_v28  ;;  %2178 = vmatprep.mubr.msk.bf16.mxu1 %vm2506_vm0, %v2505_v21 }
 0x5b1   :  { %2188 = vmatprep.subr.bf16.mxu1 %v2505_v21 }
 0x5b7   :  { %2179 = vmatmul.mubr.msk.bf16.vlgmr.msra.gmra.mxu1 %vm383_vm1, %v1000_v32  ;;  %v2288_v32 = vld [vmem:[#allocation7 + $0x20] sm:$0xff]  }
 0x5b8   :  { %2189 = vmatpush3.bf16.msra.mxu1 %v1125_v42  ;;  %2190 = vmatprep.mubr.msk.bf16.mxu1 %vm2506_vm0, %v2505_v21 }
 0x5b9   :  { %2202 = vmatprep.subr.bf16.mxu1 %v2505_v21 }
 0x663   :  { %v775_v34 = vpop.f32.mrf.mxu0 }
 0x665   :  { %v2146_v35 = vpop.f32.mrf.mxu0 }
 0x667   :  { %v778_v36 = vpop.f32.mrf.mxu0  ;;  %v824_v37 = vpop.f32.mrf.mxu1 }
 0x668   :  { %v830_v38 = vpack.c.bf16 %v824_v37, %v775_v34 }
 0x669   :  { %v2147_v39 = vpop.f32.mrf.mxu0  ;;  %v2152_v40 = vpop.f32.mrf.mxu1 }
 0x66a   :  { %2159 = vmatmul.mubr.msk.bf16.vlgmr.msra.gmra.mxu0 %vm383_vm1, %v830_v38 }
 0x66b   :  { %2171 = vmatpush3.bf16.xpose.msra.mxu0 %v957_v41  ;;  %v827_v43 = vpop.f32.mrf.mxu1  ;;  %2172 = vmatprep.mubr.msk.bf16.mxu0 %vm2506_vm0, %v2505_v21 }
 0x66c   :  { %2182 = vmatprep.subr.bf16.mxu0 %v2505_v21 }
 0x66d   :  { %v2153_v45 = vpop.f32.mrf.mxu1 }
 0x66f   :  { %v2770_v48 = vpop.f32.mrf.mxu1 }
 0x671   :  { %v2168_v49 = vpop.f32.mrf.mxu1 }
 0x672   :  { %2173 = vmatmul.mubr.msk.bf16.vlgmr.msra.gmra.mxu0 %vm383_vm1, %v950_v29 }
 0x673   :  { %2183 = vmatpush3.bf16.msra.mxu0 %v1079_v50  ;;  %v2775_v51 = vpop.f32.mrf.mxu1  ;;  %2184 = vmatprep.mubr.msk.bf16.mxu0 %vm2506_vm0, %v2505_v21 }
 0x674   :  { %2194 = vmatprep.subr.bf16.mxu0 %v2505_v21 }
 0x675   :  { %v2169_v52 = vpop.f32.mrf.mxu1 }
 0x677   :  { %v1043_v53 = vpop.f32.mrf.mxu1 }
 0x678   :  { %v1050_v44 = vmul.f32 0.17677669, %v1043_v53 }
 0x679   :  { %v2180_v54 = vpop.f32.mrf.mxu1 }
 0x67a   :  { %v1054_v55 = vsel %vm481_vm2, %v1050_v44, -inf }
 0x67b   :  { %1055 = vmax.xlane.f32.xlu1 %v1054_v55  ;;  %v1046_v56 = vpop.f32.mrf.mxu1 }
 0x67d   :  { %v2181_v57 = vpop.f32.mrf.mxu1 }
 0x68c   :  { %1284 = vrot.lane.b32.xlu1 %v2752_v33, %s2501_s5 }
 0x690   :  { %1231 = vrot.lane.b32.xlu1 %v2768_v47, %s2507_s19 }
 0x704   :  { %v1056_v5 = vpop.xlane.xlu1 %1055 }
 0x705   :  { %v1058_v6 = vsub.f32 %v1050_v44, %v1056_v5 }
 0x707   :  { %v1061_v9 = vmul.f32 1.442695, %v1058_v6 }
 0x708   :  { %v1285_v28 = vpop.permute.xlu1 %1284 }
 0x709   :  { %v1290_v39 = vsel %vm383_vm1, %v1285_v28, 0 }
 0x70c   :  { %v1232_v29 = vpop.permute.xlu1 %1231 }
 0x72a   :  { %v2785_v58 = vpop.f32.mrf.mxu0 }
 0x72b   :  { %v941_v57 = vadd.f32 %v2770_v48, %v2785_v58 }
 0x72c   :  { %v2160_v59 = vpop.f32.mrf.mxu0 }
 0x72e   :  { %v2787_v60 = vpop.f32.mrf.mxu0 }
 0x730   :  { %v2161_v61 = vpop.f32.mrf.mxu0 }
 0x732   :  { %v993_v62 = vpop.f32.mrf.mxu0 }
 0x733   :  { %v1049_v63 = vmul.f32 0.17677669, %v993_v62 }
 0x734   :  { %v2174_v1 = vpop.f32.mrf.mxu0 }
 0x735   :  { %v1051_v2 = vsel %vm481_vm2, %v1049_v63, -inf }
 0x736   :  { %1052 = vmax.xlane.f32.xlu0 %v1051_v2  ;;  %v996_v3 = vpop.f32.mrf.mxu0 }
 0x738   :  { %v2175_v4 = vpop.f32.mrf.mxu0 }
 0x7bf   :  { %v1053_v7 = vpop.xlane.xlu0 %1052 }
 0x7c0   :  { %v1057_v8 = vsub.f32 %v1049_v63, %v1053_v7  ;;  %v944_v63 = vadd.f32 %v2775_v51, %v2787_v60 }
 0x7c2   :  { %v1059_v10 = vmul.f32 1.442695, %v1057_v8 }
 0x7c4   :  { %2347 = vpow2.f32 %v1059_v10 }
 0x7c5   :  { %2349 = vpow2.f32 %v1061_v9 }
 0x7d1   :  { %v2348_v11 = vpop.eup %2347 }
 0x7d2   :  { %v1063_v12 = vsel %vm481_vm2, %v2348_v11, 0.0  ;;  %v2350_v13 = vpop.eup %2349 }
 0x7d3   :  { %1064 = vadd.xlane.f32.xlu0 %v1063_v12  ;;  %v1066_v14 = vsel %vm481_vm2, %v2350_v13, 0.0 }
 0x7d7   :  { %1067 = vadd.xlane.f32.xlu0 %v1066_v14 }
 0x7ed   :  { %1233 = vrot.lane.b32.xlu0 %v2768_v47, %s2501_s5 }
 0x7f1   :  { %1282 = vrot.lane.b32.xlu0 %v2752_v33, %s2507_s19 }
 0x85c   :  { %v1065_v15 = vpop.xlane.xlu0 %1064 }
 0x85d   :  { %2351 = vrcp.f32 %v1065_v15 }
 0x860   :  { %v1068_v16 = vpop.xlane.xlu0 %1067 }
 0x861   :  { %2353 = vrcp.f32 %v1068_v16 }
 0x864   :  { %v1234_v25 = vpop.permute.xlu0 %1233 }
 0x865   :  { %v1239_v27 = vsel %vm383_vm1, %v1234_v25, 0 }
 0x868   :  { %v1283_v49 = vpop.permute.xlu0 %1282 }
 0x86a   :  { %v2352_v18 = vpop.eup %2351 }
 0x86b   :  { %v1071_v19 = vmul.f32 %v2352_v18, %v2348_v11 }
 0x86d   :  { %v1073_v22 = vpack.c.bf16 %v1071_v19, %v1071_v19 }
 0x86e   :  { %v2354_v23 = vpop.eup %2353 }
 0x86f   :  { %2185 = vmatmul.mubr.msk.bf16.vlgmr.msra.gmra.mxu0 %vm481_vm2, %v1073_v22  ;;  %v1072_v24 = vmul.f32 %v2354_v23, %v2350_v13 }
 0x870   :  { %2195 = vmatpush3.bf16.msra.mxu0 %v2287_v20  ;;  %2198 = vmatprep.mubr.msk.bf16.mxu0 %vm2506_vm0, %v2505_v21 }
 0x871   :  { %v1074_v26 = vpack.c.bf16 %v1072_v24, %v1072_v24  ;;  %2196 = vmatprep.subr.bf16.mxu0 %v2505_v21 }
 0x873   :  { %2191 = vmatmul.mubr.msk.bf16.vlgmr.msra.gmra.mxu1 %vm481_vm2, %v1074_v26 }
 0x874   :  { %2203 = vmatpush3.bf16.xpose.msra.mxu1 %v1239_v27  ;;  %2204 = vmatprep.mubr.msk.bf16.mxu1 %vm2506_vm0, %v2505_v21 }
 0x875   :  { %2214 = vmatprep.subr.bf16.mxu1 %v2505_v21  ;;  %2197 = vmatpush3.bf16.msra.mxu0 %v2288_v32  ;;  %v2290_v32 = vld [vmem:[#allocation7 + $0x30] sm:$0xff]  }
 0x876   :  { %2208 = vmatprep.subr.bf16.mxu0 %v2505_v21 }
 0x87b   :  { %2205 = vmatmul.mubr.msk.bf16.vlgmr.msra.gmra.mxu1 %vm383_vm1, %v1232_v29 }
 0x87c   :  { %2216 = vmatprep.mubr.msk.bf16.mxu1 %vm2506_vm0, %v2505_v21 }
 0x92f   :  { %v1115_v42 = vpop.f32.mrf.mxu0 }
 0x931   :  { %v2186_v46 = vpop.f32.mrf.mxu0 }
 0x932   :  { %v2296_v46 = vld [vmem:[#allocation8 + $0x64] ss:$8 sps:$4 sm:$0xff]  }
 0x933   :  { %v1118_v34 = vpop.f32.mrf.mxu0  ;;  %v1161_v35 = vpop.f32.mrf.mxu1 }
 0x934   :  { %v1167_v36 = vpack.c.bf16 %v1161_v35, %v1115_v42  ;;  %v2293_v42 = vld [vmem:[#allocation8 + $0x74] ss:$8 sps:$4 sm:$0xff]   ;;  %v2294_v34 = vld [vmem:[#allocation8 + $0x60] ss:$8 sps:$4 sm:$0xff]  }
 0x935   :  { %v2187_v37 = vpop.f32.mrf.mxu0  ;;  %v2192_v38 = vpop.f32.mrf.mxu1  ;;  %v2299_v35 = vld [vmem:[#allocation8 + $0x54] ss:$8 sps:$4 sm:$0xff]  }
 0x936   :  { %2199 = vmatmul.mubr.msk.bf16.vlgmr.msra.gmra.mxu0 %vm383_vm1, %v1167_v36  ;;  %v2297_v36 = vld [vmem:[#allocation8 + $0x50] ss:$8 sps:$4 sm:$0xff]   ;;  %v2302_v37 = vld [vmem:[#allocation8 + $0x44] ss:$8 sps:$4 sm:$0xff]  }
 0x937   :  { %2209 = vmatpush3.bf16.xpose.msra.mxu0 %v1290_v39  ;;  %v1164_v40 = vpop.f32.mrf.mxu1  ;;  %2210 = vmatprep.mubr.msk.bf16.mxu0 %vm2506_vm0, %v2505_v21 }
 0x938   :  { %2220 = vmatprep.subr.bf16.mxu0 %v2505_v21 }
 0x939   :  { %v2193_v41 = vpop.f32.mrf.mxu1 }
 0x93b   :  { %v1275_v43 = vpop.f32.mrf.mxu1 }
 0x93c   :  { %v1332_v45 = vmul.f32 0.17677669, %v1275_v43 }
 0x93d   :  { %v2206_v50 = vpop.f32.mrf.mxu1 }
 0x93e   :  { %2211 = vmatmul.mubr.msk.bf16.vlgmr.msra.gmra.mxu0 %vm383_vm1, %v1283_v49  ;;  %v1334_v52 = vsel %vm481_vm2, %v1332_v45, -inf  ;;  %v2303_v49 = vld [vmem:[#allocation8 + $0x30] ss:$8 sps:$4 sm:$0xff]   ;;  %v2308_v50 = vld [vmem:[#allocation8 + $0x24] ss:$8 sps:$4 sm:$0xff]  }
 0x93f   :  { %1335 = vmax.xlane.f32.xlu1 %v1334_v52  ;;  %v1278_v53 = vpop.f32.mrf.mxu1  ;;  %2222 = vmatprep.mubr.msk.bf16.mxu0 %vm2506_vm0, %v2505_v21  ;;  %v2306_v52 = vld [vmem:[#allocation8 + $0x20] ss:$8 sps:$4 sm:$0xff]  }
 0x940   :  { %v2311_v53 = vld [vmem:[#allocation8 + $0x14] ss:$8 sps:$4 sm:$0xff]  }
 0x941   :  { %v2207_v44 = vpop.f32.mrf.mxu1 }
 0x942   :  { %v2309_v44 = vld [vmem:[#allocation8 + $0x10] ss:$8 sps:$4 sm:$0xff]  }
 0x9c8   :  { %v1336_v54 = vpop.xlane.xlu1 %1335 }
 0x9c9   :  { %v1340_v55 = vsub.f32 %v1332_v45, %v1336_v54  ;;  %v2305_v45 = vld [vmem:[#allocation8 + $0x34] ss:$8 sps:$4 sm:$0xff]   ;;  %v2314_v54 = vld [vmem:[#allocation8 + $0x4] ss:$8 sps:$4 sm:$0xff]  }
 0x9cb   :  { %v1342_v56 = vmul.f32 1.442695, %v1340_v55  ;;  %v2312_v55 = vld [vmem:[#allocation8] ss:$8 sps:$4 sm:$0xff]  }
 0x9cd   :  { %2355 = vpow2.f32 %v1342_v56  ;;  %v2315_v56 = vld [vmem:[#allocation10 + $0x78] sm:$0xff]  }
 0x9da   :  { %v2356_v8 = vpop.eup %2355 }
 0x9db   :  { %v1346_v9 = vsel %vm481_vm2, %v2356_v8, 0.0 }
 0x9f6   :  { %v1221_v59 = vpop.f32.mrf.mxu0 }
 0x9f7   :  { %v2820_v61 = vadd.f32 %v1221_v59, %v941_v57  ;;  %v2316_v57 = vld [vmem:[#allocation10 + $0x38] sm:$0xff]   ;;  %v2317_v59 = vld [vmem:[#allocation10 + $0x70] sm:$0xff]  }
 0x9f8   :  { %v2200_v62 = vpop.f32.mrf.mxu0 }
 0x9f9   :  { %v2318_v62 = vld [vmem:[#allocation10 + $0x30] sm:$0xff]  }
 0x9fa   :  { %v1224_v1 = vpop.f32.mrf.mxu0 }
 0x9fb   :  { %v2824_v2 = vadd.f32 %v1224_v1, %v944_v63  ;;  %v2319_v63 = vld [vmem:[#allocation10 + $0x68] sm:$0xff]  }
 0x9fc   :  { %v2201_v3 = vpop.f32.mrf.mxu0  ;;  %v2320_v1 = vld [vmem:[#allocation10 + $0x28] sm:$0xff]  }
 0x9fd   :  { %v2321_v3 = vld [vmem:[#allocation10 + $0x60] sm:$0xff]  }
 0x9fe   :  { %v1326_v4 = vpop.f32.mrf.mxu0 }
 0x9ff   :  { %v1333_v5 = vmul.f32 0.17677669, %v1326_v4  ;;  %v2322_v4 = vld [vmem:[#allocation10 + $0x20] sm:$0xff]  }
 0xa00   :  { %v2212_v6 = vpop.f32.mrf.mxu0 }
 0xa01   :  { %v1337_v7 = vsel %vm481_vm2, %v1333_v5, -inf  ;;  %v2324_v6 = vld [vmem:[#allocation10 + $0x18] sm:$0xff]  }
 0xa02   :  { %1338 = vmax.xlane.f32.xlu0 %v1337_v7  ;;  %v1329_v48 = vpop.f32.mrf.mxu0 }
 0xa04   :  { %v2213_v58 = vpop.f32.mrf.mxu0 }
 0xa06   :  { %1347 = vadd.xlane.f32.xlu0 %v1346_v9 }
 0xa1c   :  { %1358 = vrot.lane.b32.xlu0 %v2768_v47, %s2508_s2  ;;  %v2289_v47 = vld [vmem:[#allocation7 + $0x38] sm:$0xff]  }
 0xa8b   :  { %v1339_v51 = vpop.xlane.xlu0 %1338 }
 0xa8c   :  { %v1341_v60 = vsub.f32 %v1333_v5, %v1339_v51  ;;  %v2323_v5 = vld [vmem:[#allocation10 + $0x58] sm:$0xff]  }
 0xa8e   :  { %v1344_v10 = vmul.f32 1.442695, %v1341_v60  ;;  %v2363_v60 = vld [vmem:[#allocation2] sm:$0xff] }
 0xa8f   :  { %v1348_v11 = vpop.xlane.xlu0 %1347 }
 0xa90   :  { %2357 = vpow2.f32 %v1344_v10 }
 0xa91   :  { %2359 = vrcp.f32 %v1348_v11 }
 0xa93   :  { %v1359_v12 = vpop.permute.xlu0 %1358 }
 0xa94   :  { %v1364_v13 = vsel %vm511_vm3, %v1359_v12, 0  ;;  %v1974_v12 = vld [vmem:[%s2885_s9] ss:$0 sm:$0xff] }
 0xa95   :  { %2215 = vmatpush3.bf16.msra.mxu1 %v1364_v13 }
 0xa96   :  { %2226 = vmatprep.subr.bf16.mxu1 %v2505_v21 }
 0xa9d   :  { %v2358_v14 = vpop.eup %2357 }
 0xa9e   :  { %v2360_v15 = vpop.eup %2359  ;;  %v1349_v16 = vsel %vm481_vm2, %v2358_v14, 0.0 }
 0xa9f   :  { %1350 = vadd.xlane.f32.xlu1 %v1349_v16  ;;  %v1354_v18 = vmul.f32 %v2360_v15, %v2356_v8  ;;  %v1973_v8 = vld [vmem:[%s2880_s4] ss:$0 sm:$0xff]  ;;  %v2364_v16 = vld [vmem:[#allocation2 + $0x8] sm:$0xff] }
 0xaa1   :  { %v1356_v19 = vpack.c.bf16 %v1354_v18, %v1354_v18 }
 0xaa3   :  { %2217 = vmatmul.mubr.msk.bf16.vlgmr.msra.gmra.mxu1 %vm481_vm2, %v1356_v19 }
 0xaa4   :  { %2230 = vmatprep.mubr.msk.bf16.mxu1 %vm2506_vm0, %v2505_v21  ;;  %2227 = vmatpush3.bf16.msra.mxu1 %v2289_v47 }
 0xaa5   :  { %2228 = vmatprep.subr.bf16.mxu1 %v2505_v21  ;;  %v2291_v21 = vld [vmem:[#allocation8 + $0x70] ss:$8 sps:$4 sm:$0xff]  }
 0xaa8   :  { %2229 = vmatpush3.bf16.msra.mxu1 %v2290_v32 }
 0xaa9   :  { %2064 = vmatprep.subr.bf16.mxu1 %v2315_v56 }
 0xab0   :  { %1406 = vrot.lane.b32.xlu1 %v2752_v33, %s2508_s2 }
 0xb28   :  { %v1351_v20 = vpop.xlane.xlu1 %1350 }
 0xb29   :  { %2361 = vrcp.f32 %v1351_v20 }
 0xb2c   :  { %v1407_v22 = vpop.permute.xlu1 %1406 }
 0xb2d   :  { %v1412_v23 = vsel %vm511_vm3, %v1407_v22, 0 }
 0xb2e   :  { %2221 = vmatpush3.bf16.msra.mxu0 %v1412_v23  ;;  %v2325_v23 = vld [vmem:[#allocation10 + $0x50] sm:$0xff]  }
 0xb2f   :  { %1655 = vmatprep.subr.bf16.mxu0 %v2293_v42 }
 0xb36   :  { %v2362_v24 = vpop.eup %2361 }
 0xb37   :  { %v1355_v25 = vmul.f32 %v2362_v24, %v2358_v14  ;;  %v2327_v24 = vld [vmem:[#allocation10 + $0x48] sm:$0xff]  }
 0xb39   :  { %v1357_v26 = vpack.c.bf16 %v1355_v25, %v1355_v25  ;;  %v2328_v25 = vld [vmem:[#allocation10 + $0x8] sm:$0xff]  }
 0xb3b   :  { %2223 = vmatmul.mubr.msk.bf16.vlgmr.msra.gmra.mxu0 %vm481_vm2, %v1357_v26  ;;  %v2329_v26 = vld [vmem:[#allocation10 + $0x40] sm:$0xff]  }
 0xb3c   :  { %1687 = vmatprep.mubr.bf16.mxu0 %v2504_v0  ;;  %1656 = vmatpush1.bf16.msra.mxu0 %v2291_v21  ;;  %v2300_v0 = vld [vmem:[#allocation8 + $0x40] ss:$8 sps:$4 sm:$0xff]  }
 0xb3d   :  { %1657 = vmatprep.subr.bf16.mxu0 %v2296_v46 }
 0xb40   :  { %1658 = vmatpush1.bf16.msra.mxu0 %v2294_v34 }
 0xb41   :  { %1659 = vmatprep.subr.bf16.mxu0 %v2299_v35 }
 0xb44   :  { %1660 = vmatpush1.bf16.msra.mxu0 %v2297_v36 }
 0xb45   :  { %1661 = vmatprep.subr.bf16.mxu0 %v2302_v37 }
 0xb48   :  { %1662 = vmatpush1.bf16.msra.mxu0 %v2300_v0 }
 0xb49   :  { %1663 = vmatprep.subr.bf16.mxu0 %v2305_v45 }
 0xb4c   :  { %1664 = vmatpush1.bf16.msra.mxu0 %v2303_v49 }
 0xb4d   :  { %1665 = vmatprep.subr.bf16.mxu0 %v2308_v50 }
 0xb50   :  { %1666 = vmatpush1.bf16.msra.mxu0 %v2306_v52  ;;  %v2009_v52 = vld [vmem:[%s2887_s11] ss:$0 sm:$0xff] }
 0xb51   :  { %1667 = vmatprep.subr.bf16.mxu0 %v2311_v53 }
 0xb54   :  { %1668 = vmatpush1.bf16.msra.mxu0 %v2309_v44 }
 0xb55   :  { %1669 = vmatprep.subr.bf16.mxu0 %v2314_v54 }
 0xb58   :  { %1670 = vmatpush1.bf16.msra.mxu0 %v2312_v55  ;;  %v2010_v55 = vld [vmem:[%s2888_s12] ss:$0 sm:$0xff] }
 0xb63   :  { %v1400_v27 = vpop.f32.mrf.mxu1 }
 0xb65   :  { %v2218_v28 = vpop.f32.mrf.mxu1 }
 0xb66   :  { %v1563_v28 = vld [vmem:[%s2882_s6] sm:$0x3] }
 0xb67   :  { %v1403_v33 = vpop.f32.mrf.mxu1  ;;  %v1568_v32 = vrot.slane %v1563_v28, %v153_v31 }
 0xb69   :  { %v2219_v29 = vpop.f32.mrf.mxu1 }
 0xb6a   :  { %v1572_v29 = vrot.slane %v1563_v28, %v157_v17 }
 0xbfb   :  { %v1448_v38 = vpop.f32.mrf.mxu0 }
 0xbfc   :  { %v1454_v39 = vpack.c.bf16 %v1448_v38, %v1400_v27  ;;  %v2330_v27 = vld [vmem:[#allocation10] sm:$0xff]  }
 0xbfd   :  { %v2224_v40 = vpop.f32.mrf.mxu0 }
 0xbfe   :  { %2231 = vmatmul.mubr.msk.bf16.vlgmr.msra.gmra.mxu1 %vm383_vm1, %v1454_v39 }
 0xbff   :  { %v1451_v41 = vpop.f32.mrf.mxu0  ;;  %2065 = vmatpush3.bf16.msra.mxu1 %v2316_v57 }
 0xc00   :  { %2066 = vmatprep.subr.bf16.mxu1 %v2317_v59 }
 0xc01   :  { %v2225_v43 = vpop.f32.mrf.mxu0 }
 0xc03   :  { %2067 = vmatpush3.bf16.msra.mxu1 %v2318_v62 }
 0xc04   :  { %2068 = vmatprep.subr.bf16.mxu1 %v2319_v63 }
 0xc07   :  { %2069 = vmatpush3.bf16.msra.mxu1 %v2320_v1 }
 0xc08   :  { %2070 = vmatprep.subr.bf16.mxu1 %v2321_v3 }
 0xc0b   :  { %2071 = vmatpush3.bf16.msra.mxu1 %v2322_v4 }
 0xc0c   :  { %2072 = vmatprep.subr.bf16.mxu1 %v2323_v5 }
 0xc0f   :  { %2073 = vmatpush3.bf16.msra.mxu1 %v2324_v6 }
 0xc10   :  { %2074 = vmatprep.subr.bf16.mxu1 %v2325_v23 }
 0xcbe   :  { %v1508_v7 = vpop.f32.mrf.mxu1 }
 0xcbf   :  { %v1515_v48 = vadd.f32 %v1508_v7, %v2820_v61  ;;  %v1975_v61 = vld [vmem:[%s2886_s10] ss:$0 sm:$0xff] }
 0xcc0   :  { %v2232_v58 = vpop.f32.mrf.mxu1 }
 0xcc1   :  { %v1524_v9 = vadd.f32 %v1973_v8, %v1515_v48 }
 0xcc2   :  { %v1511_v51 = vpop.f32.mrf.mxu1 }
 0xcc3   :  { %v1526_v10 = vadd.f32 %v2363_v60, %v1524_v9  ;;  %v1516_v11 = vadd.f32 %v1511_v51, %v2824_v2  ;;  %v2326_v2 = vld [vmem:[#allocation10 + $0x10] sm:$0xff]  }
 0xcc4   :  { %v2233_v13 = vpop.f32.mrf.mxu1  ;;  %2075 = vmatpush3.bf16.msra.mxu1 %v2326_v2 }
 0xcc5   :  { %v1525_v14 = vadd.f32 %v1973_v8, %v1516_v11  ;;  %v1535_v15 = vmul.f32 %v1974_v12, %v1526_v10  ;;  %2076 = vmatprep.subr.bf16.mxu1 %v2327_v24 }
 0xcc7   :  { %v1527_v18 = vadd.f32 %v2364_v16, %v1525_v14  ;;  %v1544_v47 = vadd.f32 %v1975_v61, %v1535_v15 }
 0xcc8   :  { %2077 = vmatpush3.bf16.msra.mxu1 %v2328_v25 }
 0xcc9   :  { %v1536_v19 = vmul.f32 %v1974_v12, %v1527_v18  ;;  %2078 = vmatprep.subr.bf16.mxu1 %v2329_v26 }
 0xccb   :  { %v1545_v20 = vadd.f32 %v1975_v61, %v1536_v19 }
 0xccc   :  { %2079 = vmatpush3.bf16.msra.mxu1 %v2330_v27 }
 0xccd   :  { %v1546_v22 = vpack.c.bf16 %v1545_v20, %v1544_v47 }
 0xccf   :  { %1688 = vmatmul.mubr.bf16.vlgmr.msra.gmra.mxu0 %v1546_v22 }
 0xd8f   :  { %v1689_v33 = vpop.f32.mrf.mxu0 }
 0xd90   :  { %v1690_v35 = vadd.f32 %v1689_v33, %v1568_v32 }
 0xd91   :  { %v1691_v21 = vpop.f32.mrf.mxu0 }
 0xd92   :  { %v1692_v46 = vadd.f32 %v1691_v21, %v1572_v29  ;;  %v1698_v40 = vmax.f32 %v1690_v35, 0.0 }
 0xd93   :  { %v1693_v42 = vpop.f32.mrf.mxu0 }
 0xd94   :  { %v1694_v34 = vadd.f32 %v1693_v42, %v1568_v32  ;;  %v1699_v38 = vmax.f32 %v1692_v46, 0.0 }
 0xd95   :  { %v1695_v36 = vpop.f32.mrf.mxu0 }
 0xd96   :  { %v1696_v37 = vadd.f32 %v1695_v36, %v1572_v29  ;;  %v1700_v0 = vmax.f32 %v1694_v34, 0.0 }
 0xd98   :  { %v1701_v39 = vmax.f32 %v1696_v37, 0.0  ;;  %v1702_v43 = vpack.c.bf16 %v1700_v0, %v1698_v40 }
 0xd9a   :  { %v1703_v41 = vpack.c.bf16 %v1701_v39, %v1699_v38 }
 0xd9c   :  { %1871 = vmatprep.mubr.bf16.mxu1 %v1703_v41 }
 0xd9d   :  { %1872 = vmatmul.mubr.bf16.vlgmr.msra.gmra.mxu1 %v1702_v43 }
 0xe5d   :  { %v2080_v45 = vpop.f32.mrf.mxu1 }
 0xe5f   :  { %v2081_v31 = vpop.f32.mrf.mxu1 }
 0xe60   :  { %v2082_v17 = vadd.f32 %v2081_v31, %v2080_v45 }
 0xe61   :  { %v2083_v49 = vpop.f32.mrf.mxu1 }
 0xe62   :  { %v1874_v50 = vadd.f32 %v2082_v17, %v1992_v30 }
 0xe63   :  { %v2084_v53 = vpop.f32.mrf.mxu1 }
 0xe64   :  { %v1880_v44 = vadd.f32 %v1874_v50, %v1544_v47  ;;  %v2085_v54 = vadd.f32 %v2084_v53, %v2083_v49 }
 0xe66   :  { %v1889_v56 = vmul.f32 %v2009_v52, %v1880_v44  ;;  %v1877_v57 = vadd.f32 %v2085_v54, %v1992_v30 }
 0xe68   :  { %v1881_v59 = vadd.f32 %v1877_v57, %v1545_v20  ;;  %v1898_v62 = vadd.f32 %v2010_v55, %v1889_v56 }
 0xe6a   :  { %v1890_v63 = vmul.f32 %v2009_v52, %v1881_v59  ;;  %1900 = vst [vmem:[#allocation11] sm:$0xff] %v1898_v62 }
 0xe6c   :  { %v1899_v1 = vadd.f32 %v2010_v55, %v1890_v63 }
 0xe6e   :  { %1901 = vst [vmem:[#allocation11 + $0x8] sm:$0xff] %v1899_v1 }
 0xe6f   :  { %2476 = shalt.err (!%p2473_p1)
}
 0xe70   :  { %1913 = dma.vmem_to_hbm [thread:$0]  %s1908_s30, 256, %s2889_s13, [#allocation4], %s2498_s20, %s2498_s20, %s2499_s21  }
 0xe71   :  { %2491 = dma.done.wait [#allocation4], 256  }
 0xe72   :  { %2492 = vsyncadd [#allocation4], 4294967040 }
 0xe73   :  { %1917 = vsyncpa [#allocation3], 1 }
 0xe74   :  { %1918 = vsyncpa [#allocation6], 1 }
 0xe75   :  { %1919 = vsyncpa [#allocation9], 1 }
 0xe76   :  { %1920 = vsyncpa [#allocation4], 1 }

// kernel: tpu_custom_call.1
= control target key start
LH: loop header
LB: loop body
LE: loop exit
PB: predicated region body
PF: predicated region fallthrough
CT: control target
= control target key end

     0   :  { %18 = vsyncpa [#allocation3], 0  ;;  %s2876_s0 = inlined_call_operand.hbm [shape: f32[2,8,128], index: 0, kind: input, shape index: {}]   ;;  %s2877_s1 = inlined_call_operand.hbm [shape: bf16[128,384], index: 1, kind: input, shape index: {}]   ;;  %s2878_s2 = inlined_call_operand.vmem [shape: f32[1,384], index: 2, kind: input, shape index: {}]   ;;  %s2879_s3 = inlined_call_operand.hbm [shape: bf16[128,128], index: 3, kind: input, shape index: {}]   ;;  %s2880_s4 = inlined_call_operand.vmem [shape: f32[1,128], index: 4, kind: input, shape index: {}]   ;;  %s2881_s5 = inlined_call_operand.hbm [shape: bf16[128,256], index: 5, kind: input, shape index: {}]   ;;  %s2882_s6 = inlined_call_operand.vmem [shape: f32[1,256], index: 6, kind: input, shape index: {}]   ;;  %s2883_s7 = inlined_call_operand.hbm [shape: bf16[256,128], index: 7, kind: input, shape index: {}]   ;;  %s2884_s8 = inlined_call_operand.vmem [shape: f32[1,128], index: 8, kind: input, shape index: {}]   ;;  %s2885_s9 = inlined_call_operand.vmem [shape: f32[1,128], index: 9, kind: input, shape index: {}]   ;;  %s2886_s10 = inlined_call_operand.vmem [shape: f32[1,128], index: 10, kind: input, shape index: {}]   ;;  %s2887_s11 = inlined_call_operand.vmem [shape: f32[1,128], index: 11, kind: input, shape index: {}]   ;;  %s2888_s12 = inlined_call_operand.vmem [shape: f32[1,128], index: 12, kind: input, shape index: {}]   ;;  %s2889_s13 = inlined_call_operand.hbm [shape: f32[2,8,128], index: 13, kind: output, shape index: {}]  }
   0x1   :  { %19 = vsyncpa [#allocation6], 0 }
   0x2   :  { %20 = vsyncpa [#allocation9], 0 }
   0x3   :  { %21 = vsyncpa [#allocation4], 0  ;;  %s2493_s25 = smov [#allocation5]  }
   0x4   :  { %s39_s26 = sshll.u32 %s2493_s25, 4  ;;  %s40_s26 = int_to_ptr.vmem [resolvable:$true] %s39_s26 }
   0x5   :  { %s2373_s27 = scalar_lea.vmem %s40_s26, 3072  ;;  %p2378_p1 = scmp.lt.s32.totalorder %s40_s26, %s40_s26 }
   0x6   :  { %p2374_p0 = scmp.ne.s32.totalorder %s40_s26, %s2373_s27  ;;  %p2379_p2 = scmp.lt.s32.totalorder %s2373_s27, %s2373_s27 }
   0x8   :  { %p2380_p3 = por %p2379_p2, %p2378_p1 }
   0xa   :  { %p2381_p4 = pnand %p2380_p3, %p2374_p0 }
   0xc   :  { %2384 = shalt.err (!%p2381_p4)
}
   0xd   :  { %s2494_s28 = smov 192   ;;  %s2495_s29 = smov 12  }
   0xe   :  { %45 = dma.hbm_to_vmem [thread:$0]  %s2877_s1, 3072, %s40_s26, [#allocation6], %s2494_s28, %s2494_s28, %s2495_s29  }
   0xf   :  { %s2496_s15 = smov [#allocation8]   ;;  %s2497_s17 = smov [#allocation2]  }
  0x10   :  { %s67_s16 = sshll.u32 %s2496_s15, 4  ;;  %s27_s18 = sshll.u32 %s2497_s17, 4  ;;  %s68_s16 = int_to_ptr.vmem [resolvable:$true] %s67_s16  ;;  %s28_s18 = int_to_ptr.vmem [resolvable:$true] %s27_s18 }
  0x11   :  { %s2393_s19 = scalar_lea.vmem %s68_s16, 2048  ;;  %p2398_p6 = scmp.lt.s32.totalorder %s68_s16, %s68_s16 }
  0x12   :  { %p2394_p5 = scmp.ne.s32.totalorder %s68_s16, %s2393_s19  ;;  %p2399_p7 = scmp.lt.s32.totalorder %s2393_s19, %s2393_s19 }
  0x14   :  { %p2400_p8 = por %p2399_p7, %p2398_p6 }
  0x16   :  { %p2401_p9 = pnand %p2400_p8, %p2394_p5 }
  0x18   :  { %2404 = shalt.err (!%p2401_p9)
}
  0x19   :  { %s2498_s20 = smov 128   ;;  %s2499_s21 = smov 8  }
  0x1a   :  { %73 = dma.hbm_to_vmem [thread:$0]  %s2881_s5, 2048, %s68_s16, [#allocation9], %s2498_s20, %s2498_s20, %s2499_s21  }
  0x1b   :  { %s2413_s1 = scalar_lea.vmem %s28_s18, 256  ;;  %p2418_p11 = scmp.lt.s32.totalorder %s28_s18, %s28_s18 }
  0x1c   :  { %p2414_p10 = scmp.ne.s32.totalorder %s28_s18, %s2413_s1  ;;  %p2419_p12 = scmp.lt.s32.totalorder %s2413_s1, %s2413_s1 }
  0x1e   :  { %p2420_p13 = por %p2419_p12, %p2418_p11 }
  0x20   :  { %p2421_p0 = pnand %p2420_p13, %p2414_p10 }
  0x22   :  { %2424 = shalt.err (!%p2421_p0)
}
  0x23   :  { %33 = dma.hbm_to_vmem [thread:$0]  %s2876_s0, 256, %s28_s18, [#allocation3], %s2498_s20, %s2498_s20, %s2499_s21  }
  0x24   :  { %s2500_s26 = smov [#allocation7]  }
  0x25   :  { %s53_s27 = sshll.u32 %s2500_s26, 4  ;;  %s54_s27 = int_to_ptr.vmem [resolvable:$true] %s53_s27 }
  0x26   :  { %s2433_s28 = scalar_lea.vmem %s54_s27, 1024  ;;  %p2438_p2 = scmp.lt.s32.totalorder %s54_s27, %s54_s27 }
  0x27   :  { %p2434_p1 = scmp.ne.s32.totalorder %s54_s27, %s2433_s28  ;;  %p2439_p3 = scmp.lt.s32.totalorder %s2433_s28, %s2433_s28 }
  0x29   :  { %p2440_p4 = por %p2439_p3, %p2438_p2 }
  0x2b   :  { %p2441_p5 = pnand %p2440_p4, %p2434_p1 }
  0x2d   :  { %2444 = shalt.err (!%p2441_p5)
}
  0x2e   :  { %s2501_s5 = smov 64   ;;  %s2502_s29 = smov 4  }
  0x2f   :  { %59 = dma.hbm_to_vmem [thread:$0]  %s2879_s3, 1024, %s54_s27, [#allocation6], %s2501_s5, %s2501_s5, %s2502_s29  }
  0x30   :  { %s2503_s15 = smov [#allocation10]  }
  0x31   :  { %s81_s0 = sshll.u32 %s2503_s15, 4  ;;  %s82_s0 = int_to_ptr.vmem [resolvable:$true] %s81_s0 }
  0x32   :  { %s2453_s16 = scalar_lea.vmem %s82_s0, 2048  ;;  %p2458_p7 = scmp.lt.s32.totalorder %s82_s0, %s82_s0 }
  0x33   :  { %p2454_p6 = scmp.ne.s32.totalorder %s82_s0, %s2453_s16  ;;  %p2459_p8 = scmp.lt.s32.totalorder %s2453_s16, %s2453_s16 }
  0x35   :  { %p2460_p9 = por %p2459_p8, %p2458_p7 }
  0x37   :  { %p2461_p10 = pnand %p2460_p9, %p2454_p6 }
  0x39   :  { %2464 = shalt.err (!%p2461_p10)
}
  0x3a   :  { %87 = dma.hbm_to_vmem [thread:$0]  %s2883_s7, 2048, %s82_s0, [#allocation9], %s2501_s5, %s2501_s5, %s2502_s29  }
  0x3b   :  { %2485 = dma.done.wait [#allocation3], 256  }
  0x3c   :  { %2486 = vsyncadd [#allocation3], 4294967040 }
  0x3d   :  { %2487 = dma.done.wait [#allocation6], 4096  }
  0x3e   :  { %2488 = vsyncadd [#allocation6], 4294963200 }
  0x3f   :  { %2489 = dma.done.wait [#allocation9], 4096  }
  0x40   :  { %2490 = vsyncadd [#allocation9], 4294963200  ;;  %v2504_v0 = vmov 0   ;;  %v2251_v1 = vld [vmem:[#allocation5 + $0xac] ss:$12 sps:$4 sm:$0xff]   ;;  %v114_v17 = vld [vmem:[#allocation2] sm:$0xff]  ;;  %v151_v29 = vlaneseq }
  0x41   :  { %326 = vmatprep.mubr.bf16.mxu0 %v2504_v0  ;;  %v2253_v2 = vld [vmem:[#allocation5 + $0xa8] ss:$12 sps:$4 sm:$0xff]   ;;  %294 = vmatprep.subr.bf16.mxu0 %v2251_v1  ;;  %v2256_v4 = vld [vmem:[#allocation5 + $0x90] ss:$12 sps:$4 sm:$0xff]   ;;  %v2259_v6 = vld [vmem:[#allocation5 + $0x78] ss:$12 sps:$4 sm:$0xff]  }
  0x42   :  { %v2254_v3 = vld [vmem:[#allocation5 + $0x94] ss:$12 sps:$4 sm:$0xff]   ;;  %295 = vmatpush1.bf16.msra.mxu0 %v2253_v2  ;;  %v2257_v5 = vld [vmem:[#allocation5 + $0x7c] ss:$12 sps:$4 sm:$0xff]   ;;  %v2260_v7 = vld [vmem:[#allocation5 + $0x64] ss:$12 sps:$4 sm:$0xff]  }
  0x43   :  { %296 = vmatprep.subr.bf16.mxu0 %v2254_v3  ;;  %v2262_v8 = vld [vmem:[#allocation5 + $0x60] ss:$12 sps:$4 sm:$0xff]   ;;  %v2265_v10 = vld [vmem:[#allocation5 + $0x48] ss:$12 sps:$4 sm:$0xff]   ;;  %v2268_v12 = vld [vmem:[#allocation5 + $0x30] ss:$12 sps:$4 sm:$0xff]  }
  0x44   :  { %v2263_v9 = vld [vmem:[#allocation5 + $0x4c] ss:$12 sps:$4 sm:$0xff]   ;;  %v2266_v11 = vld [vmem:[#allocation5 + $0x34] ss:$12 sps:$4 sm:$0xff]   ;;  %v2269_v13 = vld [vmem:[#allocation5 + $0x1c] ss:$12 sps:$4 sm:$0xff]  }
  0x45   :  { %v2271_v14 = vld [vmem:[#allocation5 + $0x18] ss:$12 sps:$4 sm:$0xff]   ;;  %v2274_v16 = vld [vmem:[#allocation5] ss:$12 sps:$4 sm:$0xff]   ;;  %v2275_v20 = vld [vmem:[#allocation5 + $0xb0] ss:$12 sps:$4 sm:$0xff]  }
  0x46   :  { %297 = vmatpush1.bf16.msra.mxu0 %v2256_v4  ;;  %v2272_v15 = vld [vmem:[#allocation5 + $0x4] ss:$12 sps:$4 sm:$0xff]   ;;  %v115_v18 = vld [vmem:[#allocation2 + $0x8] sm:$0xff]  ;;  %v2505_v21 = vmov 0.0   ;;  %vm2506_vm0 = vmmov 0   ;;  %v2622_v30 = vshrl.u32 %v151_v29, 7 }
  0x47   :  { %298 = vmatprep.subr.bf16.mxu0 %v2257_v5  ;;  %v116_v19 = vpack.c.bf16 %v115_v18, %v114_v17  ;;  %2086 = vmatprep.subr.bf16.mxu1 %v2505_v21  ;;  %v2276_v22 = vld [vmem:[#allocation5 + $0x98] ss:$12 sps:$4 sm:$0xff]   ;;  %v2277_v23 = vld [vmem:[#allocation5 + $0x80] ss:$12 sps:$4 sm:$0xff]   ;;  %v2278_v24 = vld [vmem:[#allocation5 + $0x68] ss:$12 sps:$4 sm:$0xff]  }
  0x48   :  { %2102 = vmatprep.mubr.msk.bf16.mxu1 %vm2506_vm0, %v2505_v21  ;;  %2087 = vmatpush3.bf16.msra.mxu1 %v2275_v20  ;;  %v2279_v25 = vld [vmem:[#allocation5 + $0x50] ss:$12 sps:$4 sm:$0xff]   ;;  %v2280_v26 = vld [vmem:[#allocation5 + $0x38] ss:$12 sps:$4 sm:$0xff]   ;;  %v2281_v27 = vld [vmem:[#allocation5 + $0x20] ss:$12 sps:$4 sm:$0xff]  }
  0x49   :  { %2088 = vmatprep.subr.bf16.mxu1 %v2505_v21  ;;  %v2282_v28 = vld [vmem:[#allocation5 + $0x8] ss:$12 sps:$4 sm:$0xff]   ;;  %v153_v31 = vsub.s32 0, %v2622_v30  ;;  %v2628_v32 = vld [vmem:[%s2878_s2] sm:$0x7]  ;;  %s2507_s19 = smov 96  }
  0x4a   :  { %299 = vmatpush1.bf16.msra.mxu0 %v2259_v6  ;;  %v161_v41 = vsub.s32 2, %v2622_v30  ;;  %vm383_vm1 = vcmask 261120   ;;  %vm481_vm2 = vcmask 64512   ;;  %vm511_vm3 = vcmask 1043456   ;;  %s2508_s2 = smov 32  }
  0x4b   :  { %300 = vmatprep.subr.bf16.mxu0 %v2260_v7  ;;  %v154_v33 = vrot.slane %v2628_v32, %v153_v31  ;;  %v157_v17 = vsub.s32 1, %v2622_v30  ;;  %v1992_v30 = vld [vmem:[%s2884_s8] ss:$0 sm:$0xff]  ;;  %s2509_s8 = smov [#allocation11]  }
  0x4c   :  { %2089 = vmatpush3.bf16.msra.mxu1 %v2276_v22  ;;  %v2645_v42 = vrot.slane %v2628_v32, %v161_v41  ;;  %s1907_s30 = sshll.u32 %s2509_s8, 4  ;;  %s1908_s30 = int_to_ptr.vmem [resolvable:$true] %s1907_s30 }
  0x4d   :  { %2090 = vmatprep.subr.bf16.mxu1 %v2505_v21  ;;  %s2465_s14 = scalar_lea.vmem %s1908_s30, 256  ;;  %p2470_p12 = scmp.lt.s32.totalorder %s1908_s30, %s1908_s30 }
  0x4e   :  { %301 = vmatpush1.bf16.msra.mxu0 %v2262_v8  ;;  %p2466_p11 = scmp.ne.s32.totalorder %s1908_s30, %s2465_s14  ;;  %p2471_p13 = scmp.lt.s32.totalorder %s2465_s14, %s2465_s14 }
  0x4f   :  { %302 = vmatprep.subr.bf16.mxu0 %v2263_v9 }
  0x50   :  { %2091 = vmatpush3.bf16.msra.mxu1 %v2277_v23  ;;  %p2472_p0 = por %p2471_p13, %p2470_p12 }
  0x51   :  { %2092 = vmatprep.subr.bf16.mxu1 %v2505_v21 }
  0x52   :  { %303 = vmatpush1.bf16.msra.mxu0 %v2265_v10  ;;  %p2473_p1 = pnand %p2472_p0, %p2466_p11 }
  0x53   :  { %304 = vmatprep.subr.bf16.mxu0 %v2266_v11 }
  0x54   :  { %2093 = vmatpush3.bf16.msra.mxu1 %v2278_v24 }
  0x55   :  { %2094 = vmatprep.subr.bf16.mxu1 %v2505_v21 }
  0x56   :  { %305 = vmatpush1.bf16.msra.mxu0 %v2268_v12 }
  0x57   :  { %306 = vmatprep.subr.bf16.mxu0 %v2269_v13 }
  0x58   :  { %2095 = vmatpush3.bf16.msra.mxu1 %v2279_v25 }
  0x59   :  { %2096 = vmatprep.subr.bf16.mxu1 %v2505_v21 }
  0x5a   :  { %307 = vmatpush1.bf16.msra.mxu0 %v2271_v14 }
  0x5b   :  { %308 = vmatprep.subr.bf16.mxu0 %v2272_v15 }
  0x5c   :  { %2097 = vmatpush3.bf16.msra.mxu1 %v2280_v26 }
  0x5d   :  { %2098 = vmatprep.subr.bf16.mxu1 %v2505_v21 }
  0x5e   :  { %309 = vmatpush1.bf16.msra.mxu0 %v2274_v16 }
  0x5f   :  { %2106 = vmatprep.subr.bf16.mxu0 %v2505_v21 }
  0x60   :  { %2099 = vmatpush3.bf16.msra.mxu1 %v2281_v27 }
  0x61   :  { %327 = vmatmul.mubr.bf16.vlgmr.msra.gmra.mxu0 %v116_v19  ;;  %2100 = vmatprep.subr.bf16.mxu1 %v2505_v21 }
  0x62   :  { %2108 = vmatprep.mubr.msk.bf16.mxu0 %vm2506_vm0, %v2505_v21 }
  0x64   :  { %2101 = vmatpush3.bf16.msra.mxu1 %v2282_v28 }
  0x65   :  { %2112 = vmatprep.subr.bf16.mxu1 %v2505_v21 }
  0x67   :  { %2103 = vmatmul.mubr.bf16.vlgmr.msra.gmra.mxu1 %v116_v19  ;;  %v158_v19 = vrot.slane %v2628_v32, %v157_v17 }
  0x68   :  { %2114 = vmatprep.mubr.msk.bf16.mxu1 %vm2506_vm0, %v2505_v21 }
 0x121   :  { %v328_v34 = vpop.f32.mrf.mxu0 }
 0x122   :  { %v329_v35 = vadd.f32 %v328_v34, %v154_v33 }
 0x123   :  { %v2633_v36 = vpop.f32.mrf.mxu0 }
 0x124   :  { %v2635_v37 = vpack.c.bf16 %v329_v35, %v329_v35  ;;  %v331_v20 = vadd.f32 %v2633_v36, %v158_v19 }
 0x125   :  { %v332_v38 = vpop.f32.mrf.mxu0 }
 0x126   :  { %v333_v39 = vadd.f32 %v332_v38, %v154_v33  ;;  %381 = vrot.lane.b32.xlu0 %v2635_v37, %s2507_s19  ;;  %v2685_v23 = vpack.c.bf16 %v331_v20, %v331_v20 }
 0x127   :  { %v371_v43 = vpop.f32.mrf.mxu1  ;;  %v334_v52 = vpop.f32.mrf.mxu0 }
 0x128   :  { %v2639_v40 = vpack.c.bf16 %v333_v39, %v333_v39  ;;  %v2648_v44 = vadd.f32 %v371_v43, %v2645_v42  ;;  %v335_v24 = vadd.f32 %v334_v52, %v158_v19  ;;  %v616_v29 = vsel %vm383_vm1, %v2685_v23, 0 }
 0x129   :  { %v2104_v45 = vpop.f32.mrf.mxu1 }
 0x12a   :  { %431 = vrot.lane.b32.xlu0 %v2639_v40, %s2507_s19  ;;  %v2687_v28 = vpack.c.bf16 %v335_v24, %v335_v24  ;;  %v2284_v24 = vld [vmem:[#allocation7] sm:$0xff]  }
 0x12b   :  { %v2650_v46 = vpop.f32.mrf.mxu1 }
 0x12c   :  { %v664_v34 = vsel %vm383_vm1, %v2687_v28, 0 }
 0x12d   :  { %v2105_v47 = vpop.f32.mrf.mxu1 }
 0x198   :  { %v382_v48 = vpop.permute.xlu0 %381 }
 0x199   :  { %v388_v49 = vsel %vm383_vm1, %v382_v48, 0 }
 0x19a   :  { %2107 = vmatpush3.bf16.xpose.msra.mxu0 %v388_v49 }
 0x19b   :  { %2118 = vmatprep.subr.bf16.mxu0 %v2505_v21 }
 0x19c   :  { %v432_v50 = vpop.permute.xlu0 %431 }
 0x19d   :  { %v437_v51 = vsel %vm383_vm1, %v432_v50, 0 }
 0x19e   :  { %2113 = vmatpush3.bf16.xpose.msra.mxu1 %v437_v51 }
 0x19f   :  { %2124 = vmatprep.subr.bf16.mxu1 %v2505_v21 }
 0x1a1   :  { %2109 = vmatmul.mubr.msk.bf16.vlgmr.msra.gmra.mxu0 %vm383_vm1, %v2635_v37 }
 0x1a2   :  { %2120 = vmatprep.mubr.msk.bf16.mxu0 %vm2506_vm0, %v2505_v21 }
 0x1a5   :  { %2115 = vmatmul.mubr.msk.bf16.vlgmr.msra.gmra.mxu1 %vm383_vm1, %v2639_v40 }
 0x1a6   :  { %2126 = vmatprep.mubr.msk.bf16.mxu1 %vm2506_vm0, %v2505_v21 }
 0x261   :  { %v424_v53 = vpop.f32.mrf.mxu0 }
 0x262   :  { %v479_v54 = vmul.f32 0.17677669, %v424_v53 }
 0x263   :  { %v2110_v55 = vpop.f32.mrf.mxu0 }
 0x264   :  { %v482_v56 = vsel %vm481_vm2, %v479_v54, -inf }
 0x265   :  { %483 = vmax.xlane.f32.xlu1 %v482_v56  ;;  %v427_v57 = vpop.f32.mrf.mxu0  ;;  %v473_v58 = vpop.f32.mrf.mxu1 }
 0x266   :  { %v480_v59 = vmul.f32 0.17677669, %v473_v58 }
 0x267   :  { %v2111_v60 = vpop.f32.mrf.mxu0  ;;  %v2116_v61 = vpop.f32.mrf.mxu1 }
 0x268   :  { %v485_v62 = vsel %vm481_vm2, %v480_v59, -inf }
 0x269   :  { %486 = vmax.xlane.f32.xlu1 %v485_v62  ;;  %v476_v63 = vpop.f32.mrf.mxu1 }
 0x26b   :  { %v2117_v1 = vpop.f32.mrf.mxu1 }
 0x27a   :  { %506 = vrot.lane.b32.xlu1 %v2635_v37, %s2501_s5 }
 0x27e   :  { %555 = vrot.lane.b32.xlu1 %v2639_v40, %s2501_s5 }
 0x2ee   :  { %v484_v2 = vpop.xlane.xlu1 %483 }
 0x2ef   :  { %v488_v3 = vsub.f32 %v479_v54, %v484_v2 }
 0x2f1   :  { %v490_v4 = vmul.f32 1.442695, %v488_v3 }
 0x2f2   :  { %v487_v5 = vpop.xlane.xlu1 %486 }
 0x2f3   :  { %2331 = vpow2.f32 %v490_v4  ;;  %v489_v6 = vsub.f32 %v480_v59, %v487_v5 }
 0x2f5   :  { %v492_v7 = vmul.f32 1.442695, %v489_v6 }
 0x2f6   :  { %v507_v8 = vpop.permute.xlu1 %506 }
 0x2f7   :  { %2333 = vpow2.f32 %v492_v7  ;;  %v513_v9 = vsel %vm511_vm3, %v507_v8, 0 }
 0x2f8   :  { %2119 = vmatpush3.bf16.msra.mxu0 %v513_v9 }
 0x2f9   :  { %2130 = vmatprep.subr.bf16.mxu0 %v2505_v21 }
 0x2fa   :  { %v556_v10 = vpop.permute.xlu1 %555 }
 0x2fb   :  { %v561_v11 = vsel %vm511_vm3, %v556_v10, 0 }
 0x2fc   :  { %2125 = vmatpush3.bf16.msra.mxu1 %v561_v11 }
 0x2fd   :  { %2136 = vmatprep.subr.bf16.mxu1 %v2505_v21 }
 0x300   :  { %v2332_v12 = vpop.eup %2331 }
 0x301   :  { %v494_v13 = vsel %vm481_vm2, %v2332_v12, 0.0 }
 0x302   :  { %495 = vadd.xlane.f32.xlu0 %v494_v13 }
 0x304   :  { %v2334_v14 = vpop.eup %2333 }
 0x305   :  { %v497_v15 = vsel %vm481_vm2, %v2334_v14, 0.0 }
 0x306   :  { %498 = vadd.xlane.f32.xlu1 %v497_v15 }
 0x317   :  { %610 = vrot.lane.b32.xlu1 %v2635_v37, %s2508_s2 }
 0x31b   :  { %658 = vrot.lane.b32.xlu1 %v2639_v40, %s2508_s2 }
 0x38b   :  { %v496_v16 = vpop.xlane.xlu0 %495 }
 0x38c   :  { %2335 = vrcp.f32 %v496_v16  ;;  %v2285_v16 = vld [vmem:[#allocation7 + $0x18] sm:$0xff]  }
 0x38f   :  { %v499_v18 = vpop.xlane.xlu1 %498 }
 0x390   :  { %2337 = vrcp.f32 %v499_v18 }
 0x393   :  { %v611_v35 = vpop.permute.xlu1 %610 }
 0x397   :  { %v659_v36 = vpop.permute.xlu1 %658 }
 0x399   :  { %v2336_v22 = vpop.eup %2335 }
 0x39a   :  { %v502_v25 = vmul.f32 %v2336_v22, %v2332_v12  ;;  %v2283_v22 = vld [vmem:[#allocation7 + $0x8] sm:$0xff]  }
 0x39c   :  { %v504_v26 = vpack.c.bf16 %v502_v25, %v502_v25 }
 0x39d   :  { %v2338_v27 = vpop.eup %2337 }
 0x39e   :  { %2121 = vmatmul.mubr.msk.bf16.vlgmr.msra.gmra.mxu0 %vm481_vm2, %v504_v26  ;;  %v503_v33 = vmul.f32 %v2338_v27, %v2334_v14  ;;  %v375_v27 = vadd.f32 %v2650_v46, %v2645_v42  ;;  %v2286_v46 = vld [vmem:[#allocation7 + $0x10] sm:$0xff]  }
 0x39f   :  { %2131 = vmatpush3.bf16.xpose.msra.mxu0 %v616_v29  ;;  %2132 = vmatprep.mubr.msk.bf16.mxu0 %vm2506_vm0, %v2505_v21 }
 0x3a0   :  { %v505_v32 = vpack.c.bf16 %v503_v33, %v503_v33  ;;  %2142 = vmatprep.subr.bf16.mxu0 %v2505_v21  ;;  %v2752_v33 = vpack.c.bf16 %v375_v27, %v375_v27 }
 0x3a2   :  { %2127 = vmatmul.mubr.msk.bf16.vlgmr.msra.gmra.mxu1 %vm481_vm2, %v505_v32  ;;  %v1125_v42 = vsel %vm511_vm3, %v2752_v33, 0 }
 0x3a3   :  { %2137 = vmatpush3.bf16.xpose.msra.mxu1 %v664_v34  ;;  %2138 = vmatprep.mubr.msk.bf16.mxu1 %vm2506_vm0, %v2505_v21 }
 0x3a4   :  { %2148 = vmatprep.subr.bf16.mxu1 %v2505_v21 }
 0x3a6   :  { %2133 = vmatmul.mubr.msk.bf16.vlgmr.msra.gmra.mxu0 %vm383_vm1, %v611_v35 }
 0x3a7   :  { %2144 = vmatprep.mubr.msk.bf16.mxu0 %vm2506_vm0, %v2505_v21 }
 0x3aa   :  { %2139 = vmatmul.mubr.msk.bf16.vlgmr.msra.gmra.mxu1 %vm383_vm1, %v659_v36 }
 0x3ab   :  { %2150 = vmatprep.mubr.msk.bf16.mxu1 %vm2506_vm0, %v2505_v21 }
 0x45e   :  { %v2707_v37 = vpop.f32.mrf.mxu0 }
 0x460   :  { %v2122_v38 = vpop.f32.mrf.mxu0 }
 0x462   :  { %v552_v39 = vpop.f32.mrf.mxu0  ;;  %v2709_v40 = vpop.f32.mrf.mxu1 }
 0x463   :  { %v603_v41 = vpack.c.bf16 %v2709_v40, %v2707_v37 }
 0x464   :  { %v2123_v43 = vpop.f32.mrf.mxu0  ;;  %v2128_v45 = vpop.f32.mrf.mxu1 }
 0x466   :  { %v600_v47 = vpop.f32.mrf.mxu1  ;;  %v652_v48 = vpop.f32.mrf.mxu0 }
 0x467   :  { %v706_v49 = vmul.f32 0.17677669, %v652_v48  ;;  %v2768_v47 = vpack.c.bf16 %v2648_v44, %v2648_v44 }
 0x468   :  { %v2129_v50 = vpop.f32.mrf.mxu1  ;;  %v2134_v51 = vpop.f32.mrf.mxu0 }
 0x469   :  { %v708_v52 = vsel %vm481_vm2, %v706_v49, -inf  ;;  %v1079_v50 = vsel %vm511_vm3, %v2768_v47, 0 }
 0x46a   :  { %v700_v53 = vpop.f32.mrf.mxu1  ;;  %709 = vmax.xlane.f32.xlu0 %v708_v52  ;;  %v655_v54 = vpop.f32.mrf.mxu0 }
 0x46b   :  { %v707_v55 = vmul.f32 0.17677669, %v700_v53 }
 0x46c   :  { %v2135_v56 = vpop.f32.mrf.mxu0  ;;  %v2140_v57 = vpop.f32.mrf.mxu1 }
 0x46d   :  { %v711_v58 = vsel %vm481_vm2, %v707_v55, -inf }
 0x46e   :  { %712 = vmax.xlane.f32.xlu1 %v711_v58  ;;  %v703_v59 = vpop.f32.mrf.mxu1 }
 0x470   :  { %v2141_v60 = vpop.f32.mrf.mxu1 }
 0x47f   :  { %1001 = vrot.lane.b32.xlu1 %v2687_v28, %s2508_s2 }
 0x480   :  { %733 = vrot.lane.b32.xlu0 %v2685_v23, %s2507_s19 }
 0x4f3   :  { %v710_v61 = vpop.xlane.xlu0 %709 }
 0x4f4   :  { %v714_v62 = vsub.f32 %v706_v49, %v710_v61 }
 0x4f6   :  { %v716_v63 = vmul.f32 1.442695, %v714_v62 }
 0x4f7   :  { %v713_v1 = vpop.xlane.xlu1 %712  ;;  %v734_v2 = vpop.permute.xlu0 %733 }
 0x4f8   :  { %2339 = vpow2.f32 %v716_v63  ;;  %v715_v3 = vsub.f32 %v707_v55, %v713_v1  ;;  %v739_v4 = vsel %vm511_vm3, %v734_v2, 0 }
 0x4f9   :  { %2143 = vmatpush3.bf16.msra.mxu0 %v739_v4 }
 0x4fa   :  { %v718_v5 = vmul.f32 1.442695, %v715_v3  ;;  %2154 = vmatprep.subr.bf16.mxu0 %v2505_v21 }
 0x4fb   :  { %v1002_v26 = vpop.permute.xlu1 %1001 }
 0x4fc   :  { %2341 = vpow2.f32 %v718_v5 }
 0x505   :  { %v2340_v6 = vpop.eup %2339 }
 0x506   :  { %v720_v7 = vsel %vm481_vm2, %v2340_v6, 0.0 }
 0x507   :  { %721 = vadd.xlane.f32.xlu0 %v720_v7 }
 0x509   :  { %v2342_v8 = vpop.eup %2341 }
 0x50a   :  { %v723_v9 = vsel %vm481_vm2, %v2342_v8, 0.0 }
 0x50b   :  { %724 = vadd.xlane.f32.xlu0 %v723_v9 }
 0x521   :  { %782 = vrot.lane.b32.xlu0 %v2687_v28, %s2507_s19 }
 0x525   :  { %951 = vrot.lane.b32.xlu0 %v2685_v23, %s2508_s2 }
 0x529   :  { %949 = vrot.lane.b32.xlu0 %v2685_v23, %s2501_s5 }
 0x52d   :  { %999 = vrot.lane.b32.xlu0 %v2687_v28, %s2501_s5  ;;  %v1007_v28 = vsel %vm383_vm1, %v1002_v26, 0 }
 0x590   :  { %v722_v10 = vpop.xlane.xlu0 %721 }
 0x591   :  { %2343 = vrcp.f32 %v722_v10 }
 0x594   :  { %v725_v11 = vpop.xlane.xlu0 %724 }
 0x595   :  { %2345 = vrcp.f32 %v725_v11 }
 0x598   :  { %v783_v12 = vpop.permute.xlu0 %782 }
 0x599   :  { %v788_v13 = vsel %vm511_vm3, %v783_v12, 0 }
 0x59a   :  { %2149 = vmatpush3.bf16.msra.mxu1 %v788_v13 }
 0x59b   :  { %2162 = vmatprep.subr.bf16.mxu1 %v2505_v21 }
 0x59c   :  { %v952_v25 = vpop.permute.xlu0 %951 }
 0x59e   :  { %v2344_v14 = vpop.eup %2343 }
 0x59f   :  { %v728_v15 = vmul.f32 %v2344_v14, %v2340_v6 }
 0x5a0   :  { %v950_v29 = vpop.permute.xlu0 %949 }
 0x5a1   :  { %v730_v18 = vpack.c.bf16 %v728_v15, %v728_v15 }
 0x5a2   :  { %v2346_v19 = vpop.eup %2345 }
 0x5a3   :  { %2145 = vmatmul.mubr.msk.bf16.vlgmr.msra.gmra.mxu0 %vm481_vm2, %v730_v18  ;;  %v729_v20 = vmul.f32 %v2346_v19, %v2342_v8 }
 0x5a4   :  { %2155 = vmatpush3.bf16.msra.mxu0 %v2285_v16  ;;  %2158 = vmatprep.mubr.msk.bf16.mxu0 %vm2506_vm0, %v2505_v21  ;;  %v1000_v32 = vpop.permute.xlu0 %999 }
 0x5a5   :  { %v731_v23 = vpack.c.bf16 %v729_v20, %v729_v20  ;;  %2156 = vmatprep.subr.bf16.mxu0 %v2505_v21  ;;  %v2287_v20 = vld [vmem:[#allocation7 + $0x28] sm:$0xff]  }
 0x5a7   :  { %2151 = vmatmul.mubr.msk.bf16.vlgmr.msra.gmra.mxu1 %vm481_vm2, %v731_v23 }
 0x5a8   :  { %2163 = vmatpush3.bf16.msra.mxu1 %v2283_v22  ;;  %2166 = vmatprep.mubr.msk.bf16.mxu1 %vm2506_vm0, %v2505_v21 }
 0x5a9   :  { %2164 = vmatprep.subr.bf16.mxu1 %v2505_v21  ;;  %2157 = vmatpush3.bf16.msra.mxu0 %v2286_v46 }
 0x5aa   :  { %2170 = vmatprep.subr.bf16.mxu0 %v2505_v21 }
 0x5ac   :  { %2165 = vmatpush3.bf16.msra.mxu1 %v2284_v24 }
 0x5ad   :  { %2176 = vmatprep.subr.bf16.mxu1 %v2505_v21 }
 0x5af   :  { %2167 = vmatmul.mubr.msk.bf16.vlgmr.msra.gmra.mxu1 %vm383_vm1, %v603_v41  ;;  %v957_v41 = vsel %vm383_vm1, %v952_v25, 0 }
 0x5b0   :  { %2177 = vmatpush3.bf16.xpose.msra.mxu1 %v1007_v28  ;;  %2178 = vmatprep.mubr.msk.bf16.mxu1 %vm2506_vm0, %v2505_v21 }
 0x5b1   :  { %2188 = vmatprep.subr.bf16.mxu1 %v2505_v21 }
 0x5b7   :  { %2179 = vmatmul.mubr.msk.bf16.vlgmr.msra.gmra.mxu1 %vm383_vm1, %v1000_v32  ;;  %v2288_v32 = vld [vmem:[#allocation7 + $0x20] sm:$0xff]  }
 0x5b8   :  { %2189 = vmatpush3.bf16.msra.mxu1 %v1125_v42  ;;  %2190 = vmatprep.mubr.msk.bf16.mxu1 %vm2506_vm0, %v2505_v21 }
 0x5b9   :  { %2202 = vmatprep.subr.bf16.mxu1 %v2505_v21 }
 0x663   :  { %v775_v34 = vpop.f32.mrf.mxu0 }
 0x665   :  { %v2146_v35 = vpop.f32.mrf.mxu0 }
 0x667   :  { %v778_v36 = vpop.f32.mrf.mxu0  ;;  %v824_v37 = vpop.f32.mrf.mxu1 }
 0x668   :  { %v830_v38 = vpack.c.bf16 %v824_v37, %v775_v34 }
 0x669   :  { %v2147_v39 = vpop.f32.mrf.mxu0  ;;  %v2152_v40 = vpop.f32.mrf.mxu1 }
 0x66a   :  { %2159 = vmatmul.mubr.msk.bf16.vlgmr.msra.gmra.mxu0 %vm383_vm1, %v830_v38 }
 0x66b   :  { %2171 = vmatpush3.bf16.xpose.msra.mxu0 %v957_v41  ;;  %v827_v43 = vpop.f32.mrf.mxu1  ;;  %2172 = vmatprep.mubr.msk.bf16.mxu0 %vm2506_vm0, %v2505_v21 }
 0x66c   :  { %2182 = vmatprep.subr.bf16.mxu0 %v2505_v21 }
 0x66d   :  { %v2153_v45 = vpop.f32.mrf.mxu1 }
 0x66f   :  { %v2770_v48 = vpop.f32.mrf.mxu1 }
 0x671   :  { %v2168_v49 = vpop.f32.mrf.mxu1 }
 0x672   :  { %2173 = vmatmul.mubr.msk.bf16.vlgmr.msra.gmra.mxu0 %vm383_vm1, %v950_v29 }
 0x673   :  { %2183 = vmatpush3.bf16.msra.mxu0 %v1079_v50  ;;  %v2775_v51 = vpop.f32.mrf.mxu1  ;;  %2184 = vmatprep.mubr.msk.bf16.mxu0 %vm2506_vm0, %v2505_v21 }
 0x674   :  { %2194 = vmatprep.subr.bf16.mxu0 %v2505_v21 }
 0x675   :  { %v2169_v52 = vpop.f32.mrf.mxu1 }
 0x677   :  { %v1043_v53 = vpop.f32.mrf.mxu1 }
 0x678   :  { %v1050_v44 = vmul.f32 0.17677669, %v1043_v53 }
 0x679   :  { %v2180_v54 = vpop.f32.mrf.mxu1 }
 0x67a   :  { %v1054_v55 = vsel %vm481_vm2, %v1050_v44, -inf }
 0x67b   :  { %1055 = vmax.xlane.f32.xlu1 %v1054_v55  ;;  %v1046_v56 = vpop.f32.mrf.mxu1 }
 0x67d   :  { %v2181_v57 = vpop.f32.mrf.mxu1 }
 0x68c   :  { %1284 = vrot.lane.b32.xlu1 %v2752_v33, %s2501_s5 }
 0x690   :  { %1231 = vrot.lane.b32.xlu1 %v2768_v47, %s2507_s19 }
 0x704   :  { %v1056_v5 = vpop.xlane.xlu1 %1055 }
 0x705   :  { %v1058_v6 = vsub.f32 %v1050_v44, %v1056_v5 }
 0x707   :  { %v1061_v9 = vmul.f32 1.442695, %v1058_v6 }
 0x708   :  { %v1285_v28 = vpop.permute.xlu1 %1284 }
 0x709   :  { %v1290_v39 = vsel %vm383_vm1, %v1285_v28, 0 }
 0x70c   :  { %v1232_v29 = vpop.permute.xlu1 %1231 }
 0x72a   :  { %v2785_v58 = vpop.f32.mrf.mxu0 }
 0x72b   :  { %v941_v57 = vadd.f32 %v2770_v48, %v2785_v58 }
 0x72c   :  { %v2160_v59 = vpop.f32.mrf.mxu0 }
 0x72e   :  { %v2787_v60 = vpop.f32.mrf.mxu0 }
 0x730   :  { %v2161_v61 = vpop.f32.mrf.mxu0 }
 0x732   :  { %v993_v62 = vpop.f32.mrf.mxu0 }
 0x733   :  { %v1049_v63 = vmul.f32 0.17677669, %v993_v62 }
 0x734   :  { %v2174_v1 = vpop.f32.mrf.mxu0 }
 0x735   :  { %v1051_v2 = vsel %vm481_vm2, %v1049_v63, -inf }
 0x736   :  { %1052 = vmax.xlane.f32.xlu0 %v1051_v2  ;;  %v996_v3 = vpop.f32.mrf.mxu0 }
 0x738   :  { %v2175_v4 = vpop.f32.mrf.mxu0 }
 0x7bf   :  { %v1053_v7 = vpop.xlane.xlu0 %1052 }
 0x7c0   :  { %v1057_v8 = vsub.f32 %v1049_v63, %v1053_v7  ;;  %v944_v63 = vadd.f32 %v2775_v51, %v2787_v60 }
 0x7c2   :  { %v1059_v10 = vmul.f32 1.442695, %v1057_v8 }
 0x7c4   :  { %2347 = vpow2.f32 %v1059_v10 }
 0x7c5   :  { %2349 = vpow2.f32 %v1061_v9 }
 0x7d1   :  { %v2348_v11 = vpop.eup %2347 }
 0x7d2   :  { %v1063_v12 = vsel %vm481_vm2, %v2348_v11, 0.0  ;;  %v2350_v13 = vpop.eup %2349 }
 0x7d3   :  { %1064 = vadd.xlane.f32.xlu0 %v1063_v12  ;;  %v1066_v14 = vsel %vm481_vm2, %v2350_v13, 0.0 }
 0x7d7   :  { %1067 = vadd.xlane.f32.xlu0 %v1066_v14 }
 0x7ed   :  { %1233 = vrot.lane.b32.xlu0 %v2768_v47, %s2501_s5 }
 0x7f1   :  { %1282 = vrot.lane.b32.xlu0 %v2752_v33, %s2507_s19 }
 0x85c   :  { %v1065_v15 = vpop.xlane.xlu0 %1064 }
 0x85d   :  { %2351 = vrcp.f32 %v1065_v15 }
 0x860   :  { %v1068_v16 = vpop.xlane.xlu0 %1067 }
 0x861   :  { %2353 = vrcp.f32 %v1068_v16 }
 0x864   :  { %v1234_v25 = vpop.permute.xlu0 %1233 }
 0x865   :  { %v1239_v27 = vsel %vm383_vm1, %v1234_v25, 0 }
 0x868   :  { %v1283_v49 = vpop.permute.xlu0 %1282 }
 0x86a   :  { %v2352_v18 = vpop.eup %2351 }
 0x86b   :  { %v1071_v19 = vmul.f32 %v2352_v18, %v2348_v11 }
 0x86d   :  { %v1073_v22 = vpack.c.bf16 %v1071_v19, %v1071_v19 }
 0x86e   :  { %v2354_v23 = vpop.eup %2353 }
 0x86f   :  { %2185 = vmatmul.mubr.msk.bf16.vlgmr.msra.gmra.mxu0 %vm481_vm2, %v1073_v22  ;;  %v1072_v24 = vmul.f32 %v2354_v23, %v2350_v13 }
 0x870   :  { %2195 = vmatpush3.bf16.msra.mxu0 %v2287_v20  ;;  %2198 = vmatprep.mubr.msk.bf16.mxu0 %vm2506_vm0, %v2505_v21 }
 0x871   :  { %v1074_v26 = vpack.c.bf16 %v1072_v24, %v1072_v24  ;;  %2196 = vmatprep.subr.bf16.mxu0 %v2505_v21 }
 0x873   :  { %2191 = vmatmul.mubr.msk.bf16.vlgmr.msra.gmra.mxu1 %vm481_vm2, %v1074_v26 }
 0x874   :  { %2203 = vmatpush3.bf16.xpose.msra.mxu1 %v1239_v27  ;;  %2204 = vmatprep.mubr.msk.bf16.mxu1 %vm2506_vm0, %v2505_v21 }
 0x875   :  { %2214 = vmatprep.subr.bf16.mxu1 %v2505_v21  ;;  %2197 = vmatpush3.bf16.msra.mxu0 %v2288_v32  ;;  %v2290_v32 = vld [vmem:[#allocation7 + $0x30] sm:$0xff]  }
 0x876   :  { %2208 = vmatprep.subr.bf16.mxu0 %v2505_v21 }
 0x87b   :  { %2205 = vmatmul.mubr.msk.bf16.vlgmr.msra.gmra.mxu1 %vm383_vm1, %v1232_v29 }
 0x87c   :  { %2216 = vmatprep.mubr.msk.bf16.mxu1 %vm2506_vm0, %v2505_v21 }
 0x92f   :  { %v1115_v42 = vpop.f32.mrf.mxu0 }
 0x931   :  { %v2186_v46 = vpop.f32.mrf.mxu0 }
 0x932   :  { %v2296_v46 = vld [vmem:[#allocation8 + $0x64] ss:$8 sps:$4 sm:$0xff]  }
 0x933   :  { %v1118_v34 = vpop.f32.mrf.mxu0  ;;  %v1161_v35 = vpop.f32.mrf.mxu1 }
 0x934   :  { %v1167_v36 = vpack.c.bf16 %v1161_v35, %v1115_v42  ;;  %v2293_v42 = vld [vmem:[#allocation8 + $0x74] ss:$8 sps:$4 sm:$0xff]   ;;  %v2294_v34 = vld [vmem:[#allocation8 + $0x60] ss:$8 sps:$4 sm:$0xff]  }
 0x935   :  { %v2187_v37 = vpop.f32.mrf.mxu0  ;;  %v2192_v38 = vpop.f32.mrf.mxu1  ;;  %v2299_v35 = vld [vmem:[#allocation8 + $0x54] ss:$8 sps:$4 sm:$0xff]  }
 0x936   :  { %2199 = vmatmul.mubr.msk.bf16.vlgmr.msra.gmra.mxu0 %vm383_vm1, %v1167_v36  ;;  %v2297_v36 = vld [vmem:[#allocation8 + $0x50] ss:$8 sps:$4 sm:$0xff]   ;;  %v2302_v37 = vld [vmem:[#allocation8 + $0x44] ss:$8 sps:$4 sm:$0xff]  }
 0x937   :  { %2209 = vmatpush3.bf16.xpose.msra.mxu0 %v1290_v39  ;;  %v1164_v40 = vpop.f32.mrf.mxu1  ;;  %2210 = vmatprep.mubr.msk.bf16.mxu0 %vm2506_vm0, %v2505_v21 }
 0x938   :  { %2220 = vmatprep.subr.bf16.mxu0 %v2505_v21 }
 0x939   :  { %v2193_v41 = vpop.f32.mrf.mxu1 }
 0x93b   :  { %v1275_v43 = vpop.f32.mrf.mxu1 }
 0x93c   :  { %v1332_v45 = vmul.f32 0.17677669, %v1275_v43 }
 0x93d   :  { %v2206_v50 = vpop.f32.mrf.mxu1 }
 0x93e   :  { %2211 = vmatmul.mubr.msk.bf16.vlgmr.msra.gmra.mxu0 %vm383_vm1, %v1283_v49  ;;  %v1334_v52 = vsel %vm481_vm2, %v1332_v45, -inf  ;;  %v2303_v49 = vld [vmem:[#allocation8 + $0x30] ss:$8 sps:$4 sm:$0xff]   ;;  %v2308_v50 = vld [vmem:[#allocation8 + $0x24] ss:$8 sps:$4 sm:$0xff]  }
 0x93f   :  { %1335 = vmax.xlane.f32.xlu1 %v1334_v52  ;;  %v1278_v53 = vpop.f32.mrf.mxu1  ;;  %2222 = vmatprep.mubr.msk.bf16.mxu0 %vm2506_vm0, %v2505_v21  ;;  %v2306_v52 = vld [vmem:[#allocation8 + $0x20] ss:$8 sps:$4 sm:$0xff]  }
 0x940   :  { %v2311_v53 = vld [vmem:[#allocation8 + $0x14] ss:$8 sps:$4 sm:$0xff]  }
 0x941   :  { %v2207_v44 = vpop.f32.mrf.mxu1 }
 0x942   :  { %v2309_v44 = vld [vmem:[#allocation8 + $0x10] ss:$8 sps:$4 sm:$0xff]  }
 0x9c8   :  { %v1336_v54 = vpop.xlane.xlu1 %1335 }
 0x9c9   :  { %v1340_v55 = vsub.f32 %v1332_v45, %v1336_v54  ;;  %v2305_v45 = vld [vmem:[#allocation8 + $0x34] ss:$8 sps:$4 sm:$0xff]   ;;  %v2314_v54 = vld [vmem:[#allocation8 + $0x4] ss:$8 sps:$4 sm:$0xff]  }
 0x9cb   :  { %v1342_v56 = vmul.f32 1.442695, %v1340_v55  ;;  %v2312_v55 = vld [vmem:[#allocation8] ss:$8 sps:$4 sm:$0xff]  }
 0x9cd   :  { %2355 = vpow2.f32 %v1342_v56  ;;  %v2315_v56 = vld [vmem:[#allocation10 + $0x78] sm:$0xff]  }
 0x9da   :  { %v2356_v8 = vpop.eup %2355 }
 0x9db   :  { %v1346_v9 = vsel %vm481_vm2, %v2356_v8, 0.0 }
 0x9f6   :  { %v1221_v59 = vpop.f32.mrf.mxu0 }
 0x9f7   :  { %v2820_v61 = vadd.f32 %v1221_v59, %v941_v57  ;;  %v2316_v57 = vld [vmem:[#allocation10 + $0x38] sm:$0xff]   ;;  %v2317_v59 = vld [vmem:[#allocation10 + $0x70] sm:$0xff]  }
 0x9f8   :  { %v2200_v62 = vpop.f32.mrf.mxu0 }
 0x9f9   :  { %v2318_v62 = vld [vmem:[#allocation10 + $0x30] sm:$0xff]  }
 0x9fa   :  { %v1224_v1 = vpop.f32.mrf.mxu0 }
 0x9fb   :  { %v2824_v2 = vadd.f32 %v1224_v1, %v944_v63  ;;  %v2319_v63 = vld [vmem:[#allocation10 + $0x68] sm:$0xff]  }
 0x9fc   :  { %v2201_v3 = vpop.f32.mrf.mxu0  ;;  %v2320_v1 = vld [vmem:[#allocation10 + $0x28] sm:$0xff]  }
 0x9fd   :  { %v2321_v3 = vld [vmem:[#allocation10 + $0x60] sm:$0xff]  }
 0x9fe   :  { %v1326_v4 = vpop.f32.mrf.mxu0 }
 0x9ff   :  { %v1333_v5 = vmul.f32 0.17677669, %v1326_v4  ;;  %v2322_v4 = vld [vmem:[#allocation10 + $0x20] sm:$0xff]  }
 0xa00   :  { %v2212_v6 = vpop.f32.mrf.mxu0 }
 0xa01   :  { %v1337_v7 = vsel %vm481_vm2, %v1333_v5, -inf  ;;  %v2324_v6 = vld [vmem:[#allocation10 + $0x18] sm:$0xff]  }
 0xa02   :  { %1338 = vmax.xlane.f32.xlu0 %v1337_v7  ;;  %v1329_v48 = vpop.f32.mrf.mxu0 }
 0xa04   :  { %v2213_v58 = vpop.f32.mrf.mxu0 }
 0xa06   :  { %1347 = vadd.xlane.f32.xlu0 %v1346_v9 }
 0xa1c   :  { %1358 = vrot.lane.b32.xlu0 %v2768_v47, %s2508_s2  ;;  %v2289_v47 = vld [vmem:[#allocation7 + $0x38] sm:$0xff]  }
 0xa8b   :  { %v1339_v51 = vpop.xlane.xlu0 %1338 }
 0xa8c   :  { %v1341_v60 = vsub.f32 %v1333_v5, %v1339_v51  ;;  %v2323_v5 = vld [vmem:[#allocation10 + $0x58] sm:$0xff]  }
 0xa8e   :  { %v1344_v10 = vmul.f32 1.442695, %v1341_v60  ;;  %v2363_v60 = vld [vmem:[#allocation2] sm:$0xff] }
 0xa8f   :  { %v1348_v11 = vpop.xlane.xlu0 %1347 }
 0xa90   :  { %2357 = vpow2.f32 %v1344_v10 }
 0xa91   :  { %2359 = vrcp.f32 %v1348_v11 }
 0xa93   :  { %v1359_v12 = vpop.permute.xlu0 %1358 }
 0xa94   :  { %v1364_v13 = vsel %vm511_vm3, %v1359_v12, 0  ;;  %v1974_v12 = vld [vmem:[%s2885_s9] ss:$0 sm:$0xff] }
 0xa95   :  { %2215 = vmatpush3.bf16.msra.mxu1 %v1364_v13 }
 0xa96   :  { %2226 = vmatprep.subr.bf16.mxu1 %v2505_v21 }
 0xa9d   :  { %v2358_v14 = vpop.eup %2357 }
 0xa9e   :  { %v2360_v15 = vpop.eup %2359  ;;  %v1349_v16 = vsel %vm481_vm2, %v2358_v14, 0.0 }
 0xa9f   :  { %1350 = vadd.xlane.f32.xlu1 %v1349_v16  ;;  %v1354_v18 = vmul.f32 %v2360_v15, %v2356_v8  ;;  %v1973_v8 = vld [vmem:[%s2880_s4] ss:$0 sm:$0xff]  ;;  %v2364_v16 = vld [vmem:[#allocation2 + $0x8] sm:$0xff] }
 0xaa1   :  { %v1356_v19 = vpack.c.bf16 %v1354_v18, %v1354_v18 }
 0xaa3   :  { %2217 = vmatmul.mubr.msk.bf16.vlgmr.msra.gmra.mxu1 %vm481_vm2, %v1356_v19 }
 0xaa4   :  { %2230 = vmatprep.mubr.msk.bf16.mxu1 %vm2506_vm0, %v2505_v21  ;;  %2227 = vmatpush3.bf16.msra.mxu1 %v2289_v47 }
 0xaa5   :  { %2228 = vmatprep.subr.bf16.mxu1 %v2505_v21  ;;  %v2291_v21 = vld [vmem:[#allocation8 + $0x70] ss:$8 sps:$4 sm:$0xff]  }
 0xaa8   :  { %2229 = vmatpush3.bf16.msra.mxu1 %v2290_v32 }
 0xaa9   :  { %2064 = vmatprep.subr.bf16.mxu1 %v2315_v56 }
 0xab0   :  { %1406 = vrot.lane.b32.xlu1 %v2752_v33, %s2508_s2 }
 0xb28   :  { %v1351_v20 = vpop.xlane.xlu1 %1350 }
 0xb29   :  { %2361 = vrcp.f32 %v1351_v20 }
 0xb2c   :  { %v1407_v22 = vpop.permute.xlu1 %1406 }
 0xb2d   :  { %v1412_v23 = vsel %vm511_vm3, %v1407_v22, 0 }
 0xb2e   :  { %2221 = vmatpush3.bf16.msra.mxu0 %v1412_v23  ;;  %v2325_v23 = vld [vmem:[#allocation10 + $0x50] sm:$0xff]  }
 0xb2f   :  { %1655 = vmatprep.subr.bf16.mxu0 %v2293_v42 }
 0xb36   :  { %v2362_v24 = vpop.eup %2361 }
 0xb37   :  { %v1355_v25 = vmul.f32 %v2362_v24, %v2358_v14  ;;  %v2327_v24 = vld [vmem:[#allocation10 + $0x48] sm:$0xff]  }
 0xb39   :  { %v1357_v26 = vpack.c.bf16 %v1355_v25, %v1355_v25  ;;  %v2328_v25 = vld [vmem:[#allocation10 + $0x8] sm:$0xff]  }
 0xb3b   :  { %2223 = vmatmul.mubr.msk.bf16.vlgmr.msra.gmra.mxu0 %vm481_vm2, %v1357_v26  ;;  %v2329_v26 = vld [vmem:[#allocation10 + $0x40] sm:$0xff]  }
 0xb3c   :  { %1687 = vmatprep.mubr.bf16.mxu0 %v2504_v0  ;;  %1656 = vmatpush1.bf16.msra.mxu0 %v2291_v21  ;;  %v2300_v0 = vld [vmem:[#allocation8 + $0x40] ss:$8 sps:$4 sm:$0xff]  }
 0xb3d   :  { %1657 = vmatprep.subr.bf16.mxu0 %v2296_v46 }
 0xb40   :  { %1658 = vmatpush1.bf16.msra.mxu0 %v2294_v34 }
 0xb41   :  { %1659 = vmatprep.subr.bf16.mxu0 %v2299_v35 }
 0xb44   :  { %1660 = vmatpush1.bf16.msra.mxu0 %v2297_v36 }
 0xb45   :  { %1661 = vmatprep.subr.bf16.mxu0 %v2302_v37 }
 0xb48   :  { %1662 = vmatpush1.bf16.msra.mxu0 %v2300_v0 }
 0xb49   :  { %1663 = vmatprep.subr.bf16.mxu0 %v2305_v45 }
 0xb4c   :  { %1664 = vmatpush1.bf16.msra.mxu0 %v2303_v49 }
 0xb4d   :  { %1665 = vmatprep.subr.bf16.mxu0 %v2308_v50 }
 0xb50   :  { %1666 = vmatpush1.bf16.msra.mxu0 %v2306_v52  ;;  %v2009_v52 = vld [vmem:[%s2887_s11] ss:$0 sm:$0xff] }
 0xb51   :  { %1667 = vmatprep.subr.bf16.mxu0 %v2311_v53 }
 0xb54   :  { %1668 = vmatpush1.bf16.msra.mxu0 %v2309_v44 }
 0xb55   :  { %1669 = vmatprep.subr.bf16.mxu0 %v2314_v54 }
 0xb58   :  { %1670 = vmatpush1.bf16.msra.mxu0 %v2312_v55  ;;  %v2010_v55 = vld [vmem:[%s2888_s12] ss:$0 sm:$0xff] }
 0xb63   :  { %v1400_v27 = vpop.f32.mrf.mxu1 }
 0xb65   :  { %v2218_v28 = vpop.f32.mrf.mxu1 }
 0xb66   :  { %v1563_v28 = vld [vmem:[%s2882_s6] sm:$0x3] }
 0xb67   :  { %v1403_v33 = vpop.f32.mrf.mxu1  ;;  %v1568_v32 = vrot.slane %v1563_v28, %v153_v31 }
 0xb69   :  { %v2219_v29 = vpop.f32.mrf.mxu1 }
 0xb6a   :  { %v1572_v29 = vrot.slane %v1563_v28, %v157_v17 }
 0xbfb   :  { %v1448_v38 = vpop.f32.mrf.mxu0 }
 0xbfc   :  { %v1454_v39 = vpack.c.bf16 %v1448_v38, %v1400_v27  ;;  %v2330_v27 = vld [vmem:[#allocation10] sm:$0xff]  }
 0xbfd   :  { %v2224_v40 = vpop.f32.mrf.mxu0 }
 0xbfe   :  { %2231 = vmatmul.mubr.msk.bf16.vlgmr.msra.gmra.mxu1 %vm383_vm1, %v1454_v39 }
 0xbff   :  { %v1451_v41 = vpop.f32.mrf.mxu0  ;;  %2065 = vmatpush3.bf16.msra.mxu1 %v2316_v57 }
 0xc00   :  { %2066 = vmatprep.subr.bf16.mxu1 %v2317_v59 }
 0xc01   :  { %v2225_v43 = vpop.f32.mrf.mxu0 }
 0xc03   :  { %2067 = vmatpush3.bf16.msra.mxu1 %v2318_v62 }
 0xc04   :  { %2068 = vmatprep.subr.bf16.mxu1 %v2319_v63 }
 0xc07   :  { %2069 = vmatpush3.bf16.msra.mxu1 %v2320_v1 }
 0xc08   :  { %2070 = vmatprep.subr.bf16.mxu1 %v2321_v3 }
 0xc0b   :  { %2071 = vmatpush3.bf16.msra.mxu1 %v2322_v4 }
 0xc0c   :  { %2072 = vmatprep.subr.bf16.mxu1 %v2323_v5 }
 0xc0f   :  { %2073 = vmatpush3.bf16.msra.mxu1 %v2324_v6 }
 0xc10   :  { %2074 = vmatprep.subr.bf16.mxu1 %v2325_v23 }
 0xcbe   :  { %v1508_v7 = vpop.f32.mrf.mxu1 }
 0xcbf   :  { %v1515_v48 = vadd.f32 %v1508_v7, %v2820_v61  ;;  %v1975_v61 = vld [vmem:[%s2886_s10] ss:$0 sm:$0xff] }
 0xcc0   :  { %v2232_v58 = vpop.f32.mrf.mxu1 }
 0xcc1   :  { %v1524_v9 = vadd.f32 %v1973_v8, %v1515_v48 }
 0xcc2   :  { %v1511_v51 = vpop.f32.mrf.mxu1 }
 0xcc3   :  { %v1526_v10 = vadd.f32 %v2363_v60, %v1524_v9  ;;  %v1516_v11 = vadd.f32 %v1511_v51, %v2824_v2  ;;  %v2326_v2 = vld [vmem:[#allocation10 + $0x10] sm:$0xff]  }
 0xcc4   :  { %v2233_v13 = vpop.f32.mrf.mxu1  ;;  %2075 = vmatpush3.bf16.msra.mxu1 %v2326_v2 }
 0xcc5   :  { %v1525_v14 = vadd.f32 %v1973_v8, %v1516_v11  ;;  %v1535_v15 = vmul.f32 %v1974_v12, %v1526_v10  ;;  %2076 = vmatprep.subr.bf16.mxu1 %v2327_v24 }
 0xcc7   :  { %v1527_v18 = vadd.f32 %v2364_v16, %v1525_v14  ;;  %v1544_v47 = vadd.f32 %v1975_v61, %v1535_v15 }
 0xcc8   :  { %2077 = vmatpush3.bf16.msra.mxu1 %v2328_v25 }
 0xcc9   :  { %v1536_v19 = vmul.f32 %v1974_v12, %v1527_v18  ;;  %2078 = vmatprep.subr.bf16.mxu1 %v2329_v26 }
 0xccb   :  { %v1545_v20 = vadd.f32 %v1975_v61, %v1536_v19 }
 0xccc   :  { %2079 = vmatpush3.bf16.msra.mxu1 %v2330_v27 }
 0xccd   :  { %v1546_v22 = vpack.c.bf16 %v1545_v20, %v1544_v47 }
 0xccf   :  { %1688 = vmatmul.mubr.bf16.vlgmr.msra.gmra.mxu0 %v1546_v22 }
 0xd8f   :  { %v1689_v33 = vpop.f32.mrf.mxu0 }
 0xd90   :  { %v1690_v35 = vadd.f32 %v1689_v33, %v1568_v32 }
 0xd91   :  { %v1691_v21 = vpop.f32.mrf.mxu0 }
 0xd92   :  { %v1692_v46 = vadd.f32 %v1691_v21, %v1572_v29  ;;  %v1698_v40 = vmax.f32 %v1690_v35, 0.0 }
 0xd93   :  { %v1693_v42 = vpop.f32.mrf.mxu0 }
 0xd94   :  { %v1694_v34 = vadd.f32 %v1693_v42, %v1568_v32  ;;  %v1699_v38 = vmax.f32 %v1692_v46, 0.0 }
 0xd95   :  { %v1695_v36 = vpop.f32.mrf.mxu0 }
 0xd96   :  { %v1696_v37 = vadd.f32 %v1695_v36, %v1572_v29  ;;  %v1700_v0 = vmax.f32 %v1694_v34, 0.0 }
 0xd98   :  { %v1701_v39 = vmax.f32 %v1696_v37, 0.0  ;;  %v1702_v43 = vpack.c.bf16 %v1700_v0, %v1698_v40 }
 0xd9a   :  { %v1703_v41 = vpack.c.bf16 %v1701_v39, %v1699_v38 }
 0xd9c   :  { %1871 = vmatprep.mubr.bf16.mxu1 %v1703_v41 }
 0xd9d   :  { %1872 = vmatmul.mubr.bf16.vlgmr.msra.gmra.mxu1 %v1702_v43 }
 0xe5d   :  { %v2080_v45 = vpop.f32.mrf.mxu1 }
 0xe5f   :  { %v2081_v31 = vpop.f32.mrf.mxu1 }
 0xe60   :  { %v2082_v17 = vadd.f32 %v2081_v31, %v2080_v45 }
 0xe61   :  { %v2083_v49 = vpop.f32.mrf.mxu1 }
 0xe62   :  { %v1874_v50 = vadd.f32 %v2082_v17, %v1992_v30 }
 0xe63   :  { %v2084_v53 = vpop.f32.mrf.mxu1 }
 0xe64   :  { %v1880_v44 = vadd.f32 %v1874_v50, %v1544_v47  ;;  %v2085_v54 = vadd.f32 %v2084_v53, %v2083_v49 }
 0xe66   :  { %v1889_v56 = vmul.f32 %v2009_v52, %v1880_v44  ;;  %v1877_v57 = vadd.f32 %v2085_v54, %v1992_v30 }
 0xe68   :  { %v1881_v59 = vadd.f32 %v1877_v57, %v1545_v20  ;;  %v1898_v62 = vadd.f32 %v2010_v55, %v1889_v56 }
 0xe6a   :  { %v1890_v63 = vmul.f32 %v2009_v52, %v1881_v59  ;;  %1900 = vst [vmem:[#allocation11] sm:$0xff] %v1898_v62 }
 0xe6c   :  { %v1899_v1 = vadd.f32 %v2010_v55, %v1890_v63 }
 0xe6e   :  { %1901 = vst [vmem:[#allocation11 + $0x8] sm:$0xff] %v1899_v1 }
 0xe6f   :  { %2476 = shalt.err (!%p2473_p1)
}
 0xe70   :  { %1913 = dma.vmem_to_hbm [thread:$0]  %s1908_s30, 256, %s2889_s13, [#allocation4], %s2498_s20, %s2498_s20, %s2499_s21  }
 0xe71   :  { %2491 = dma.done.wait [#allocation4], 256  }
 0xe72   :  { %2492 = vsyncadd [#allocation4], 4294967040 }
 0xe73   :  { %1917 = vsyncpa [#allocation3], 1 }
 0xe74   :  { %1918 = vsyncpa [#allocation6], 1 }
 0xe75   :  { %1919 = vsyncpa [#allocation9], 1 }
 0xe76   :  { %1920 = vsyncpa [#allocation4], 1 }

</bundles_post_ra>
